<compile_context>
chip_gen: v7x
topology: tpu7x:2x2x1
jax: 0.10.0
libtpu: 0.0.40
codegen_flags: <defaults>
</compile_context>

<pallas_src>
import jax
import jax.numpy as jnp
from jax.experimental import pallas as pl
from jax.experimental.pallas import tpu as pltpu


def fused_mlp_kernel(x_ref, w1_ref, b1_ref, w2_ref, b2_ref, o_ref, acc_ref):
    """One (token_tile, f_tile) grid step of Linear -> ReLU -> Linear.

    x:  (tT, H) f32   (cast to bf16 in-kernel; free VPU work under the DMA)
    w1: (H, tF) bf16   b1: (1, tF) f32
    w2: (tF, H) bf16   b2: (1, H)  f32
    o:  (tT, H) bf16   acc: (tT, H) f32 scratch (partial sums over F tiles)
    """
    f = pl.program_id(1)

    @pl.when(f == 0)
    def _():
        acc_ref[...] = jnp.zeros_like(acc_ref)

    x = x_ref[...].astype(jnp.bfloat16)            # in-kernel activation cast
    h = jnp.dot(x, w1_ref[...], preferred_element_type=jnp.float32)
    h = jnp.maximum(h + b1_ref[...], 0.0)          # f32 epilogue (v5e: no bf16 VPU)
    h = h.astype(jnp.bfloat16)                     # bf16 operand for 2nd MXU matmul
    acc_ref[...] += jnp.dot(h, w2_ref[...], preferred_element_type=jnp.float32)

    @pl.when(f == pl.num_programs(1) - 1)
    def _():
        o_ref[...] = (acc_ref[...] + b2_ref[...]).astype(o_ref.dtype)


def _vmem_limit_bytes():
    # ~0.75 * physical VMEM: ~96 MiB on v5e/v6e (128 MiB), ~48 MiB on v7x (64 MiB).
    try:
        cap = getattr(pltpu.get_tpu_info(), "vmem_capacity_bytes", None)
        if cap:
            return min(int(0.75 * cap), 100 * 1024 * 1024)
    except Exception:
        pass
    return 48 * 1024 * 1024  # safe headroom on every generation


def _pick_token_tile(T, max_tile=1024):
    tT = min(T, max_tile)
    # v7x exposes 2 TensorCores; split the 'parallel' token axis evenly across
    # them. Single-TC chips (v5e/v6e) keep a single large tile -> grid=(1, .).
    n_cores = getattr(jax.devices()[0], "num_cores", 1) or 1
    if n_cores > 1 and T > 8:
        per_core = -(-T // n_cores)                 # ceil
        per_core = max(8, ((per_core + 7) // 8) * 8)
        tT = min(tT, per_core)
    return tT


def _pick_f_tile(tT, H, F, vmem_limit):
    # Shrink the F tile (power-of-two steps, multiples of 128) until the weight
    # blocks + (tT, tF) f32 intermediate fit a conservative VMEM budget.
    budget = int(0.6 * vmem_limit)

    def need(tF):
        return 2 * H * tF * 2 + tT * tF * 4 + tF * 4  # w1+w2 bf16, h f32, b1

    tF = F
    while (tF > 128 and need(tF) > budget
           and tF % 2 == 0 and (tF // 2) % 128 == 0):
        tF //= 2
    return tF


def fused_mlp(x2d, w1, b1, w2, b2, *, single_buffer_weights=True):
    """x2d: (T, H) f32; w1: (H, F) bf16; b1: (1, F) f32; w2: (F, H) bf16;
    b2: (1, H) f32. Returns (T, H) bf16 (f32 accumulation inside)."""
    T, H = x2d.shape
    F = w1.shape[1]

    vmem_limit = _vmem_limit_bytes()
    tT = _pick_token_tile(T)
    tF = _pick_f_tile(tT, H, F, vmem_limit)
    n_tok = pl.cdiv(T, tT)
    n_f = pl.cdiv(F, tF)

    def const_spec(shape, index_map):
        # Constant-index blocks only need one VMEM buffer (default is 2).
        if single_buffer_weights and hasattr(pl, "Buffered"):
            return pl.BlockSpec(shape, index_map, pipeline_mode=pl.Buffered(1))
        return pl.BlockSpec(shape, index_map)

    # Weights / b1 are truly constant across grid steps only when F is untiled.
    wspec = const_spec if n_f == 1 else pl.BlockSpec

    flops = 4 * T * H * F  # two matmuls, 2*T*H*F MACs each
    bytes_accessed = (T * H * 4            # x (f32 in)
                      + 2 * H * F * 2      # w1 + w2 (bf16)
                      + (F + H) * 4        # biases (f32)
                      + T * H * 2)         # output (bf16)

    return pl.pallas_call(
        fused_mlp_kernel,
        out_shape=jax.ShapeDtypeStruct((T, H), jnp.bfloat16),
        grid_spec=pltpu.PrefetchScalarGridSpec(
            num_scalar_prefetch=0,
            grid=(n_tok, n_f),
            in_specs=[
                # Activations: tiled along tokens, pipelined/double-buffered.
                pl.BlockSpec((tT, H), lambda i, f: (i, 0)),
                # Weights & biases: resident in VMEM (single-buffered when the
                # block index never changes).
                wspec((H, tF), lambda i, f: (0, f)),
                wspec((1, tF), lambda i, f: (0, f)),
                wspec((tF, H), lambda i, f: (f, 0)),
                const_spec((1, H), lambda i, f: (0, 0)),
            ],
            out_specs=pl.BlockSpec((tT, H), lambda i, f: (i, 0)),
            scratch_shapes=[pltpu.VMEM((tT, H), jnp.float32)],
        ),
        compiler_params=pltpu.CompilerParams(
            # Token tiles independent -> parallel (both TCs on v7x);
            # F axis is a reduction -> arbitrary, last.
            dimension_semantics=("parallel", "arbitrary"),
            vmem_limit_bytes=vmem_limit,
        ),
        cost_estimate=pl.CostEstimate(
            flops=flops, transcendentals=0, bytes_accessed=bytes_accessed),
    )(x2d, w1, b1, w2, b2)


class InnerMLPModel:
    """Concrete inner model wrapped by WrapperModelONNX (Linear-ReLU-Linear)."""

    def __init__(self, hidden, ffn, key):
        k1, k2, k3, k4 = jax.random.split(key, 4)
        self.w1 = jax.random.normal(k1, (hidden, ffn), jnp.float32) / jnp.sqrt(hidden)
        self.b1 = jax.random.normal(k2, (1, ffn), jnp.float32) * 0.01
        self.w2 = jax.random.normal(k3, (ffn, hidden), jnp.float32) / jnp.sqrt(ffn)
        self.b2 = jax.random.normal(k4, (1, hidden), jnp.float32) * 0.01
        # Pre-cast weights once (avoid per-call HBM cast passes). Precision
        # note: bf16 matmul operands with f32 accumulation is an intentional
        # deviation from fp32 PyTorch semantics.
        self.w1_bf16 = self.w1.astype(jnp.bfloat16)
        self.w2_bf16 = self.w2.astype(jnp.bfloat16)

    def __call__(self, x):
        # x: (batch, seq, hidden) f32. The bf16 cast happens inside the kernel.
        B, S, H = x.shape
        x2d = x.reshape(B * S, H)
        try:
            y2d = fused_mlp(x2d, self.w1_bf16, self.b1, self.w2_bf16, self.b2,
                            single_buffer_weights=True)
        except Exception:
            # Fallback for JAX builds where pl.Buffered(1) is not accepted.
            y2d = fused_mlp(x2d, self.w1_bf16, self.b1, self.w2_bf16, self.b2,
                            single_buffer_weights=False)
        return y2d.reshape(B, S, H)  # bf16 output (f32 accumulate inside)


class WrapperModelONNX:
    """JAX/Pallas analogue of the PyTorch WrapperModelONNX wrapper."""

    def __init__(self, model):
        self.model = model

    def prepare_for_onnx_export(self):
        # TODO(synk): onnx_trace flags / requires_grad toggles have no JAX
        # equivalent (JAX params are plain arrays); this is a no-op here.
        pass

    def forward(self, *args, **kwargs):
        return self.model(*args, **kwargs)

    def __call__(self, *args, **kwargs):
        return self.forward(*args, **kwargs)


if __name__ == "__main__":
    key = jax.random.PRNGKey(0)
    k_param, k_x = jax.random.split(key)

    # Small but lane-aligned shapes: H, F multiples of 128; T=512 fits a single
    # token tile -> grid=(1, 1) on single-TC chips.
    batch, seq, hidden, ffn = 2, 256, 128, 256
    inner = InnerMLPModel(hidden, ffn, k_param)
    wrapper = WrapperModelONNX(inner)
    wrapper.prepare_for_onnx_export()

    x = jax.random.normal(k_x, (batch, seq, hidden), jnp.float32)

    out = jax.block_until_ready(wrapper(x))
    assert out.shape == (batch, seq, hidden)
    assert out.dtype == jnp.bfloat16

    # Reference in plain JAX, reproducing the same bf16 casts so the remaining
    # differences are accumulation-order / 1-ULP bf16 rounding only.
    def bf(a):
        return a.astype(jnp.bfloat16).astype(jnp.float32)

    x2 = bf(x.reshape(-1, hidden))
    w1 = bf(inner.w1)
    w2 = bf(inner.w2)
    h = jnp.maximum(
        jnp.dot(x2, w1, precision=jax.lax.Precision.HIGHEST) + inner.b1, 0.0)
    h = bf(h)
    ref = jnp.dot(h, w2, precision=jax.lax.Precision.HIGHEST) + inner.b2
    ref = bf(ref).reshape(batch, seq, hidden)

    out_f32 = out.astype(jnp.float32)
    assert jnp.allclose(out_f32, ref, atol=3e-2, rtol=3e-2), (
        float(jnp.max(jnp.abs(out_f32 - ref))))

    print("KERNEL_OK")
</pallas_src>

<mosaic_0001>
module attributes {stable_mosaic.version = 11 : i64} {
  func.func @fused_mlp_kernel(%arg0: i32, %arg1: i32, %arg2: memref<512x128xf32, #tpu.memory_space<vmem>>, %arg3: memref<128x256xbf16, #tpu.memory_space<vmem>>, %arg4: memref<1x256xf32, #tpu.memory_space<vmem>>, %arg5: memref<256x128xbf16, #tpu.memory_space<vmem>>, %arg6: memref<1x128xf32, #tpu.memory_space<vmem>>, %arg7: memref<512x128xbf16, #tpu.memory_space<vmem>>, %arg8: memref<512x128xf32, #tpu.memory_space<vmem>>) attributes {dimension_semantics = [#tpu.dimension_semantics<parallel>, #tpu.dimension_semantics<arbitrary>], iteration_bounds = array<i64: 1, 1>, scalar_prefetch = 0 : i64, scratch_operands = 1 : i64, tpu.core_type = #tpu.core_type<tc>, window_params = [{transform_indices = @transform_0, window_bounds = array<i64: 512, 128>}, {pipeline_mode = #tpu.pipeline_mode<synchronous>, transform_indices = @transform_1, window_bounds = array<i64: 128, 256>}, {pipeline_mode = #tpu.pipeline_mode<synchronous>, transform_indices = @transform_2, window_bounds = array<i64: 1, 256>}, {pipeline_mode = #tpu.pipeline_mode<synchronous>, transform_indices = @transform_3, window_bounds = array<i64: 256, 128>}, {pipeline_mode = #tpu.pipeline_mode<synchronous>, transform_indices = @transform_4, window_bounds = array<i64: 1, 128>}, {transform_indices = @transform_5, window_bounds = array<i64: 512, 128>}]} {
    %c0_i32 = arith.constant 0 : i32
    %0 = arith.cmpi eq, %arg1, %c0_i32 : i32
    %1 = arith.extui %0 : i1 to i32
    %c0_i32_0 = arith.constant 0 : i32
    %2 = arith.cmpi ne, %1, %c0_i32_0 : i32
    scf.if %2 {
      %cst_16 = arith.constant 0.000000e+00 : f32
      %21 = vector.broadcast %cst_16 : f32 to vector<512x128xf32>
      %c0_17 = arith.constant 0 : index
      %c0_18 = arith.constant 0 : index
      %22 = vector.load %arg8[%c0_17, %c0_18] : memref<512x128xf32, #tpu.memory_space<vmem>>, vector<512x128xf32>
      tpu.vector_store %arg8[%c0_17, %c0_18], %21 {strides = array<i32>} : memref<512x128xf32, #tpu.memory_space<vmem>>, vector<512x128xf32>,
    } else {
    }
    %c0 = arith.constant 0 : index
    %c0_1 = arith.constant 0 : index
    %3 = vector.load %arg2[%c0, %c0_1] : memref<512x128xf32, #tpu.memory_space<vmem>>, vector<512x128xf32>
    %4 = arith.truncf %3 : vector<512x128xf32> to vector<512x128xbf16>
    %c0_2 = arith.constant 0 : index
    %c0_3 = arith.constant 0 : index
    %5 = vector.load %arg3[%c0_2, %c0_3] : memref<128x256xbf16, #tpu.memory_space<vmem>>, vector<128x256xbf16>
    %cst = arith.constant dense<0.000000e+00> : vector<512x256xf32>
    %6 = tpu.matmul %4, %5, %cst {dimension_numbers = #tpu.dot_dimension_numbers<[1], [0], [0], [1], [0, 0, 1, 1], [], []>} : vector<512x128xbf16>, vector<128x256xbf16>, vector<512x256xf32> -> vector<512x256xf32>
    %c0_4 = arith.constant 0 : index
    %c0_5 = arith.constant 0 : index
    %7 = vector.load %arg4[%c0_4, %c0_5] : memref<1x256xf32, #tpu.memory_space<vmem>>, vector<1x256xf32>
    %8 = vector.broadcast %7 : vector<1x256xf32> to vector<512x256xf32>
    %9 = arith.addf %6, %8 : vector<512x256xf32>
    %cst_6 = arith.constant 0.000000e+00 : f32
    %10 = vector.broadcast %cst_6 : f32 to vector<512x256xf32>
    %11 = arith.maximumf %9, %10 : vector<512x256xf32>
    %12 = arith.truncf %11 : vector<512x256xf32> to vector<512x256xbf16>
    %c0_7 = arith.constant 0 : index
    %c0_8 = arith.constant 0 : index
    %13 = vector.load %arg8[%c0_7, %c0_8] : memref<512x128xf32, #tpu.memory_space<vmem>>, vector<512x128xf32>
    %c0_9 = arith.constant 0 : index
    %c0_10 = arith.constant 0 : index
    %14 = vector.load %arg5[%c0_9, %c0_10] : memref<256x128xbf16, #tpu.memory_space<vmem>>, vector<256x128xbf16>
    %cst_11 = arith.constant dense<0.000000e+00> : vector<512x128xf32>
    %15 = tpu.matmul %12, %14, %cst_11 {dimension_numbers = #tpu.dot_dimension_numbers<[1], [0], [0], [1], [0, 0, 1, 1], [], []>} : vector<512x256xbf16>, vector<256x128xbf16>, vector<512x128xf32> -> vector<512x128xf32>
    %16 = arith.addf %13, %15 : vector<512x128xf32>
    %c0_12 = arith.constant 0 : index
    %c0_13 = arith.constant 0 : index
    %17 = vector.load %arg8[%c0_12, %c0_13] : memref<512x128xf32, #tpu.memory_space<vmem>>, vector<512x128xf32>
    tpu.vector_store %arg8[%c0_12, %c0_13], %16 {strides = array<i32>} : memref<512x128xf32, #tpu.memory_space<vmem>>, vector<512x128xf32>,
    %c0_i32_14 = arith.constant 0 : i32
    %18 = arith.cmpi eq, %arg1, %c0_i32_14 : i32
    %19 = arith.extui %18 : i1 to i32
    %c0_i32_15 = arith.constant 0 : i32
    %20 = arith.cmpi ne, %19, %c0_i32_15 : i32
    scf.if %20 {
      %c0_16 = arith.constant 0 : index
      %c0_17 = arith.constant 0 : index
      %21 = vector.load %arg8[%c0_16, %c0_17] : memref<512x128xf32, #tpu.memory_space<vmem>>, vector<512x128xf32>
      %c0_18 = arith.constant 0 : index
      %c0_19 = arith.constant 0 : index
      %22 = vector.load %arg6[%c0_18, %c0_19] : memref<1x128xf32, #tpu.memory_space<vmem>>, vector<1x128xf32>
      %23 = vector.broadcast %22 : vector<1x128xf32> to vector<512x128xf32>
      %24 = arith.addf %21, %23 : vector<512x128xf32>
      %25 = arith.truncf %24 : vector<512x128xf32> to vector<512x128xbf16>
      %c0_20 = arith.constant 0 : index
      %c0_21 = arith.constant 0 : index
      %26 = vector.load %arg7[%c0_20, %c0_21] : memref<512x128xbf16, #tpu.memory_space<vmem>>, vector<512x128xbf16>
      tpu.vector_store %arg7[%c0_20, %c0_21], %25 {strides = array<i32>} : memref<512x128xbf16, #tpu.memory_space<vmem>>, vector<512x128xbf16>,
    } else {
    }
    return
  }
  func.func @transform_0(%arg0: i32, %arg1: i32) -> (i32, i32) {
    %c0_i32 = arith.constant 0 : i32
    %c0_i32_0 = arith.constant 0 : i32
    return %arg0, %c0_i32 : i32, i32
  }
  func.func @transform_1(%arg0: i32, %arg1: i32) -> (i32, i32) {
    %c0_i32 = arith.constant 0 : i32
    %c0_i32_0 = arith.constant 0 : i32
    return %c0_i32, %arg1 : i32, i32
  }
  func.func @transform_2(%arg0: i32, %arg1: i32) -> (i32, i32) {
    %c0_i32 = arith.constant 0 : i32
    %c0_i32_0 = arith.constant 0 : i32
    return %c0_i32, %arg1 : i32, i32
  }
  func.func @transform_3(%arg0: i32, %arg1: i32) -> (i32, i32) {
    %c0_i32 = arith.constant 0 : i32
    %c0_i32_0 = arith.constant 0 : i32
    return %arg1, %c0_i32 : i32, i32
  }
  func.func @transform_4(%arg0: i32, %arg1: i32) -> (i32, i32) {
    %c0_i32 = arith.constant 0 : i32
    %c0_i32_0 = arith.constant 0 : i32
    %c0_i32_1 = arith.constant 0 : i32
    return %c0_i32, %c0_i32_0 : i32, i32
  }
  func.func @transform_5(%arg0: i32, %arg1: i32) -> (i32, i32) {
    %c0_i32 = arith.constant 0 : i32
    %c0_i32_0 = arith.constant 0 : i32
    return %arg0, %c0_i32 : i32, i32
  }
}

module attributes {stable_mosaic.version = 11 : i64} {
  func.func @fused_mlp_kernel(%arg0: i32, %arg1: i32, %arg2: memref<512x128xf32, #tpu.memory_space<vmem>>, %arg3: memref<128x256xbf16, #tpu.memory_space<vmem>>, %arg4: memref<1x256xf32, #tpu.memory_space<vmem>>, %arg5: memref<256x128xbf16, #tpu.memory_space<vmem>>, %arg6: memref<1x128xf32, #tpu.memory_space<vmem>>, %arg7: memref<512x128xbf16, #tpu.memory_space<vmem>>, %arg8: memref<512x128xf32, #tpu.memory_space<vmem>>) attributes {dimension_semantics = [#tpu.dimension_semantics<parallel>, #tpu.dimension_semantics<arbitrary>], iteration_bounds = array<i64: 1, 1>, scalar_prefetch = 0 : i64, scratch_operands = 1 : i64, tpu.core_type = #tpu.core_type<tc>, window_params = [{transform_indices = @transform_0, window_bounds = array<i64: 512, 128>}, {transform_indices = @transform_1, window_bounds = array<i64: 128, 256>}, {transform_indices = @transform_2, window_bounds = array<i64: 1, 256>}, {transform_indices = @transform_3, window_bounds = array<i64: 256, 128>}, {pipeline_mode = #tpu.pipeline_mode<synchronous>, transform_indices = @transform_4, window_bounds = array<i64: 1, 128>}, {transform_indices = @transform_5, window_bounds = array<i64: 512, 128>}]} {
    %c0_i32 = arith.constant 0 : i32
    %0 = arith.cmpi eq, %arg1, %c0_i32 : i32
    %1 = arith.extui %0 : i1 to i32
    %c0_i32_0 = arith.constant 0 : i32
    %2 = arith.cmpi ne, %1, %c0_i32_0 : i32
    scf.if %2 {
      %cst_16 = arith.constant 0.000000e+00 : f32
      %21 = vector.broadcast %cst_16 : f32 to vector<512x128xf32>
      %c0_17 = arith.constant 0 : index
      %c0_18 = arith.constant 0 : index
      %22 = vector.load %arg8[%c0_17, %c0_18] : memref<512x128xf32, #tpu.memory_space<vmem>>, vector<512x128xf32>
      tpu.vector_store %arg8[%c0_17, %c0_18], %21 {strides = array<i32>} : memref<512x128xf32, #tpu.memory_space<vmem>>, vector<512x128xf32>,
    } else {
    }
    %c0 = arith.constant 0 : index
    %c0_1 = arith.constant 0 : index
    %3 = vector.load %arg2[%c0, %c0_1] : memref<512x128xf32, #tpu.memory_space<vmem>>, vector<512x128xf32>
    %4 = arith.truncf %3 : vector<512x128xf32> to vector<512x128xbf16>
    %c0_2 = arith.constant 0 : index
    %c0_3 = arith.constant 0 : index
    %5 = vector.load %arg3[%c0_2, %c0_3] : memref<128x256xbf16, #tpu.memory_space<vmem>>, vector<128x256xbf16>
    %cst = arith.constant dense<0.000000e+00> : vector<512x256xf32>
    %6 = tpu.matmul %4, %5, %cst {dimension_numbers = #tpu.dot_dimension_numbers<[1], [0], [0], [1], [0, 0, 1, 1], [], []>} : vector<512x128xbf16>, vector<128x256xbf16>, vector<512x256xf32> -> vector<512x256xf32>
    %c0_4 = arith.constant 0 : index
    %c0_5 = arith.constant 0 : index
    %7 = vector.load %arg4[%c0_4, %c0_5] : memref<1x256xf32, #tpu.memory_space<vmem>>, vector<1x256xf32>
    %8 = vector.broadcast %7 : vector<1x256xf32> to vector<512x256xf32>
    %9 = arith.addf %6, %8 : vector<512x256xf32>
    %cst_6 = arith.constant 0.000000e+00 : f32
    %10 = vector.broadcast %cst_6 : f32 to vector<512x256xf32>
    %11 = arith.maximumf %9, %10 : vector<512x256xf32>
    %12 = arith.truncf %11 : vector<512x256xf32> to vector<512x256xbf16>
    %c0_7 = arith.constant 0 : index
    %c0_8 = arith.constant 0 : index
    %13 = vector.load %arg8[%c0_7, %c0_8] : memref<512x128xf32, #tpu.memory_space<vmem>>, vector<512x128xf32>
    %c0_9 = arith.constant 0 : index
    %c0_10 = arith.constant 0 : index
    %14 = vector.load %arg5[%c0_9, %c0_10] : memref<256x128xbf16, #tpu.memory_space<vmem>>, vector<256x128xbf16>
    %cst_11 = arith.constant dense<0.000000e+00> : vector<512x128xf32>
    %15 = tpu.matmul %12, %14, %cst_11 {dimension_numbers = #tpu.dot_dimension_numbers<[1], [0], [0], [1], [0, 0, 1, 1], [], []>} : vector<512x256xbf16>, vector<256x128xbf16>, vector<512x128xf32> -> vector<512x128xf32>
    %16 = arith.addf %13, %15 : vector<512x128xf32>
    %c0_12 = arith.constant 0 : index
    %c0_13 = arith.constant 0 : index
    %17 = vector.load %arg8[%c0_12, %c0_13] : memref<512x128xf32, #tpu.memory_space<vmem>>, vector<512x128xf32>
    tpu.vector_store %arg8[%c0_12, %c0_13], %16 {strides = array<i32>} : memref<512x128xf32, #tpu.memory_space<vmem>>, vector<512x128xf32>,
    %c0_i32_14 = arith.constant 0 : i32
    %18 = arith.cmpi eq, %arg1, %c0_i32_14 : i32
    %19 = arith.extui %18 : i1 to i32
    %c0_i32_15 = arith.constant 0 : i32
    %20 = arith.cmpi ne, %19, %c0_i32_15 : i32
    scf.if %20 {
      %c0_16 = arith.constant 0 : index
      %c0_17 = arith.constant 0 : index
      %21 = vector.load %arg8[%c0_16, %c0_17] : memref<512x128xf32, #tpu.memory_space<vmem>>, vector<512x128xf32>
      %c0_18 = arith.constant 0 : index
      %c0_19 = arith.constant 0 : index
      %22 = vector.load %arg6[%c0_18, %c0_19] : memref<1x128xf32, #tpu.memory_space<vmem>>, vector<1x128xf32>
      %23 = vector.broadcast %22 : vector<1x128xf32> to vector<512x128xf32>
      %24 = arith.addf %21, %23 : vector<512x128xf32>
      %25 = arith.truncf %24 : vector<512x128xf32> to vector<512x128xbf16>
      %c0_20 = arith.constant 0 : index
      %c0_21 = arith.constant 0 : index
      %26 = vector.load %arg7[%c0_20, %c0_21] : memref<512x128xbf16, #tpu.memory_space<vmem>>, vector<512x128xbf16>
      tpu.vector_store %arg7[%c0_20, %c0_21], %25 {strides = array<i32>} : memref<512x128xbf16, #tpu.memory_space<vmem>>, vector<512x128xbf16>,
    } else {
    }
    return
  }
  func.func @transform_0(%arg0: i32, %arg1: i32) -> (i32, i32) {
    %c0_i32 = arith.constant 0 : i32
    %c0_i32_0 = arith.constant 0 : i32
    return %arg0, %c0_i32 : i32, i32
  }
  func.func @transform_1(%arg0: i32, %arg1: i32) -> (i32, i32) {
    %c0_i32 = arith.constant 0 : i32
    %c0_i32_0 = arith.constant 0 : i32
    return %c0_i32, %arg1 : i32, i32
  }
  func.func @transform_2(%arg0: i32, %arg1: i32) -> (i32, i32) {
    %c0_i32 = arith.constant 0 : i32
    %c0_i32_0 = arith.constant 0 : i32
    return %c0_i32, %arg1 : i32, i32
  }
  func.func @transform_3(%arg0: i32, %arg1: i32) -> (i32, i32) {
    %c0_i32 = arith.constant 0 : i32
    %c0_i32_0 = arith.constant 0 : i32
    return %arg1, %c0_i32 : i32, i32
  }
  func.func @transform_4(%arg0: i32, %arg1: i32) -> (i32, i32) {
    %c0_i32 = arith.constant 0 : i32
    %c0_i32_0 = arith.constant 0 : i32
    %c0_i32_1 = arith.constant 0 : i32
    return %c0_i32, %c0_i32_0 : i32, i32
  }
  func.func @transform_5(%arg0: i32, %arg1: i32) -> (i32, i32) {
    %c0_i32 = arith.constant 0 : i32
    %c0_i32_0 = arith.constant 0 : i32
    return %arg0, %c0_i32 : i32, i32
  }
}

</mosaic_0001>

<bundles_post_ra>
// kernel: tpu_custom_call.1
= control target key start
LH: loop header
LB: loop body
LE: loop exit
PB: predicated region body
PF: predicated region fallthrough
CT: control target
= control target key end

     0   :  { %10 = vsyncpa [#allocation4], 0  ;;  %s2872_s0 = inlined_call_operand.hbm [shape: f32[512,128], index: 0, kind: input, shape index: {}]   ;;  %s2873_s1 = inlined_call_operand.hbm [shape: bf16[128,256], index: 1, kind: input, shape index: {}]   ;;  %s2874_s2 = inlined_call_operand.vmem [shape: f32[1,256], index: 2, kind: input, shape index: {}]   ;;  %s2875_s3 = inlined_call_operand.hbm [shape: bf16[256,128], index: 3, kind: input, shape index: {}]   ;;  %s2876_s4 = inlined_call_operand.vmem [shape: f32[1,128], index: 4, kind: input, shape index: {}]   ;;  %s2877_s5 = inlined_call_operand.hbm [shape: bf16[512,128], index: 5, kind: output, shape index: {}]  }
   0x1   :  { %11 = vsyncpa [#allocation7], 0 }
   0x2   :  { %12 = vsyncpa [#allocation5], 0  ;;  %s2492_s18 = smov [#allocation6]   ;;  %s2493_s20 = smov [#allocation3]  }
   0x3   :  { %s30_s19 = sshll.u32 %s2492_s18, 4  ;;  %s18_s21 = sshll.u32 %s2493_s20, 4  ;;  %s31_s19 = int_to_ptr.vmem [resolvable:$true] %s30_s19  ;;  %s2531_s21 = int_to_ptr.vmem [resolvable:$true] %s18_s21 }
   0x4   :  { %s2398_s24 = scalar_lea.hbm %s2873_s1, 2048 }
   0x5   :  { %p2399_p0 = scmp.ne.s32.totalorder %s2873_s1, %s2398_s24  ;;  %p2402_p1 = scmp.lt.u32.totalorder %s2398_s24, %s2873_s1 }
   0x7   :  { %p2404_p2 = pnand %p2402_p1, %p2399_p0 }
   0x9   :  { %2407 = shalt.err (!%p2404_p2)
}
   0xa   :  { %s2408_s29 = scalar_lea.vmem %s31_s19, 2048  ;;  %p2413_p4 = scmp.lt.s32.totalorder %s31_s19, %s31_s19 }
   0xb   :  { %p2409_p3 = scmp.ne.s32.totalorder %s31_s19, %s2408_s29  ;;  %p2414_p5 = scmp.lt.s32.totalorder %s2408_s29, %s2408_s29 }
   0xd   :  { %p2415_p6 = por %p2414_p5, %p2413_p4 }
   0xf   :  { %p2416_p7 = pnand %p2415_p6, %p2409_p3 }
  0x11   :  { %2419 = shalt.err (!%p2416_p7)
}
  0x12   :  { %s2494_s30 = smov 128   ;;  %s2495_s6 = smov 8  }
  0x13   :  { %36 = dma.hbm_to_vmem [thread:$0]  %s2873_s1, 2048, %s31_s19, [#allocation7], %s2494_s30, %s2494_s30, %s2495_s6  }
  0x14   :  { %s2420_s11 = scalar_lea.hbm %s2872_s0, 8192 }
  0x15   :  { %p2421_p8 = scmp.ne.s32.totalorder %s2872_s0, %s2420_s11  ;;  %p2424_p9 = scmp.lt.u32.totalorder %s2420_s11, %s2872_s0 }
  0x17   :  { %p2426_p10 = pnand %p2424_p9, %p2421_p8 }
  0x19   :  { %2429 = shalt.err (!%p2426_p10)
}
  0x1a   :  { %s2430_s16 = scalar_lea.vmem %s2531_s21, 8192  ;;  %p2435_p12 = scmp.lt.s32.totalorder %s2531_s21, %s2531_s21 }
  0x1b   :  { %p2431_p11 = scmp.ne.s32.totalorder %s2531_s21, %s2430_s16  ;;  %p2436_p13 = scmp.lt.s32.totalorder %s2430_s16, %s2430_s16 }
  0x1d   :  { %p2437_p0 = por %p2436_p13, %p2435_p12 }
  0x1f   :  { %p2438_p1 = pnand %p2437_p0, %p2431_p11 }
  0x21   :  { %2441 = shalt.err (!%p2438_p1)
}
  0x22   :  { %24 = dma.hbm_to_vmem [thread:$0]  %s2872_s0, 8192, %s2531_s21, [#allocation4], %s2494_s30, %s2494_s30, %s2495_s6  }
  0x23   :  { %s2496_s18 = smov [#allocation8]   ;;  %s2442_s23 = scalar_lea.hbm %s2875_s3, 2048 }
  0x24   :  { %s44_s19 = sshll.u32 %s2496_s18, 4  ;;  %p2443_p2 = scmp.ne.s32.totalorder %s2875_s3, %s2442_s23  ;;  %s45_s19 = int_to_ptr.vmem [resolvable:$true] %s44_s19 }
  0x25   :  { %p2446_p3 = scmp.lt.u32.totalorder %s2442_s23, %s2875_s3 }
  0x27   :  { %p2448_p4 = pnand %p2446_p3, %p2443_p2 }
  0x29   :  { %2451 = shalt.err (!%p2448_p4)
}
  0x2a   :  { %s2452_s28 = scalar_lea.vmem %s45_s19, 2048  ;;  %p2457_p6 = scmp.lt.s32.totalorder %s45_s19, %s45_s19 }
  0x2b   :  { %p2453_p5 = scmp.ne.s32.totalorder %s45_s19, %s2452_s28  ;;  %p2458_p7 = scmp.lt.s32.totalorder %s2452_s28, %s2452_s28 }
  0x2d   :  { %p2459_p8 = por %p2458_p7, %p2457_p6 }
  0x2f   :  { %p2460_p9 = pnand %p2459_p8, %p2453_p5 }
  0x31   :  { %2463 = shalt.err (!%p2460_p9)
}
  0x32   :  { %s2497_s0 = smov 64   ;;  %s2498_s21 = smov 4  }
  0x33   :  { %50 = dma.hbm_to_vmem [thread:$0]  %s2875_s3, 2048, %s45_s19, [#allocation7], %s2497_s0, %s2497_s0, %s2498_s21  }
  0x34   :  { %2486 = dma.done.wait [#allocation4], 8192  }
  0x35   :  { %2487 = vsyncadd [#allocation4], 4294959104 }
  0x36   :  { %2488 = dma.done.wait [#allocation7], 4096  }
  0x37   :  { %2489 = vsyncadd [#allocation7], 4294963200  ;;  %v2499_v0 = vmov 0   ;;  %v2358_v1 = vld [vmem:[#allocation6 + $0x4] ss:$8 sps:$4 sm:$0xff]   ;;  %v133_v20 = vld [vmem:[#allocation3 + $0x10] sm:$0xff] }
  0x38   :  { %367 = vmatprep.mubr.bf16.mxu0 %v2499_v0  ;;  %2317 = vmatprep.subr.bf16.mxu1 %v2499_v0  ;;  %v2360_v2 = vld [vmem:[#allocation6] ss:$8 sps:$4 sm:$0xff]   ;;  %v2361_v3 = vld [vmem:[#allocation6 + $0x14] ss:$8 sps:$4 sm:$0xff]   ;;  %v2363_v4 = vld [vmem:[#allocation6 + $0x10] ss:$8 sps:$4 sm:$0xff]  }
  0x39   :  { %335 = vmatprep.subr.bf16.mxu0 %v2358_v1  ;;  %v2364_v5 = vld [vmem:[#allocation6 + $0x24] ss:$8 sps:$4 sm:$0xff]   ;;  %v2366_v6 = vld [vmem:[#allocation6 + $0x20] ss:$8 sps:$4 sm:$0xff]   ;;  %v2367_v7 = vld [vmem:[#allocation6 + $0x34] ss:$8 sps:$4 sm:$0xff]  }
  0x3a   :  { %336 = vmatpush1.bf16.msra.mxu0 %v2360_v2  ;;  %v2369_v8 = vld [vmem:[#allocation6 + $0x30] ss:$8 sps:$4 sm:$0xff]   ;;  %v2370_v9 = vld [vmem:[#allocation6 + $0x44] ss:$8 sps:$4 sm:$0xff]   ;;  %v2372_v10 = vld [vmem:[#allocation6 + $0x40] ss:$8 sps:$4 sm:$0xff]  }
  0x3b   :  { %337 = vmatprep.subr.bf16.mxu0 %v2361_v3  ;;  %v2373_v11 = vld [vmem:[#allocation6 + $0x54] ss:$8 sps:$4 sm:$0xff]   ;;  %v2375_v12 = vld [vmem:[#allocation6 + $0x50] ss:$8 sps:$4 sm:$0xff]   ;;  %v2376_v13 = vld [vmem:[#allocation6 + $0x64] ss:$8 sps:$4 sm:$0xff]  }
  0x3c   :  { %v2378_v14 = vld [vmem:[#allocation6 + $0x60] ss:$8 sps:$4 sm:$0xff]   ;;  %v2379_v15 = vld [vmem:[#allocation6 + $0x74] ss:$8 sps:$4 sm:$0xff]   ;;  %v2381_v16 = vld [vmem:[#allocation6 + $0x70] ss:$8 sps:$4 sm:$0xff]  }
  0x3d   :  { %v131_v17 = vld [vmem:[#allocation3] sm:$0xff]  ;;  %v132_v18 = vld [vmem:[#allocation3 + $0x8] sm:$0xff]  ;;  %v134_v21 = vld [vmem:[#allocation3 + $0x18] sm:$0xff] }
  0x3e   :  { %338 = vmatpush1.bf16.msra.mxu0 %v2363_v4  ;;  %v195_v19 = vpack.c.bf16 %v132_v18, %v131_v17  ;;  %v196_v22 = vpack.c.bf16 %v134_v21, %v133_v20  ;;  %v135_v23 = vld [vmem:[#allocation3 + $0x20] sm:$0xff]  ;;  %v136_v24 = vld [vmem:[#allocation3 + $0x28] sm:$0xff]  ;;  %v137_v26 = vld [vmem:[#allocation3 + $0x30] sm:$0xff] }
  0x3f   :  { %339 = vmatprep.subr.bf16.mxu0 %v2364_v5  ;;  %v197_v25 = vpack.c.bf16 %v136_v24, %v135_v23  ;;  %v138_v27 = vld [vmem:[#allocation3 + $0x38] sm:$0xff]  ;;  %v139_v29 = vld [vmem:[#allocation3 + $0x40] sm:$0xff]  ;;  %v140_v30 = vld [vmem:[#allocation3 + $0x48] sm:$0xff] }
  0x40   :  { %v198_v28 = vpack.c.bf16 %v138_v27, %v137_v26  ;;  %v199_v31 = vpack.c.bf16 %v140_v30, %v139_v29  ;;  %v141_v32 = vld [vmem:[#allocation3 + $0x50] sm:$0xff]  ;;  %v142_v33 = vld [vmem:[#allocation3 + $0x58] sm:$0xff]  ;;  %v143_v35 = vld [vmem:[#allocation3 + $0x60] sm:$0xff] }
  0x41   :  { %v200_v34 = vpack.c.bf16 %v142_v33, %v141_v32  ;;  %v144_v36 = vld [vmem:[#allocation3 + $0x68] sm:$0xff]  ;;  %v2382_v37 = vld [vmem:[#allocation8] sm:$0xff]   ;;  %v145_v40 = vld [vmem:[#allocation3 + $0x70] sm:$0xff] }
  0x42   :  { %340 = vmatpush1.bf16.msra.mxu0 %v2366_v6  ;;  %2333 = vmatpush1.bf16.msra.mxu1 %v2382_v37  ;;  %v201_v38 = vpack.c.bf16 %v144_v36, %v143_v35  ;;  %v2383_v39 = vld [vmem:[#allocation8 + $0x8] sm:$0xff]   ;;  %v146_v41 = vld [vmem:[#allocation3 + $0x78] sm:$0xff]  ;;  %v2384_v42 = vld [vmem:[#allocation8 + $0x10] sm:$0xff]  }
  0x43   :  { %341 = vmatprep.subr.bf16.mxu0 %v2367_v7  ;;  %2318 = vmatprep.subr.bf16.mxu1 %v2499_v0  ;;  %v202_v43 = vpack.c.bf16 %v146_v41, %v145_v40  ;;  %v2385_v44 = vld [vmem:[#allocation8 + $0x18] sm:$0xff]   ;;  %v147_v45 = vld [vmem:[#allocation3 + $0x80] sm:$0xff]  ;;  %v148_v46 = vld [vmem:[#allocation3 + $0x88] sm:$0xff] }
  0x44   :  { %v2386_v47 = vld [vmem:[#allocation8 + $0x20] sm:$0xff]   ;;  %v203_v48 = vpack.c.bf16 %v148_v46, %v147_v45  ;;  %v2387_v49 = vld [vmem:[#allocation8 + $0x28] sm:$0xff]   ;;  %v149_v50 = vld [vmem:[#allocation3 + $0x90] sm:$0xff] }
  0x45   :  { %v150_v51 = vld [vmem:[#allocation3 + $0x98] sm:$0xff]  ;;  %v2388_v52 = vld [vmem:[#allocation8 + $0x30] sm:$0xff]   ;;  %v151_v55 = vld [vmem:[#allocation3 + $0xa0] sm:$0xff] }
  0x46   :  { %342 = vmatpush1.bf16.msra.mxu0 %v2369_v8  ;;  %2334 = vmatpush1.bf16.msra.mxu1 %v2383_v39  ;;  %v204_v53 = vpack.c.bf16 %v150_v51, %v149_v50  ;;  %v2389_v54 = vld [vmem:[#allocation8 + $0x38] sm:$0xff]   ;;  %v152_v56 = vld [vmem:[#allocation3 + $0xa8] sm:$0xff]  ;;  %v2390_v57 = vld [vmem:[#allocation8 + $0x40] sm:$0xff]  }
  0x47   :  { %343 = vmatprep.subr.bf16.mxu0 %v2370_v9  ;;  %2319 = vmatprep.subr.bf16.mxu1 %v2499_v0  ;;  %v205_v58 = vpack.c.bf16 %v152_v56, %v151_v55  ;;  %v153_v59 = vld [vmem:[#allocation3 + $0xb0] sm:$0xff]  ;;  %v154_v60 = vld [vmem:[#allocation3 + $0xb8] sm:$0xff]  ;;  %v2391_v61 = vld [vmem:[#allocation8 + $0x48] sm:$0xff]  }
  0x48   :  { %v206_v62 = vpack.c.bf16 %v154_v60, %v153_v59  ;;  %v2392_v63 = vld [vmem:[#allocation8 + $0x50] sm:$0xff]   ;;  %v155_v1 = vld [vmem:[#allocation3 + $0xc0] sm:$0xff]  ;;  %v156_v2 = vld [vmem:[#allocation3 + $0xc8] sm:$0xff] }
  0x49   :  { %v2393_v3 = vld [vmem:[#allocation8 + $0x58] sm:$0xff]   ;;  %v207_v4 = vpack.c.bf16 %v156_v2, %v155_v1  ;;  %v2394_v5 = vld [vmem:[#allocation8 + $0x60] sm:$0xff]   ;;  %v157_v6 = vld [vmem:[#allocation3 + $0xd0] sm:$0xff] }
  0x4a   :  { %344 = vmatpush1.bf16.msra.mxu0 %v2372_v10  ;;  %2335 = vmatpush1.bf16.msra.mxu1 %v2384_v42  ;;  %v158_v7 = vld [vmem:[#allocation3 + $0xd8] sm:$0xff]  ;;  %v2395_v8 = vld [vmem:[#allocation8 + $0x68] sm:$0xff]   ;;  %v2396_v10 = vld [vmem:[#allocation8 + $0x70] sm:$0xff]  }
  0x4b   :  { %345 = vmatprep.subr.bf16.mxu0 %v2373_v11  ;;  %2320 = vmatprep.subr.bf16.mxu1 %v2499_v0  ;;  %v208_v9 = vpack.c.bf16 %v158_v7, %v157_v6  ;;  %v159_v11 = vld [vmem:[#allocation3 + $0xe0] sm:$0xff]  ;;  %v165_v21 = vld [vmem:[#allocation3 + $0x110] sm:$0xff]  ;;  %v178_v40 = vld [vmem:[#allocation3 + $0x178] sm:$0xff] }
  0x4c   :  { %v163_v18 = vld [vmem:[#allocation3 + $0x100] sm:$0xff]  ;;  %v169_v27 = vld [vmem:[#allocation3 + $0x130] sm:$0xff]  ;;  %v182_v46 = vld [vmem:[#allocation3 + $0x198] sm:$0xff] }
  0x4d   :  { %v167_v24 = vld [vmem:[#allocation3 + $0x120] sm:$0xff]  ;;  %v173_v33 = vld [vmem:[#allocation3 + $0x150] sm:$0xff]  ;;  %v184_v51 = vld [vmem:[#allocation3 + $0x1a8] sm:$0xff] }
  0x4e   :  { %346 = vmatpush1.bf16.msra.mxu0 %v2375_v12  ;;  %2336 = vmatpush1.bf16.msra.mxu1 %v2385_v44  ;;  %v160_v12 = vld [vmem:[#allocation3 + $0xe8] sm:$0xff]  ;;  %v171_v30 = vld [vmem:[#allocation3 + $0x140] sm:$0xff]  ;;  %v181_v45 = vld [vmem:[#allocation3 + $0x190] sm:$0xff] }
  0x4f   :  { %347 = vmatprep.subr.bf16.mxu0 %v2376_v13  ;;  %2321 = vmatprep.subr.bf16.mxu1 %v2499_v0  ;;  %v2397_v13 = vld [vmem:[#allocation8 + $0x78] sm:$0xff]   ;;  %v175_v36 = vld [vmem:[#allocation3 + $0x160] sm:$0xff] }
  0x50   :  { %v183_v50 = vld [vmem:[#allocation3 + $0x1a0] sm:$0xff]  ;;  %v186_v59 = vld [vmem:[#allocation3 + $0x1b8] sm:$0xff] }
  0x52   :  { %348 = vmatpush1.bf16.msra.mxu0 %v2378_v14  ;;  %2337 = vmatpush1.bf16.msra.mxu1 %v2386_v47  ;;  %v209_v14 = vpack.c.bf16 %v160_v12, %v159_v11  ;;  %v188_v11 = vld [vmem:[#allocation3 + $0x1c8] sm:$0xff] }
  0x53   :  { %349 = vmatprep.subr.bf16.mxu0 %v2379_v15  ;;  %2322 = vmatprep.subr.bf16.mxu1 %v2499_v0  ;;  %v161_v15 = vld [vmem:[#allocation3 + $0xf0] sm:$0xff] }
  0x56   :  { %350 = vmatpush1.bf16.msra.mxu0 %v2381_v16  ;;  %2338 = vmatpush1.bf16.msra.mxu1 %v2387_v49  ;;  %v162_v16 = vld [vmem:[#allocation3 + $0xf8] sm:$0xff] }
  0x57   :  { %1072 = vmatprep.subr.bf16.mxu0 %v2499_v0  ;;  %2323 = vmatprep.subr.bf16.mxu1 %v2499_v0  ;;  %v210_v17 = vpack.c.bf16 %v162_v16, %v161_v15 }
  0x59   :  { %368 = vmatmul.mubr.bf16.vlgmr.msra.gmra.mrb[0].mxu0 %v195_v19  ;;  %v164_v19 = vld [vmem:[#allocation3 + $0x108] sm:$0xff] }
  0x5a   :  { %377 = vmatprep.mubr.bf16.mxu0 %v2499_v0  ;;  %1073 = vmatpush1.bf16.msra.mxu0 %v2382_v37  ;;  %v211_v20 = vpack.c.bf16 %v164_v19, %v163_v18  ;;  %v176_v37 = vld [vmem:[#allocation3 + $0x168] sm:$0xff] }
  0x5b   :  { %1074 = vmatprep.subr.bf16.mxu0 %v2499_v0  ;;  %2339 = vmatpush1.bf16.msra.mxu1 %v2388_v52 }
  0x5c   :  { %2324 = vmatprep.subr.bf16.mxu1 %v2499_v0 }
  0x5e   :  { %1075 = vmatpush1.bf16.msra.mxu0 %v2383_v39  ;;  %v177_v39 = vld [vmem:[#allocation3 + $0x170] sm:$0xff] }
  0x5f   :  { %1076 = vmatprep.subr.bf16.mxu0 %v2499_v0  ;;  %2340 = vmatpush1.bf16.msra.mxu1 %v2389_v54  ;;  %v218_v41 = vpack.c.bf16 %v178_v40, %v177_v39 }
  0x60   :  { %2325 = vmatprep.subr.bf16.mxu1 %v2499_v0 }
  0x61   :  { %378 = vmatmul.mubr.bf16.gmra.mrb[4].mxu0 %v196_v22  ;;  %v166_v22 = vld [vmem:[#allocation3 + $0x118] sm:$0xff] }
  0x62   :  { %387 = vmatprep.mubr.bf16.mxu0 %v2499_v0  ;;  %1077 = vmatpush1.bf16.msra.mxu0 %v2384_v42  ;;  %v212_v23 = vpack.c.bf16 %v166_v22, %v165_v21  ;;  %v179_v42 = vld [vmem:[#allocation3 + $0x180] sm:$0xff] }
  0x63   :  { %1078 = vmatprep.subr.bf16.mxu0 %v2499_v0  ;;  %2341 = vmatpush1.bf16.msra.mxu1 %v2390_v57 }
  0x64   :  { %2326 = vmatprep.subr.bf16.mxu1 %v2499_v0 }
  0x66   :  { %1079 = vmatpush1.bf16.msra.mxu0 %v2385_v44 }
  0x67   :  { %1080 = vmatprep.subr.bf16.mxu0 %v2499_v0  ;;  %2342 = vmatpush1.bf16.msra.mxu1 %v2391_v61 }
  0x68   :  { %2327 = vmatprep.subr.bf16.mxu1 %v2499_v0 }
  0x69   :  { %388 = vmatmul.mubr.bf16.gmra.mrb[8].mxu0 %v197_v25  ;;  %v168_v25 = vld [vmem:[#allocation3 + $0x128] sm:$0xff] }
  0x6a   :  { %397 = vmatprep.mubr.bf16.mxu0 %v2499_v0  ;;  %1081 = vmatpush1.bf16.msra.mxu0 %v2386_v47  ;;  %v213_v26 = vpack.c.bf16 %v168_v25, %v167_v24  ;;  %v220_v47 = vpack.c.bf16 %v182_v46, %v181_v45  ;;  %v192_v45 = vld [vmem:[#allocation3 + $0x1e8] sm:$0xff] }
  0x6b   :  { %1082 = vmatprep.subr.bf16.mxu0 %v2499_v0  ;;  %2343 = vmatpush1.bf16.msra.mxu1 %v2392_v63 }
  0x6c   :  { %2328 = vmatprep.subr.bf16.mxu1 %v2499_v0 }
  0x6e   :  { %1083 = vmatpush1.bf16.msra.mxu0 %v2387_v49 }
  0x6f   :  { %1084 = vmatprep.subr.bf16.mxu0 %v2499_v0  ;;  %2344 = vmatpush1.bf16.msra.mxu1 %v2393_v3 }
  0x70   :  { %2329 = vmatprep.subr.bf16.mxu1 %v2499_v0 }
  0x71   :  { %398 = vmatmul.mubr.bf16.gmra.mrb[12].mxu0 %v198_v28  ;;  %v170_v28 = vld [vmem:[#allocation3 + $0x138] sm:$0xff] }
  0x72   :  { %407 = vmatprep.mubr.bf16.mxu0 %v2499_v0  ;;  %1085 = vmatpush1.bf16.msra.mxu0 %v2388_v52  ;;  %v214_v29 = vpack.c.bf16 %v170_v28, %v169_v27  ;;  %v221_v52 = vpack.c.bf16 %v184_v51, %v183_v50  ;;  %v189_v27 = vld [vmem:[#allocation3 + $0x1d0] sm:$0xff]  ;;  %v190_v28 = vld [vmem:[#allocation3 + $0x1d8] sm:$0xff] }
  0x73   :  { %1086 = vmatprep.subr.bf16.mxu0 %v2499_v0  ;;  %2345 = vmatpush1.bf16.msra.mxu1 %v2394_v5 }
  0x74   :  { %2330 = vmatprep.subr.bf16.mxu1 %v2499_v0 }
  0x76   :  { %1087 = vmatpush1.bf16.msra.mxu0 %v2389_v54  ;;  %v243_v54 = vld [vmem:[%s2874_s2] sm:$0x3] }
  0x77   :  { %1088 = vmatprep.subr.bf16.mxu0 %v2499_v0  ;;  %2346 = vmatpush1.bf16.msra.mxu1 %v2395_v8 }
  0x78   :  { %2331 = vmatprep.subr.bf16.mxu1 %v2499_v0 }
  0x79   :  { %408 = vmatmul.mubr.bf16.gmra.mrb[16].mxu0 %v199_v31  ;;  %v172_v31 = vld [vmem:[#allocation3 + $0x148] sm:$0xff] }
  0x7a   :  { %417 = vmatprep.mubr.bf16.mxu0 %v2499_v0  ;;  %1089 = vmatpush1.bf16.msra.mxu0 %v2390_v57  ;;  %v215_v32 = vpack.c.bf16 %v172_v31, %v171_v30 }
  0x7b   :  { %1090 = vmatprep.subr.bf16.mxu0 %v2499_v0  ;;  %2347 = vmatpush1.bf16.msra.mxu1 %v2396_v10 }
  0x7c   :  { %2332 = vmatprep.subr.bf16.mxu1 %v2499_v0 }
  0x7e   :  { %1091 = vmatpush1.bf16.msra.mxu0 %v2391_v61 }
  0x7f   :  { %1092 = vmatprep.subr.bf16.mxu0 %v2499_v0  ;;  %2348 = vmatpush1.bf16.msra.mxu1 %v2397_v13 }
  0x81   :  { %418 = vmatmul.mubr.bf16.gmra.mrb[20].mxu0 %v200_v34  ;;  %v174_v34 = vld [vmem:[#allocation3 + $0x158] sm:$0xff] }
  0x82   :  { %427 = vmatprep.mubr.bf16.mxu0 %v2499_v0  ;;  %1093 = vmatpush1.bf16.msra.mxu0 %v2392_v63  ;;  %v216_v35 = vpack.c.bf16 %v174_v34, %v173_v33  ;;  %v224_v34 = vpack.c.bf16 %v190_v28, %v189_v27 }
  0x83   :  { %1094 = vmatprep.subr.bf16.mxu0 %v2499_v0 }
  0x86   :  { %1095 = vmatpush1.bf16.msra.mxu0 %v2393_v3 }
  0x87   :  { %1096 = vmatprep.subr.bf16.mxu0 %v2499_v0 }
  0x89   :  { %428 = vmatmul.mubr.bf16.gmra.mrb[24].mxu0 %v201_v38  ;;  %v217_v38 = vpack.c.bf16 %v176_v37, %v175_v36 }
  0x8a   :  { %437 = vmatprep.mubr.bf16.mxu0 %v2499_v0  ;;  %1097 = vmatpush1.bf16.msra.mxu0 %v2394_v5 }
  0x8b   :  { %1098 = vmatprep.subr.bf16.mxu0 %v2499_v0 }
  0x8e   :  { %1099 = vmatpush1.bf16.msra.mxu0 %v2395_v8 }
  0x8f   :  { %1100 = vmatprep.subr.bf16.mxu0 %v2499_v0 }
  0x91   :  { %438 = vmatmul.mubr.bf16.gmra.mrb[28].mxu0 %v202_v43  ;;  %v180_v43 = vld [vmem:[#allocation3 + $0x188] sm:$0xff] }
  0x92   :  { %447 = vmatprep.mubr.bf16.mxu0 %v2499_v0  ;;  %1101 = vmatpush1.bf16.msra.mxu0 %v2396_v10  ;;  %v219_v44 = vpack.c.bf16 %v180_v43, %v179_v42  ;;  %v187_v10 = vld [vmem:[#allocation3 + $0x1c0] sm:$0xff] }
  0x93   :  { %1102 = vmatprep.subr.bf16.mxu0 %v2499_v0 }
  0x96   :  { %1103 = vmatpush1.bf16.msra.mxu0 %v2397_v13 }
  0x99   :  { %448 = vmatmul.mubr.bf16.gmra.mrb[32].mxu0 %v203_v48  ;;  %v245_v48 = vlaneseq }
  0x9a   :  { %457 = vmatprep.mubr.bf16.mxu0 %v2499_v0 }
  0x9b   :  { %v246_v49 = vshrl.u32 %v245_v48, 7 }
  0x9d   :  { %v251_v55 = vsub.s32 1, %v246_v49 }
  0x9f   :  { %v2641_v57 = vrot.slane %v243_v54, %v251_v55 }
  0xa1   :  { %458 = vmatmul.mubr.bf16.gmra.mrb[36].mxu0 %v204_v53  ;;  %v247_v53 = vsub.s32 0, %v246_v49 }
  0xa2   :  { %467 = vmatprep.mubr.bf16.mxu0 %v2499_v0 }
  0xa3   :  { %v2639_v56 = vrot.slane %v243_v54, %v247_v53 }
  0xa9   :  { %468 = vmatmul.mubr.bf16.gmra.mrb[40].mxu0 %v205_v58  ;;  %v185_v58 = vld [vmem:[#allocation3 + $0x1b0] sm:$0xff] }
  0xaa   :  { %477 = vmatprep.mubr.bf16.mxu0 %v2499_v0  ;;  %v222_v63 = vpack.c.bf16 %v186_v59, %v185_v58 }
  0xb1   :  { %478 = vmatmul.mubr.bf16.gmra.mrb[44].mxu0 %v206_v62 }
  0xb2   :  { %487 = vmatprep.mubr.bf16.mxu0 %v2499_v0 }
  0xb9   :  { %488 = vmatmul.mubr.bf16.gmra.mrb[48].mxu0 %v207_v4 }
  0xba   :  { %497 = vmatprep.mubr.bf16.mxu0 %v2499_v0 }
  0xc1   :  { %498 = vmatmul.mubr.bf16.gmra.mrb[52].mxu0 %v208_v9 }
  0xc2   :  { %507 = vmatprep.mubr.bf16.mxu0 %v2499_v0 }
  0xc9   :  { %508 = vmatmul.mubr.bf16.gmra.mrb[56].mxu0 %v209_v14 }
  0xca   :  { %517 = vmatprep.mubr.bf16.mxu0 %v2499_v0 }
  0xd1   :  { %518 = vmatmul.mubr.bf16.gmra.mrb[60].mxu0 %v210_v17  ;;  %v223_v17 = vpack.c.bf16 %v188_v11, %v187_v10 }
  0xd2   :  { %527 = vmatprep.mubr.bf16.mxu0 %v2499_v0 }
  0xd9   :  { %528 = vmatmul.mubr.bf16.gmra.mrb[64].mxu0 %v211_v20 }
  0xda   :  { %537 = vmatprep.mubr.bf16.mxu0 %v2499_v0 }
  0xe1   :  { %538 = vmatmul.mubr.bf16.gmra.mrb[68].mxu0 %v212_v23 }
  0xe2   :  { %547 = vmatprep.mubr.bf16.mxu0 %v2499_v0 }
  0xe9   :  { %548 = vmatmul.mubr.bf16.gmra.mrb[72].mxu0 %v213_v26 }
  0xea   :  { %557 = vmatprep.mubr.bf16.mxu0 %v2499_v0 }
  0xf1   :  { %558 = vmatmul.mubr.bf16.gmra.mrb[76].mxu0 %v214_v29 }
  0xf2   :  { %567 = vmatprep.mubr.bf16.mxu0 %v2499_v0 }
  0xf9   :  { %568 = vmatmul.mubr.bf16.gmra.mrb[80].mxu0 %v215_v32 }
  0xfa   :  { %577 = vmatprep.mubr.bf16.mxu0 %v2499_v0 }
 0x101   :  { %578 = vmatmul.mubr.bf16.gmra.mrb[84].mxu0 %v216_v35 }
 0x102   :  { %587 = vmatprep.mubr.bf16.mxu0 %v2499_v0 }
 0x109   :  { %588 = vmatmul.mubr.bf16.gmra.mrb[88].mxu0 %v217_v38 }
 0x10a   :  { %597 = vmatprep.mubr.bf16.mxu0 %v2499_v0 }
 0x111   :  { %598 = vmatmul.mubr.bf16.gmra.mrb[92].mxu0 %v218_v41 }
 0x112   :  { %607 = vmatprep.mubr.bf16.mxu0 %v2499_v0 }
 0x119   :  { %608 = vmatmul.mubr.bf16.gmra.mrb[96].mxu0 %v219_v44  ;;  %v191_v44 = vld [vmem:[#allocation3 + $0x1e0] sm:$0xff] }
 0x11a   :  { %617 = vmatprep.mubr.bf16.mxu0 %v2499_v0  ;;  %v225_v51 = vpack.c.bf16 %v192_v45, %v191_v44 }
 0x121   :  { %618 = vmatmul.mubr.bf16.gmra.mrb[100].mxu0 %v220_v47 }
 0x122   :  { %627 = vmatprep.mubr.bf16.mxu0 %v2499_v0 }
 0x129   :  { %628 = vmatmul.mubr.bf16.gmra.mrb[104].mxu0 %v221_v52 }
 0x12a   :  { %637 = vmatprep.mubr.bf16.mxu0 %v2499_v0 }
 0x12c   :  { %v369_v60 = vpop.f32.mrb[0].mxu0 }
 0x12d   :  { %v370_v61 = vadd.f32 %v369_v60, %v2639_v56  ;;  %v371_v62 = vpop.f32.mrb[1].mxu0 }
 0x12e   :  { %v372_v1 = vadd.f32 %v371_v62, %v2641_v57  ;;  %v373_v2 = vpop.f32.mrb[2].mxu0 }
 0x12f   :  { %v374_v3 = vadd.f32 %v373_v2, %v2639_v56  ;;  %v375_v4 = vpop.f32.mrb[3].mxu0  ;;  %v688_v6 = vmax.f32 %v370_v61, 0.0 }
 0x130   :  { %v376_v5 = vadd.f32 %v375_v4, %v2641_v57  ;;  %v689_v8 = vmax.f32 %v372_v1, 0.0  ;;  %v194_v1 = vld [vmem:[#allocation3 + $0x1f8] sm:$0xff] }
 0x131   :  { %v690_v7 = vmax.f32 %v374_v3, 0.0  ;;  %638 = vmatmul.mubr.bf16.gmra.mrb[108].mxu0 %v222_v63  ;;  %v193_v63 = vld [vmem:[#allocation3 + $0x1f0] sm:$0xff] }
 0x132   :  { %v691_v9 = vmax.f32 %v376_v5, 0.0  ;;  %647 = vmatprep.mubr.bf16.mxu0 %v2499_v0 }
 0x133   :  { %v2649_v12 = vpack.c.bf16 %v690_v7, %v688_v6  ;;  %v226_v7 = vpack.c.bf16 %v194_v1, %v193_v63 }
 0x134   :  { %v2651_v13 = vpack.c.bf16 %v691_v9, %v689_v8  ;;  %v379_v14 = vpop.f32.mrb[4].mxu0 }
 0x135   :  { %v380_v15 = vadd.f32 %v379_v14, %v2639_v56  ;;  %v381_v16 = vpop.f32.mrb[5].mxu0 }
 0x136   :  { %v382_v18 = vadd.f32 %v381_v16, %v2641_v57  ;;  %v383_v19 = vpop.f32.mrb[6].mxu0 }
 0x137   :  { %v384_v20 = vadd.f32 %v383_v19, %v2639_v56  ;;  %v385_v21 = vpop.f32.mrb[7].mxu0  ;;  %v692_v23 = vmax.f32 %v380_v15, 0.0 }
 0x138   :  { %v386_v22 = vadd.f32 %v385_v21, %v2641_v57  ;;  %v693_v25 = vmax.f32 %v382_v18, 0.0 }
 0x139   :  { %v694_v24 = vmax.f32 %v384_v20, 0.0  ;;  %648 = vmatmul.mubr.bf16.gmra.mrb[112].mxu0 %v223_v17 }
 0x13a   :  { %v695_v26 = vmax.f32 %v386_v22, 0.0  ;;  %657 = vmatprep.mubr.bf16.mxu0 %v2499_v0 }
 0x13b   :  { %v2658_v29 = vpack.c.bf16 %v694_v24, %v692_v23 }
 0x13c   :  { %v2660_v30 = vpack.c.bf16 %v695_v26, %v693_v25  ;;  %v389_v31 = vpop.f32.mrb[8].mxu0 }
 0x13d   :  { %v390_v32 = vadd.f32 %v389_v31, %v2639_v56  ;;  %v391_v33 = vpop.f32.mrb[9].mxu0 }
 0x13e   :  { %v392_v35 = vadd.f32 %v391_v33, %v2641_v57  ;;  %v393_v36 = vpop.f32.mrb[10].mxu0 }
 0x13f   :  { %v394_v37 = vadd.f32 %v393_v36, %v2639_v56  ;;  %v395_v38 = vpop.f32.mrb[11].mxu0  ;;  %v696_v40 = vmax.f32 %v390_v32, 0.0 }
 0x140   :  { %v396_v39 = vadd.f32 %v395_v38, %v2641_v57  ;;  %v697_v42 = vmax.f32 %v392_v35, 0.0 }
 0x141   :  { %v698_v41 = vmax.f32 %v394_v37, 0.0  ;;  %658 = vmatmul.mubr.bf16.gmra.mrb[116].mxu0 %v224_v34 }
 0x142   :  { %v699_v43 = vmax.f32 %v396_v39, 0.0  ;;  %667 = vmatprep.mubr.bf16.mxu0 %v2499_v0 }
 0x143   :  { %v820_v46 = vpack.c.bf16 %v698_v41, %v696_v40 }
 0x144   :  { %v399_v47 = vpop.f32.mrb[12].mxu0  ;;  %v821_v48 = vpack.c.bf16 %v699_v43, %v697_v42 }
 0x145   :  { %v400_v49 = vadd.f32 %v399_v47, %v2639_v56  ;;  %v401_v50 = vpop.f32.mrb[13].mxu0 }
 0x146   :  { %v402_v52 = vadd.f32 %v401_v50, %v2641_v57  ;;  %v403_v53 = vpop.f32.mrb[14].mxu0  ;;  %1120 = vmatprep.mubr.bf16.mxu1 %v821_v48 }
 0x147   :  { %v404_v54 = vadd.f32 %v403_v53, %v2639_v56  ;;  %v405_v55 = vpop.f32.mrb[15].mxu0  ;;  %1121 = vmatmul.mubr.bf16.vlgmr.msra.gmra.mrb[0].mxu1 %v820_v46  ;;  %v700_v59 = vmax.f32 %v400_v49, 0.0 }
 0x148   :  { %v406_v58 = vadd.f32 %v405_v55, %v2641_v57  ;;  %v701_v61 = vmax.f32 %v402_v52, 0.0 }
 0x149   :  { %v702_v60 = vmax.f32 %v404_v54, 0.0  ;;  %668 = vmatmul.mubr.bf16.gmra.mrb[120].mxu0 %v225_v51 }
 0x14a   :  { %v703_v62 = vmax.f32 %v406_v58, 0.0  ;;  %677 = vmatprep.mubr.bf16.mxu0 %v2499_v0 }
 0x14b   :  { %v822_v2 = vpack.c.bf16 %v702_v60, %v700_v59 }
 0x14c   :  { %v823_v3 = vpack.c.bf16 %v703_v62, %v701_v61  ;;  %v409_v4 = vpop.f32.mrb[16].mxu0 }
 0x14d   :  { %v410_v5 = vadd.f32 %v409_v4, %v2639_v56  ;;  %v411_v6 = vpop.f32.mrb[17].mxu0 }
 0x14e   :  { %v412_v8 = vadd.f32 %v411_v6, %v2641_v57  ;;  %v413_v9 = vpop.f32.mrb[18].mxu0  ;;  %1128 = vmatprep.mubr.bf16.mxu1 %v823_v3 }
 0x14f   :  { %v414_v10 = vadd.f32 %v413_v9, %v2639_v56  ;;  %v415_v11 = vpop.f32.mrb[19].mxu0  ;;  %1129 = vmatmul.mubr.bf16.gmra.mrb[4].mxu1 %v822_v2  ;;  %v704_v0 = vmax.f32 %v410_v5, 0.0 }
 0x150   :  { %v416_v14 = vadd.f32 %v415_v11, %v2641_v57  ;;  %v705_v16 = vmax.f32 %v412_v8, 0.0 }
 0x151   :  { %v706_v15 = vmax.f32 %v414_v10, 0.0  ;;  %678 = vmatmul.mubr.bf16.gmra.mrb[124].mxu0 %v226_v7 }
 0x152   :  { %v707_v17 = vmax.f32 %v416_v14, 0.0  ;;  %1104 = vmatprep.mubr.bf16.mxu0 %v2651_v13 }
 0x153   :  { %v824_v18 = vpack.c.bf16 %v706_v15, %v704_v0 }
 0x154   :  { %v825_v19 = vpack.c.bf16 %v707_v17, %v705_v16  ;;  %v419_v20 = vpop.f32.mrb[20].mxu0 }
 0x155   :  { %v420_v21 = vadd.f32 %v419_v20, %v2639_v56  ;;  %v421_v22 = vpop.f32.mrb[21].mxu0 }
 0x156   :  { %v422_v23 = vadd.f32 %v421_v22, %v2641_v57  ;;  %v423_v24 = vpop.f32.mrb[22].mxu0  ;;  %1136 = vmatprep.mubr.bf16.mxu1 %v825_v19 }
 0x157   :  { %v424_v25 = vadd.f32 %v423_v24, %v2639_v56  ;;  %v425_v26 = vpop.f32.mrb[23].mxu0  ;;  %1137 = vmatmul.mubr.bf16.gmra.mrb[8].mxu1 %v824_v18  ;;  %v708_v28 = vmax.f32 %v420_v21, 0.0 }
 0x158   :  { %v426_v27 = vadd.f32 %v425_v26, %v2641_v57  ;;  %v709_v13 = vmax.f32 %v422_v23, 0.0 }
 0x159   :  { %v710_v31 = vmax.f32 %v424_v25, 0.0  ;;  %1105 = vmatmul.mubr.bf16.vlgmr.msra.gmra.mrb[128].mxu0 %v2649_v12 }
 0x15a   :  { %v711_v32 = vmax.f32 %v426_v27, 0.0  ;;  %1112 = vmatprep.mubr.bf16.mxu0 %v2660_v30 }
 0x15b   :  { %v826_v33 = vpack.c.bf16 %v710_v31, %v708_v28 }
 0x15c   :  { %v827_v34 = vpack.c.bf16 %v711_v32, %v709_v13  ;;  %v429_v35 = vpop.f32.mrb[24].mxu0 }
 0x15d   :  { %v430_v36 = vadd.f32 %v429_v35, %v2639_v56  ;;  %v431_v37 = vpop.f32.mrb[25].mxu0 }
 0x15e   :  { %v432_v38 = vadd.f32 %v431_v37, %v2641_v57  ;;  %v433_v39 = vpop.f32.mrb[26].mxu0  ;;  %1144 = vmatprep.mubr.bf16.mxu1 %v827_v34 }
 0x15f   :  { %v434_v40 = vadd.f32 %v433_v39, %v2639_v56  ;;  %v435_v41 = vpop.f32.mrb[27].mxu0  ;;  %1145 = vmatmul.mubr.bf16.gmra.mrb[12].mxu1 %v826_v33  ;;  %v712_v42 = vmax.f32 %v430_v36, 0.0 }
 0x160   :  { %v436_v12 = vadd.f32 %v435_v41, %v2641_v57  ;;  %v713_v30 = vmax.f32 %v432_v38, 0.0 }
 0x161   :  { %v714_v43 = vmax.f32 %v434_v40, 0.0  ;;  %1113 = vmatmul.mubr.bf16.gmra.mrb[132].mxu0 %v2658_v29 }
 0x162   :  { %v715_v44 = vmax.f32 %v436_v12, 0.0 }
 0x163   :  { %v828_v45 = vpack.c.bf16 %v714_v43, %v712_v42 }
 0x164   :  { %v829_v46 = vpack.c.bf16 %v715_v44, %v713_v30  ;;  %v439_v47 = vpop.f32.mrb[28].mxu0 }
 0x165   :  { %v440_v48 = vadd.f32 %v439_v47, %v2639_v56  ;;  %v441_v49 = vpop.f32.mrb[29].mxu0 }
 0x166   :  { %v442_v50 = vadd.f32 %v441_v49, %v2641_v57  ;;  %v443_v51 = vpop.f32.mrb[30].mxu0  ;;  %1152 = vmatprep.mubr.bf16.mxu1 %v829_v46 }
 0x167   :  { %v444_v52 = vadd.f32 %v443_v51, %v2639_v56  ;;  %v445_v53 = vpop.f32.mrb[31].mxu0  ;;  %1153 = vmatmul.mubr.bf16.gmra.mrb[16].mxu1 %v828_v45  ;;  %v716_v55 = vmax.f32 %v440_v48, 0.0 }
 0x168   :  { %v446_v54 = vadd.f32 %v445_v53, %v2641_v57  ;;  %v717_v58 = vmax.f32 %v442_v50, 0.0 }
 0x169   :  { %v718_v29 = vmax.f32 %v444_v52, 0.0 }
 0x16a   :  { %v719_v59 = vmax.f32 %v446_v54, 0.0 }
 0x16b   :  { %v830_v60 = vpack.c.bf16 %v718_v29, %v716_v55 }
 0x16c   :  { %v831_v61 = vpack.c.bf16 %v719_v59, %v717_v58  ;;  %v449_v62 = vpop.f32.mrb[32].mxu0 }
 0x16d   :  { %v450_v63 = vadd.f32 %v449_v62, %v2639_v56  ;;  %v451_v1 = vpop.f32.mrb[33].mxu0 }
 0x16e   :  { %v452_v2 = vadd.f32 %v451_v1, %v2641_v57  ;;  %v453_v3 = vpop.f32.mrb[34].mxu0  ;;  %1160 = vmatprep.mubr.bf16.mxu1 %v831_v61 }
 0x16f   :  { %v454_v4 = vadd.f32 %v453_v3, %v2639_v56  ;;  %v455_v5 = vpop.f32.mrb[35].mxu0  ;;  %1161 = vmatmul.mubr.bf16.gmra.mrb[20].mxu1 %v830_v60  ;;  %v720_v7 = vmax.f32 %v450_v63, 0.0 }
 0x170   :  { %v456_v6 = vadd.f32 %v455_v5, %v2641_v57  ;;  %v721_v9 = vmax.f32 %v452_v2, 0.0 }
 0x171   :  { %v722_v8 = vmax.f32 %v454_v4, 0.0 }
 0x172   :  { %v723_v10 = vmax.f32 %v456_v6, 0.0 }
 0x173   :  { %v832_v11 = vpack.c.bf16 %v722_v8, %v720_v7 }
 0x174   :  { %v833_v14 = vpack.c.bf16 %v723_v10, %v721_v9  ;;  %v459_v0 = vpop.f32.mrb[36].mxu0 }
 0x175   :  { %v460_v15 = vadd.f32 %v459_v0, %v2639_v56  ;;  %v461_v16 = vpop.f32.mrb[37].mxu0 }
 0x176   :  { %v462_v17 = vadd.f32 %v461_v16, %v2641_v57  ;;  %v463_v18 = vpop.f32.mrb[38].mxu0  ;;  %1168 = vmatprep.mubr.bf16.mxu1 %v833_v14 }
 0x177   :  { %v464_v19 = vadd.f32 %v463_v18, %v2639_v56  ;;  %v465_v20 = vpop.f32.mrb[39].mxu0  ;;  %1169 = vmatmul.mubr.bf16.gmra.mrb[24].mxu1 %v832_v11  ;;  %v724_v22 = vmax.f32 %v460_v15, 0.0 }
 0x178   :  { %v466_v21 = vadd.f32 %v465_v20, %v2641_v57  ;;  %v725_v24 = vmax.f32 %v462_v17, 0.0 }
 0x179   :  { %v726_v23 = vmax.f32 %v464_v19, 0.0 }
 0x17a   :  { %v727_v25 = vmax.f32 %v466_v21, 0.0 }
 0x17b   :  { %v834_v26 = vpack.c.bf16 %v726_v23, %v724_v22 }
 0x17c   :  { %v835_v27 = vpack.c.bf16 %v727_v25, %v725_v24  ;;  %v469_v28 = vpop.f32.mrb[40].mxu0 }
 0x17d   :  { %v470_v31 = vadd.f32 %v469_v28, %v2639_v56  ;;  %v471_v13 = vpop.f32.mrb[41].mxu0 }
 0x17e   :  { %v472_v32 = vadd.f32 %v471_v13, %v2641_v57  ;;  %v473_v33 = vpop.f32.mrb[42].mxu0  ;;  %1176 = vmatprep.mubr.bf16.mxu1 %v835_v27 }
 0x17f   :  { %v474_v34 = vadd.f32 %v473_v33, %v2639_v56  ;;  %v475_v35 = vpop.f32.mrb[43].mxu0  ;;  %1177 = vmatmul.mubr.bf16.gmra.mrb[28].mxu1 %v834_v26  ;;  %v728_v37 = vmax.f32 %v470_v31, 0.0 }
 0x180   :  { %v476_v36 = vadd.f32 %v475_v35, %v2641_v57  ;;  %v729_v39 = vmax.f32 %v472_v32, 0.0 }
 0x181   :  { %v730_v38 = vmax.f32 %v474_v34, 0.0 }
 0x182   :  { %v731_v40 = vmax.f32 %v476_v36, 0.0 }
 0x183   :  { %v836_v41 = vpack.c.bf16 %v730_v38, %v728_v37 }
 0x184   :  { %v837_v12 = vpack.c.bf16 %v731_v40, %v729_v39  ;;  %v479_v42 = vpop.f32.mrb[44].mxu0 }
 0x185   :  { %v480_v43 = vadd.f32 %v479_v42, %v2639_v56  ;;  %v481_v30 = vpop.f32.mrb[45].mxu0 }
 0x186   :  { %v482_v44 = vadd.f32 %v481_v30, %v2641_v57  ;;  %v483_v45 = vpop.f32.mrb[46].mxu0  ;;  %1184 = vmatprep.mubr.bf16.mxu1 %v837_v12 }
 0x187   :  { %v484_v46 = vadd.f32 %v483_v45, %v2639_v56  ;;  %v485_v47 = vpop.f32.mrb[47].mxu0  ;;  %1185 = vmatmul.mubr.bf16.gmra.mrb[32].mxu1 %v836_v41  ;;  %v732_v49 = vmax.f32 %v480_v43, 0.0 }
 0x188   :  { %v486_v48 = vadd.f32 %v485_v47, %v2641_v57  ;;  %v733_v51 = vmax.f32 %v482_v44, 0.0 }
 0x189   :  { %v734_v50 = vmax.f32 %v484_v46, 0.0 }
 0x18a   :  { %v735_v52 = vmax.f32 %v486_v48, 0.0 }
 0x18b   :  { %v838_v53 = vpack.c.bf16 %v734_v50, %v732_v49 }
 0x18c   :  { %v839_v54 = vpack.c.bf16 %v735_v52, %v733_v51  ;;  %v489_v55 = vpop.f32.mrb[48].mxu0 }
 0x18d   :  { %v490_v29 = vadd.f32 %v489_v55, %v2639_v56  ;;  %v491_v58 = vpop.f32.mrb[49].mxu0 }
 0x18e   :  { %v492_v59 = vadd.f32 %v491_v58, %v2641_v57  ;;  %v493_v60 = vpop.f32.mrb[50].mxu0  ;;  %1192 = vmatprep.mubr.bf16.mxu1 %v839_v54 }
 0x18f   :  { %v494_v61 = vadd.f32 %v493_v60, %v2639_v56  ;;  %v495_v62 = vpop.f32.mrb[51].mxu0  ;;  %1193 = vmatmul.mubr.bf16.gmra.mrb[36].mxu1 %v838_v53  ;;  %v736_v1 = vmax.f32 %v490_v29, 0.0 }
 0x190   :  { %v496_v63 = vadd.f32 %v495_v62, %v2641_v57  ;;  %v737_v3 = vmax.f32 %v492_v59, 0.0 }
 0x191   :  { %v738_v2 = vmax.f32 %v494_v61, 0.0 }
 0x192   :  { %v739_v4 = vmax.f32 %v496_v63, 0.0 }
 0x193   :  { %v840_v5 = vpack.c.bf16 %v738_v2, %v736_v1 }
 0x194   :  { %v841_v6 = vpack.c.bf16 %v739_v4, %v737_v3  ;;  %v499_v7 = vpop.f32.mrb[52].mxu0 }
 0x195   :  { %v500_v8 = vadd.f32 %v499_v7, %v2639_v56  ;;  %v501_v9 = vpop.f32.mrb[53].mxu0 }
 0x196   :  { %v502_v10 = vadd.f32 %v501_v9, %v2641_v57  ;;  %v503_v11 = vpop.f32.mrb[54].mxu0  ;;  %1200 = vmatprep.mubr.bf16.mxu1 %v841_v6 }
 0x197   :  { %v504_v14 = vadd.f32 %v503_v11, %v2639_v56  ;;  %v505_v0 = vpop.f32.mrb[55].mxu0  ;;  %1201 = vmatmul.mubr.bf16.gmra.mrb[40].mxu1 %v840_v5  ;;  %v740_v16 = vmax.f32 %v500_v8, 0.0 }
 0x198   :  { %v506_v15 = vadd.f32 %v505_v0, %v2641_v57  ;;  %v741_v18 = vmax.f32 %v502_v10, 0.0 }
 0x199   :  { %v742_v17 = vmax.f32 %v504_v14, 0.0 }
 0x19a   :  { %v743_v19 = vmax.f32 %v506_v15, 0.0 }
 0x19b   :  { %v842_v20 = vpack.c.bf16 %v742_v17, %v740_v16 }
 0x19c   :  { %v843_v21 = vpack.c.bf16 %v743_v19, %v741_v18  ;;  %v509_v22 = vpop.f32.mrb[56].mxu0 }
 0x19d   :  { %v510_v23 = vadd.f32 %v509_v22, %v2639_v56  ;;  %v511_v24 = vpop.f32.mrb[57].mxu0 }
 0x19e   :  { %v512_v25 = vadd.f32 %v511_v24, %v2641_v57  ;;  %v513_v26 = vpop.f32.mrb[58].mxu0  ;;  %1208 = vmatprep.mubr.bf16.mxu1 %v843_v21 }
 0x19f   :  { %v514_v27 = vadd.f32 %v513_v26, %v2639_v56  ;;  %v515_v28 = vpop.f32.mrb[59].mxu0  ;;  %1209 = vmatmul.mubr.bf16.gmra.mrb[44].mxu1 %v842_v20  ;;  %v744_v13 = vmax.f32 %v510_v23, 0.0 }
 0x1a0   :  { %v516_v31 = vadd.f32 %v515_v28, %v2641_v57  ;;  %v745_v33 = vmax.f32 %v512_v25, 0.0 }
 0x1a1   :  { %v746_v32 = vmax.f32 %v514_v27, 0.0 }
 0x1a2   :  { %v747_v34 = vmax.f32 %v516_v31, 0.0 }
 0x1a3   :  { %v844_v35 = vpack.c.bf16 %v746_v32, %v744_v13 }
 0x1a4   :  { %v845_v36 = vpack.c.bf16 %v747_v34, %v745_v33  ;;  %v519_v37 = vpop.f32.mrb[60].mxu0 }
 0x1a5   :  { %v520_v38 = vadd.f32 %v519_v37, %v2639_v56  ;;  %v521_v39 = vpop.f32.mrb[61].mxu0 }
 0x1a6   :  { %v522_v40 = vadd.f32 %v521_v39, %v2641_v57  ;;  %v523_v41 = vpop.f32.mrb[62].mxu0  ;;  %1216 = vmatprep.mubr.bf16.mxu1 %v845_v36 }
 0x1a7   :  { %v524_v12 = vadd.f32 %v523_v41, %v2639_v56  ;;  %v525_v42 = vpop.f32.mrb[63].mxu0  ;;  %1217 = vmatmul.mubr.bf16.gmra.mrb[48].mxu1 %v844_v35  ;;  %v748_v30 = vmax.f32 %v520_v38, 0.0 }
 0x1a8   :  { %v526_v43 = vadd.f32 %v525_v42, %v2641_v57  ;;  %v749_v45 = vmax.f32 %v522_v40, 0.0 }
 0x1a9   :  { %v750_v44 = vmax.f32 %v524_v12, 0.0 }
 0x1aa   :  { %v751_v46 = vmax.f32 %v526_v43, 0.0 }
 0x1ab   :  { %v846_v47 = vpack.c.bf16 %v750_v44, %v748_v30 }
 0x1ac   :  { %v847_v48 = vpack.c.bf16 %v751_v46, %v749_v45  ;;  %v529_v49 = vpop.f32.mrb[64].mxu0 }
 0x1ad   :  { %v530_v50 = vadd.f32 %v529_v49, %v2639_v56  ;;  %v531_v51 = vpop.f32.mrb[65].mxu0 }
 0x1ae   :  { %v532_v52 = vadd.f32 %v531_v51, %v2641_v57  ;;  %v533_v53 = vpop.f32.mrb[66].mxu0  ;;  %1224 = vmatprep.mubr.bf16.mxu1 %v847_v48 }
 0x1af   :  { %v534_v54 = vadd.f32 %v533_v53, %v2639_v56  ;;  %v535_v55 = vpop.f32.mrb[67].mxu0  ;;  %1225 = vmatmul.mubr.bf16.gmra.mrb[52].mxu1 %v846_v47  ;;  %v752_v58 = vmax.f32 %v530_v50, 0.0 }
 0x1b0   :  { %v536_v29 = vadd.f32 %v535_v55, %v2641_v57  ;;  %v753_v60 = vmax.f32 %v532_v52, 0.0 }
 0x1b1   :  { %v754_v59 = vmax.f32 %v534_v54, 0.0 }
 0x1b2   :  { %v755_v61 = vmax.f32 %v536_v29, 0.0 }
 0x1b3   :  { %v848_v62 = vpack.c.bf16 %v754_v59, %v752_v58 }
 0x1b4   :  { %v849_v63 = vpack.c.bf16 %v755_v61, %v753_v60  ;;  %v539_v1 = vpop.f32.mrb[68].mxu0 }
 0x1b5   :  { %v540_v2 = vadd.f32 %v539_v1, %v2639_v56  ;;  %v541_v3 = vpop.f32.mrb[69].mxu0 }
 0x1b6   :  { %v542_v4 = vadd.f32 %v541_v3, %v2641_v57  ;;  %v543_v5 = vpop.f32.mrb[70].mxu0  ;;  %1232 = vmatprep.mubr.bf16.mxu1 %v849_v63 }
 0x1b7   :  { %v544_v6 = vadd.f32 %v543_v5, %v2639_v56  ;;  %v545_v7 = vpop.f32.mrb[71].mxu0  ;;  %1233 = vmatmul.mubr.bf16.gmra.mrb[56].mxu1 %v848_v62  ;;  %v756_v9 = vmax.f32 %v540_v2, 0.0 }
 0x1b8   :  { %v546_v8 = vadd.f32 %v545_v7, %v2641_v57  ;;  %v757_v11 = vmax.f32 %v542_v4, 0.0 }
 0x1b9   :  { %v758_v10 = vmax.f32 %v544_v6, 0.0 }
 0x1ba   :  { %v759_v14 = vmax.f32 %v546_v8, 0.0 }
 0x1bb   :  { %v850_v0 = vpack.c.bf16 %v758_v10, %v756_v9 }
 0x1bc   :  { %v851_v15 = vpack.c.bf16 %v759_v14, %v757_v11  ;;  %v549_v16 = vpop.f32.mrb[72].mxu0 }
 0x1bd   :  { %v550_v17 = vadd.f32 %v549_v16, %v2639_v56  ;;  %v551_v18 = vpop.f32.mrb[73].mxu0 }
 0x1be   :  { %v552_v19 = vadd.f32 %v551_v18, %v2641_v57  ;;  %v553_v20 = vpop.f32.mrb[74].mxu0  ;;  %1240 = vmatprep.mubr.bf16.mxu1 %v851_v15 }
 0x1bf   :  { %v554_v21 = vadd.f32 %v553_v20, %v2639_v56  ;;  %v555_v22 = vpop.f32.mrb[75].mxu0  ;;  %1241 = vmatmul.mubr.bf16.gmra.mrb[60].mxu1 %v850_v0  ;;  %v760_v24 = vmax.f32 %v550_v17, 0.0 }
 0x1c0   :  { %v556_v23 = vadd.f32 %v555_v22, %v2641_v57  ;;  %v761_v26 = vmax.f32 %v552_v19, 0.0 }
 0x1c1   :  { %v762_v25 = vmax.f32 %v554_v21, 0.0 }
 0x1c2   :  { %v763_v27 = vmax.f32 %v556_v23, 0.0 }
 0x1c3   :  { %v852_v28 = vpack.c.bf16 %v762_v25, %v760_v24 }
 0x1c4   :  { %v853_v31 = vpack.c.bf16 %v763_v27, %v761_v26  ;;  %v559_v13 = vpop.f32.mrb[76].mxu0 }
 0x1c5   :  { %v560_v32 = vadd.f32 %v559_v13, %v2639_v56  ;;  %v561_v33 = vpop.f32.mrb[77].mxu0 }
 0x1c6   :  { %v562_v34 = vadd.f32 %v561_v33, %v2641_v57  ;;  %v563_v35 = vpop.f32.mrb[78].mxu0  ;;  %1248 = vmatprep.mubr.bf16.mxu1 %v853_v31 }
 0x1c7   :  { %v564_v36 = vadd.f32 %v563_v35, %v2639_v56  ;;  %v565_v37 = vpop.f32.mrb[79].mxu0  ;;  %1249 = vmatmul.mubr.bf16.gmra.mrb[64].mxu1 %v852_v28  ;;  %v764_v39 = vmax.f32 %v560_v32, 0.0 }
 0x1c8   :  { %v566_v38 = vadd.f32 %v565_v37, %v2641_v57  ;;  %v765_v41 = vmax.f32 %v562_v34, 0.0 }
 0x1c9   :  { %v766_v40 = vmax.f32 %v564_v36, 0.0 }
 0x1ca   :  { %v767_v12 = vmax.f32 %v566_v38, 0.0 }
 0x1cb   :  { %v854_v42 = vpack.c.bf16 %v766_v40, %v764_v39 }
 0x1cc   :  { %v855_v43 = vpack.c.bf16 %v767_v12, %v765_v41  ;;  %v569_v30 = vpop.f32.mrb[80].mxu0 }
 0x1cd   :  { %v570_v44 = vadd.f32 %v569_v30, %v2639_v56  ;;  %v571_v45 = vpop.f32.mrb[81].mxu0 }
 0x1ce   :  { %v572_v46 = vadd.f32 %v571_v45, %v2641_v57  ;;  %v573_v47 = vpop.f32.mrb[82].mxu0  ;;  %1256 = vmatprep.mubr.bf16.mxu1 %v855_v43 }
 0x1cf   :  { %v574_v48 = vadd.f32 %v573_v47, %v2639_v56  ;;  %v575_v49 = vpop.f32.mrb[83].mxu0  ;;  %1257 = vmatmul.mubr.bf16.gmra.mrb[68].mxu1 %v854_v42  ;;  %v768_v51 = vmax.f32 %v570_v44, 0.0 }
 0x1d0   :  { %v576_v50 = vadd.f32 %v575_v49, %v2641_v57  ;;  %v769_v53 = vmax.f32 %v572_v46, 0.0 }
 0x1d1   :  { %v770_v52 = vmax.f32 %v574_v48, 0.0 }
 0x1d2   :  { %v771_v54 = vmax.f32 %v576_v50, 0.0 }
 0x1d3   :  { %v856_v55 = vpack.c.bf16 %v770_v52, %v768_v51 }
 0x1d4   :  { %v857_v29 = vpack.c.bf16 %v771_v54, %v769_v53  ;;  %v579_v58 = vpop.f32.mrb[84].mxu0 }
 0x1d5   :  { %v580_v59 = vadd.f32 %v579_v58, %v2639_v56  ;;  %v581_v60 = vpop.f32.mrb[85].mxu0 }
 0x1d6   :  { %v582_v61 = vadd.f32 %v581_v60, %v2641_v57  ;;  %v583_v62 = vpop.f32.mrb[86].mxu0  ;;  %1264 = vmatprep.mubr.bf16.mxu1 %v857_v29 }
 0x1d7   :  { %v584_v63 = vadd.f32 %v583_v62, %v2639_v56  ;;  %v585_v1 = vpop.f32.mrb[87].mxu0  ;;  %1265 = vmatmul.mubr.bf16.gmra.mrb[72].mxu1 %v856_v55  ;;  %v772_v3 = vmax.f32 %v580_v59, 0.0 }
 0x1d8   :  { %v586_v2 = vadd.f32 %v585_v1, %v2641_v57  ;;  %v773_v5 = vmax.f32 %v582_v61, 0.0 }
 0x1d9   :  { %v774_v4 = vmax.f32 %v584_v63, 0.0 }
 0x1da   :  { %v775_v6 = vmax.f32 %v586_v2, 0.0 }
 0x1db   :  { %v858_v7 = vpack.c.bf16 %v774_v4, %v772_v3 }
 0x1dc   :  { %v859_v8 = vpack.c.bf16 %v775_v6, %v773_v5  ;;  %v589_v9 = vpop.f32.mrb[88].mxu0 }
 0x1dd   :  { %v590_v10 = vadd.f32 %v589_v9, %v2639_v56  ;;  %v591_v11 = vpop.f32.mrb[89].mxu0 }
 0x1de   :  { %v592_v14 = vadd.f32 %v591_v11, %v2641_v57  ;;  %v593_v0 = vpop.f32.mrb[90].mxu0  ;;  %1272 = vmatprep.mubr.bf16.mxu1 %v859_v8 }
 0x1df   :  { %v594_v15 = vadd.f32 %v593_v0, %v2639_v56  ;;  %v595_v16 = vpop.f32.mrb[91].mxu0  ;;  %1273 = vmatmul.mubr.bf16.gmra.mrb[76].mxu1 %v858_v7  ;;  %v776_v18 = vmax.f32 %v590_v10, 0.0 }
 0x1e0   :  { %v596_v17 = vadd.f32 %v595_v16, %v2641_v57  ;;  %v777_v20 = vmax.f32 %v592_v14, 0.0 }
 0x1e1   :  { %v778_v19 = vmax.f32 %v594_v15, 0.0 }
 0x1e2   :  { %v779_v21 = vmax.f32 %v596_v17, 0.0 }
 0x1e3   :  { %v860_v22 = vpack.c.bf16 %v778_v19, %v776_v18 }
 0x1e4   :  { %v861_v23 = vpack.c.bf16 %v779_v21, %v777_v20  ;;  %v599_v24 = vpop.f32.mrb[92].mxu0 }
 0x1e5   :  { %v600_v25 = vadd.f32 %v599_v24, %v2639_v56  ;;  %v601_v26 = vpop.f32.mrb[93].mxu0 }
 0x1e6   :  { %v602_v27 = vadd.f32 %v601_v26, %v2641_v57  ;;  %v603_v28 = vpop.f32.mrb[94].mxu0  ;;  %1280 = vmatprep.mubr.bf16.mxu1 %v861_v23 }
 0x1e7   :  { %v604_v31 = vadd.f32 %v603_v28, %v2639_v56  ;;  %v605_v13 = vpop.f32.mrb[95].mxu0  ;;  %1281 = vmatmul.mubr.bf16.gmra.mrb[80].mxu1 %v860_v22  ;;  %v780_v33 = vmax.f32 %v600_v25, 0.0 }
 0x1e8   :  { %v606_v32 = vadd.f32 %v605_v13, %v2641_v57  ;;  %v781_v35 = vmax.f32 %v602_v27, 0.0 }
 0x1e9   :  { %v782_v34 = vmax.f32 %v604_v31, 0.0 }
 0x1ea   :  { %v783_v36 = vmax.f32 %v606_v32, 0.0 }
 0x1eb   :  { %v862_v37 = vpack.c.bf16 %v782_v34, %v780_v33 }
 0x1ec   :  { %v863_v38 = vpack.c.bf16 %v783_v36, %v781_v35  ;;  %v609_v39 = vpop.f32.mrb[96].mxu0 }
 0x1ed   :  { %v610_v40 = vadd.f32 %v609_v39, %v2639_v56  ;;  %v611_v41 = vpop.f32.mrb[97].mxu0 }
 0x1ee   :  { %v612_v12 = vadd.f32 %v611_v41, %v2641_v57  ;;  %v613_v42 = vpop.f32.mrb[98].mxu0  ;;  %1288 = vmatprep.mubr.bf16.mxu1 %v863_v38 }
 0x1ef   :  { %v614_v43 = vadd.f32 %v613_v42, %v2639_v56  ;;  %v615_v30 = vpop.f32.mrb[99].mxu0  ;;  %1289 = vmatmul.mubr.bf16.gmra.mrb[84].mxu1 %v862_v37  ;;  %v784_v45 = vmax.f32 %v610_v40, 0.0 }
 0x1f0   :  { %v616_v44 = vadd.f32 %v615_v30, %v2641_v57  ;;  %v785_v47 = vmax.f32 %v612_v12, 0.0 }
 0x1f1   :  { %v786_v46 = vmax.f32 %v614_v43, 0.0 }
 0x1f2   :  { %v787_v48 = vmax.f32 %v616_v44, 0.0 }
 0x1f3   :  { %v864_v49 = vpack.c.bf16 %v786_v46, %v784_v45 }
 0x1f4   :  { %v865_v50 = vpack.c.bf16 %v787_v48, %v785_v47  ;;  %v619_v51 = vpop.f32.mrb[100].mxu0 }
 0x1f5   :  { %v620_v52 = vadd.f32 %v619_v51, %v2639_v56  ;;  %v621_v53 = vpop.f32.mrb[101].mxu0 }
 0x1f6   :  { %v622_v54 = vadd.f32 %v621_v53, %v2641_v57  ;;  %v623_v55 = vpop.f32.mrb[102].mxu0  ;;  %1296 = vmatprep.mubr.bf16.mxu1 %v865_v50 }
 0x1f7   :  { %v624_v29 = vadd.f32 %v623_v55, %v2639_v56  ;;  %v625_v58 = vpop.f32.mrb[103].mxu0  ;;  %1297 = vmatmul.mubr.bf16.gmra.mrb[88].mxu1 %v864_v49  ;;  %v788_v60 = vmax.f32 %v620_v52, 0.0 }
 0x1f8   :  { %v626_v59 = vadd.f32 %v625_v58, %v2641_v57  ;;  %v789_v62 = vmax.f32 %v622_v54, 0.0 }
 0x1f9   :  { %v790_v61 = vmax.f32 %v624_v29, 0.0 }
 0x1fa   :  { %v791_v63 = vmax.f32 %v626_v59, 0.0  ;;  %v2783_v59 = vld [vmem:[%s2876_s4] ss:$0 sm:$0xff]  ;;  %s2500_s4 = smov [#allocation9]  }
 0x1fb   :  { %v866_v1 = vpack.c.bf16 %v790_v61, %v788_v60  ;;  %s1952_s8 = sshll.u32 %s2500_s4, 4  ;;  %s1953_s8 = int_to_ptr.vmem [resolvable:$true] %s1952_s8 }
 0x1fc   :  { %v867_v2 = vpack.c.bf16 %v791_v63, %v789_v62  ;;  %v629_v3 = vpop.f32.mrb[104].mxu0  ;;  %s2464_s9 = scalar_lea.vmem %s1953_s8, 4096  ;;  %p2469_p11 = scmp.lt.s32.totalorder %s1953_s8, %s1953_s8 }
 0x1fd   :  { %v630_v4 = vadd.f32 %v629_v3, %v2639_v56  ;;  %v631_v5 = vpop.f32.mrb[105].mxu0  ;;  %p2465_p10 = scmp.ne.s32.totalorder %s1953_s8, %s2464_s9  ;;  %p2470_p12 = scmp.lt.s32.totalorder %s2464_s9, %s2464_s9 }
 0x1fe   :  { %v632_v6 = vadd.f32 %v631_v5, %v2641_v57  ;;  %v633_v7 = vpop.f32.mrb[106].mxu0  ;;  %1304 = vmatprep.mubr.bf16.mxu1 %v867_v2 }
 0x1ff   :  { %v634_v8 = vadd.f32 %v633_v7, %v2639_v56  ;;  %v635_v9 = vpop.f32.mrb[107].mxu0  ;;  %1305 = vmatmul.mubr.bf16.gmra.mrb[92].mxu1 %v866_v1  ;;  %v792_v11 = vmax.f32 %v630_v4, 0.0  ;;  %p2471_p13 = por %p2470_p12, %p2469_p11 }
 0x200   :  { %v636_v10 = vadd.f32 %v635_v9, %v2641_v57  ;;  %v793_v0 = vmax.f32 %v632_v6, 0.0 }
 0x201   :  { %v794_v14 = vmax.f32 %v634_v8, 0.0  ;;  %p2472_p0 = pnand %p2471_p13, %p2465_p10 }
 0x202   :  { %v795_v15 = vmax.f32 %v636_v10, 0.0 }
 0x203   :  { %v868_v16 = vpack.c.bf16 %v794_v14, %v792_v11 }
 0x204   :  { %v869_v17 = vpack.c.bf16 %v795_v15, %v793_v0  ;;  %v639_v18 = vpop.f32.mrb[108].mxu0 }
 0x205   :  { %v640_v19 = vadd.f32 %v639_v18, %v2639_v56  ;;  %v641_v20 = vpop.f32.mrb[109].mxu0 }
 0x206   :  { %v642_v21 = vadd.f32 %v641_v20, %v2641_v57  ;;  %v643_v22 = vpop.f32.mrb[110].mxu0  ;;  %1312 = vmatprep.mubr.bf16.mxu1 %v869_v17 }
 0x207   :  { %v644_v23 = vadd.f32 %v643_v22, %v2639_v56  ;;  %v645_v24 = vpop.f32.mrb[111].mxu0  ;;  %1313 = vmatmul.mubr.bf16.gmra.mrb[96].mxu1 %v868_v16  ;;  %v796_v26 = vmax.f32 %v640_v19, 0.0 }
 0x208   :  { %v646_v25 = vadd.f32 %v645_v24, %v2641_v57  ;;  %v797_v28 = vmax.f32 %v642_v21, 0.0 }
 0x209   :  { %v798_v27 = vmax.f32 %v644_v23, 0.0 }
 0x20a   :  { %v799_v31 = vmax.f32 %v646_v25, 0.0 }
 0x20b   :  { %v870_v13 = vpack.c.bf16 %v798_v27, %v796_v26 }
 0x20c   :  { %v871_v32 = vpack.c.bf16 %v799_v31, %v797_v28  ;;  %v649_v33 = vpop.f32.mrb[112].mxu0 }
 0x20d   :  { %v650_v34 = vadd.f32 %v649_v33, %v2639_v56  ;;  %v651_v35 = vpop.f32.mrb[113].mxu0 }
 0x20e   :  { %v652_v36 = vadd.f32 %v651_v35, %v2641_v57  ;;  %v653_v37 = vpop.f32.mrb[114].mxu0  ;;  %1320 = vmatprep.mubr.bf16.mxu1 %v871_v32 }
 0x20f   :  { %v654_v38 = vadd.f32 %v653_v37, %v2639_v56  ;;  %v655_v39 = vpop.f32.mrb[115].mxu0  ;;  %1321 = vmatmul.mubr.bf16.gmra.mrb[100].mxu1 %v870_v13  ;;  %v800_v41 = vmax.f32 %v650_v34, 0.0 }
 0x210   :  { %v656_v40 = vadd.f32 %v655_v39, %v2641_v57  ;;  %v801_v42 = vmax.f32 %v652_v36, 0.0 }
 0x211   :  { %v802_v12 = vmax.f32 %v654_v38, 0.0 }
 0x212   :  { %v803_v43 = vmax.f32 %v656_v40, 0.0 }
 0x213   :  { %v872_v30 = vpack.c.bf16 %v802_v12, %v800_v41 }
 0x214   :  { %v873_v44 = vpack.c.bf16 %v803_v43, %v801_v42  ;;  %v659_v45 = vpop.f32.mrb[116].mxu0 }
 0x215   :  { %v660_v46 = vadd.f32 %v659_v45, %v2639_v56  ;;  %v661_v47 = vpop.f32.mrb[117].mxu0 }
 0x216   :  { %v662_v48 = vadd.f32 %v661_v47, %v2641_v57  ;;  %v663_v49 = vpop.f32.mrb[118].mxu0  ;;  %1328 = vmatprep.mubr.bf16.mxu1 %v873_v44 }
 0x217   :  { %v664_v50 = vadd.f32 %v663_v49, %v2639_v56  ;;  %v665_v51 = vpop.f32.mrb[119].mxu0  ;;  %1329 = vmatmul.mubr.bf16.gmra.mrb[104].mxu1 %v872_v30  ;;  %v804_v53 = vmax.f32 %v660_v46, 0.0 }
 0x218   :  { %v666_v52 = vadd.f32 %v665_v51, %v2641_v57  ;;  %v805_v55 = vmax.f32 %v662_v48, 0.0 }
 0x219   :  { %v806_v54 = vmax.f32 %v664_v50, 0.0 }
 0x21a   :  { %v807_v29 = vmax.f32 %v666_v52, 0.0  ;;  %v1122_v58 = vpop.f32.mrb[0].mxu1 }
 0x21b   :  { %v874_v60 = vpack.c.bf16 %v806_v54, %v804_v53  ;;  %v1124_v61 = vpop.f32.mrb[1].mxu1  ;;  %v1567_v2 = vadd.f32 %v2783_v59, %v1122_v58 }
 0x21c   :  { %v875_v62 = vpack.c.bf16 %v807_v29, %v805_v55  ;;  %v669_v63 = vpop.f32.mrb[120].mxu0  ;;  %v1125_v1 = vpop.f32.mrb[2].mxu1 }
 0x21d   :  { %v670_v3 = vadd.f32 %v669_v63, %v2639_v56  ;;  %v1568_v4 = vadd.f32 %v2783_v59, %v1125_v1  ;;  %v671_v5 = vpop.f32.mrb[121].mxu0  ;;  %v1127_v6 = vpop.f32.mrb[3].mxu1 }
 0x21e   :  { %v672_v7 = vadd.f32 %v671_v5, %v2641_v57  ;;  %v673_v8 = vpop.f32.mrb[122].mxu0  ;;  %1336 = vmatprep.mubr.bf16.mxu1 %v875_v62 }
 0x21f   :  { %v2139_v9 = vpack.c.bf16 %v1568_v4, %v1567_v2  ;;  %v674_v10 = vadd.f32 %v673_v8, %v2639_v56  ;;  %v675_v11 = vpop.f32.mrb[123].mxu0  ;;  %1337 = vmatmul.mubr.bf16.gmra.mrb[108].mxu1 %v874_v60  ;;  %v808_v0 = vmax.f32 %v670_v3, 0.0 }
 0x220   :  { %v676_v14 = vadd.f32 %v675_v11, %v2641_v57  ;;  %v809_v16 = vmax.f32 %v672_v7, 0.0 }
 0x221   :  { %2287 = vst [vmem:[#allocation9 + $0x10] sm:$0xff] %v2139_v9   ;;  %v810_v15 = vmax.f32 %v674_v10, 0.0 }
 0x222   :  { %v811_v17 = vmax.f32 %v676_v14, 0.0  ;;  %v1130_v18 = vpop.f32.mrb[4].mxu1 }
 0x223   :  { %v876_v19 = vpack.c.bf16 %v810_v15, %v808_v0  ;;  %v1132_v20 = vpop.f32.mrb[5].mxu1  ;;  %v1569_v24 = vadd.f32 %v2783_v59, %v1130_v18 }
 0x224   :  { %v877_v21 = vpack.c.bf16 %v811_v17, %v809_v16  ;;  %v679_v22 = vpop.f32.mrb[124].mxu0  ;;  %v1133_v23 = vpop.f32.mrb[6].mxu1 }
 0x225   :  { %v680_v25 = vadd.f32 %v679_v22, %v2639_v56  ;;  %v1570_v26 = vadd.f32 %v2783_v59, %v1133_v23  ;;  %v681_v27 = vpop.f32.mrb[125].mxu0  ;;  %v1135_v28 = vpop.f32.mrb[7].mxu1 }
 0x226   :  { %v682_v31 = vadd.f32 %v681_v27, %v2641_v57  ;;  %v683_v13 = vpop.f32.mrb[126].mxu0  ;;  %1344 = vmatprep.mubr.bf16.mxu1 %v877_v21 }
 0x227   :  { %v2144_v32 = vpack.c.bf16 %v1570_v26, %v1569_v24  ;;  %v684_v33 = vadd.f32 %v683_v13, %v2639_v56  ;;  %v685_v34 = vpop.f32.mrb[127].mxu0  ;;  %1345 = vmatmul.mubr.bf16.gmra.mrb[112].mxu1 %v876_v19  ;;  %v812_v36 = vmax.f32 %v680_v25, 0.0 }
 0x228   :  { %v686_v35 = vadd.f32 %v685_v34, %v2641_v57  ;;  %v813_v38 = vmax.f32 %v682_v31, 0.0 }
 0x229   :  { %2288 = vst [vmem:[#allocation9 + $0x18] sm:$0xff] %v2144_v32   ;;  %v814_v37 = vmax.f32 %v684_v33, 0.0 }
 0x22a   :  { %v815_v39 = vmax.f32 %v686_v35, 0.0  ;;  %v1138_v40 = vpop.f32.mrb[8].mxu1 }
 0x22b   :  { %v878_v41 = vpack.c.bf16 %v814_v37, %v812_v36  ;;  %v1140_v12 = vpop.f32.mrb[9].mxu1  ;;  %v1571_v44 = vadd.f32 %v2783_v59, %v1138_v40 }
 0x22c   :  { %v879_v42 = vpack.c.bf16 %v815_v39, %v813_v38  ;;  %v1106_v43 = vpop.f32.mrb[128].mxu0  ;;  %v1141_v30 = vpop.f32.mrb[10].mxu1 }
 0x22d   :  { %v1572_v45 = vadd.f32 %v2783_v59, %v1141_v30  ;;  %v1108_v56 = vpop.f32.mrb[129].mxu0  ;;  %v1143_v46 = vpop.f32.mrb[11].mxu1  ;;  %v1563_v57 = vadd.f32 %v2783_v59, %v1106_v43 }
 0x22e   :  { %v1109_v47 = vpop.f32.mrb[130].mxu0  ;;  %1352 = vmatprep.mubr.bf16.mxu1 %v879_v42 }
 0x22f   :  { %v2149_v48 = vpack.c.bf16 %v1572_v45, %v1571_v44  ;;  %v1564_v49 = vadd.f32 %v2783_v59, %v1109_v47  ;;  %v1111_v50 = vpop.f32.mrb[131].mxu0  ;;  %1353 = vmatmul.mubr.bf16.gmra.mrb[116].mxu1 %v878_v41 }
 0x231   :  { %2289 = vst [vmem:[#allocation9 + $0x20] sm:$0xff] %v2149_v48   ;;  %v2129_v51 = vpack.c.bf16 %v1564_v49, %v1563_v57 }
 0x232   :  { %v1146_v52 = vpop.f32.mrb[12].mxu1 }
 0x233   :  { %2130 = vst [vmem:[#allocation9] sm:$0xff] %v2129_v51   ;;  %v1148_v53 = vpop.f32.mrb[13].mxu1  ;;  %v1573_v29 = vadd.f32 %v2783_v59, %v1146_v52 }
 0x234   :  { %v1114_v54 = vpop.f32.mrb[132].mxu0  ;;  %v1149_v55 = vpop.f32.mrb[14].mxu1 }
 0x235   :  { %v1574_v58 = vadd.f32 %v2783_v59, %v1149_v55  ;;  %v1116_v60 = vpop.f32.mrb[133].mxu0  ;;  %v1151_v61 = vpop.f32.mrb[15].mxu1  ;;  %v1565_v63 = vadd.f32 %v2783_v59, %v1114_v54 }
 0x236   :  { %v1117_v62 = vpop.f32.mrb[134].mxu0 }
 0x237   :  { %v2154_v1 = vpack.c.bf16 %v1574_v58, %v1573_v29  ;;  %v1566_v2 = vadd.f32 %v2783_v59, %v1117_v62  ;;  %v1119_v3 = vpop.f32.mrb[135].mxu0 }
 0x239   :  { %2290 = vst [vmem:[#allocation9 + $0x28] sm:$0xff] %v2154_v1   ;;  %v2134_v4 = vpack.c.bf16 %v1566_v2, %v1565_v63 }
 0x23a   :  { %v1154_v5 = vpop.f32.mrb[16].mxu1 }
 0x23b   :  { %2286 = vst [vmem:[#allocation9 + $0x8] sm:$0xff] %v2134_v4   ;;  %v1156_v6 = vpop.f32.mrb[17].mxu1  ;;  %v1575_v8 = vadd.f32 %v2783_v59, %v1154_v5 }
 0x23c   :  { %v1157_v7 = vpop.f32.mrb[18].mxu1 }
 0x23d   :  { %v1576_v9 = vadd.f32 %v2783_v59, %v1157_v7  ;;  %v1159_v10 = vpop.f32.mrb[19].mxu1 }
 0x23f   :  { %v2159_v11 = vpack.c.bf16 %v1576_v9, %v1575_v8 }
 0x241   :  { %2291 = vst [vmem:[#allocation9 + $0x30] sm:$0xff] %v2159_v11  }
 0x242   :  { %v1162_v14 = vpop.f32.mrb[20].mxu1 }
 0x243   :  { %v1164_v0 = vpop.f32.mrb[21].mxu1  ;;  %v1577_v16 = vadd.f32 %v2783_v59, %v1162_v14 }
 0x244   :  { %v1165_v15 = vpop.f32.mrb[22].mxu1 }
 0x245   :  { %v1578_v17 = vadd.f32 %v2783_v59, %v1165_v15  ;;  %v1167_v18 = vpop.f32.mrb[23].mxu1 }
 0x247   :  { %v2164_v19 = vpack.c.bf16 %v1578_v17, %v1577_v16 }
 0x249   :  { %2292 = vst [vmem:[#allocation9 + $0x38] sm:$0xff] %v2164_v19  }
 0x24a   :  { %v1170_v20 = vpop.f32.mrb[24].mxu1 }
 0x24b   :  { %v1172_v21 = vpop.f32.mrb[25].mxu1  ;;  %v1579_v23 = vadd.f32 %v2783_v59, %v1170_v20 }
 0x24c   :  { %v1173_v22 = vpop.f32.mrb[26].mxu1 }
 0x24d   :  { %v1580_v24 = vadd.f32 %v2783_v59, %v1173_v22  ;;  %v1175_v25 = vpop.f32.mrb[27].mxu1 }
 0x24f   :  { %v2169_v26 = vpack.c.bf16 %v1580_v24, %v1579_v23 }
 0x251   :  { %2293 = vst [vmem:[#allocation9 + $0x40] sm:$0xff] %v2169_v26  }
 0x252   :  { %v1178_v27 = vpop.f32.mrb[28].mxu1 }
 0x253   :  { %v1180_v28 = vpop.f32.mrb[29].mxu1  ;;  %v1581_v13 = vadd.f32 %v2783_v59, %v1178_v27 }
 0x254   :  { %v1181_v31 = vpop.f32.mrb[30].mxu1 }
 0x255   :  { %v1582_v32 = vadd.f32 %v2783_v59, %v1181_v31  ;;  %v1183_v33 = vpop.f32.mrb[31].mxu1 }
 0x257   :  { %v2174_v34 = vpack.c.bf16 %v1582_v32, %v1581_v13 }
 0x259   :  { %2294 = vst [vmem:[#allocation9 + $0x48] sm:$0xff] %v2174_v34  }
 0x25a   :  { %v1186_v35 = vpop.f32.mrb[32].mxu1 }
 0x25b   :  { %v1188_v36 = vpop.f32.mrb[33].mxu1  ;;  %v1583_v38 = vadd.f32 %v2783_v59, %v1186_v35 }
 0x25c   :  { %v1189_v37 = vpop.f32.mrb[34].mxu1 }
 0x25d   :  { %v1584_v39 = vadd.f32 %v2783_v59, %v1189_v37  ;;  %v1191_v40 = vpop.f32.mrb[35].mxu1 }
 0x25f   :  { %v2179_v41 = vpack.c.bf16 %v1584_v39, %v1583_v38 }
 0x261   :  { %2295 = vst [vmem:[#allocation9 + $0x50] sm:$0xff] %v2179_v41  }
 0x262   :  { %v1194_v12 = vpop.f32.mrb[36].mxu1 }
 0x263   :  { %v1196_v42 = vpop.f32.mrb[37].mxu1  ;;  %v1585_v30 = vadd.f32 %v2783_v59, %v1194_v12 }
 0x264   :  { %v1197_v43 = vpop.f32.mrb[38].mxu1 }
 0x265   :  { %v1586_v44 = vadd.f32 %v2783_v59, %v1197_v43  ;;  %v1199_v45 = vpop.f32.mrb[39].mxu1 }
 0x267   :  { %v2184_v56 = vpack.c.bf16 %v1586_v44, %v1585_v30 }
 0x269   :  { %2296 = vst [vmem:[#allocation9 + $0x58] sm:$0xff] %v2184_v56  }
 0x26a   :  { %v1202_v46 = vpop.f32.mrb[40].mxu1 }
 0x26b   :  { %v1204_v47 = vpop.f32.mrb[41].mxu1  ;;  %v1587_v48 = vadd.f32 %v2783_v59, %v1202_v46 }
 0x26c   :  { %v1205_v57 = vpop.f32.mrb[42].mxu1 }
 0x26d   :  { %v1588_v49 = vadd.f32 %v2783_v59, %v1205_v57  ;;  %v1207_v50 = vpop.f32.mrb[43].mxu1 }
 0x26f   :  { %v2189_v51 = vpack.c.bf16 %v1588_v49, %v1587_v48 }
 0x271   :  { %2297 = vst [vmem:[#allocation9 + $0x60] sm:$0xff] %v2189_v51  }
 0x272   :  { %v1210_v52 = vpop.f32.mrb[44].mxu1 }
 0x273   :  { %v1212_v53 = vpop.f32.mrb[45].mxu1  ;;  %v1589_v55 = vadd.f32 %v2783_v59, %v1210_v52 }
 0x274   :  { %v1213_v54 = vpop.f32.mrb[46].mxu1 }
 0x275   :  { %v1590_v29 = vadd.f32 %v2783_v59, %v1213_v54  ;;  %v1215_v58 = vpop.f32.mrb[47].mxu1 }
 0x277   :  { %v2194_v60 = vpack.c.bf16 %v1590_v29, %v1589_v55 }
 0x279   :  { %2298 = vst [vmem:[#allocation9 + $0x68] sm:$0xff] %v2194_v60  }
 0x27a   :  { %v1218_v61 = vpop.f32.mrb[48].mxu1 }
 0x27b   :  { %v1220_v62 = vpop.f32.mrb[49].mxu1  ;;  %v1591_v1 = vadd.f32 %v2783_v59, %v1218_v61 }
 0x27c   :  { %v1221_v63 = vpop.f32.mrb[50].mxu1 }
 0x27d   :  { %v1592_v2 = vadd.f32 %v2783_v59, %v1221_v63  ;;  %v1223_v3 = vpop.f32.mrb[51].mxu1 }
 0x27f   :  { %v2199_v4 = vpack.c.bf16 %v1592_v2, %v1591_v1 }
 0x281   :  { %2299 = vst [vmem:[#allocation9 + $0x70] sm:$0xff] %v2199_v4  }
 0x282   :  { %v1226_v5 = vpop.f32.mrb[52].mxu1 }
 0x283   :  { %v1228_v6 = vpop.f32.mrb[53].mxu1  ;;  %v1593_v8 = vadd.f32 %v2783_v59, %v1226_v5 }
 0x284   :  { %v1229_v7 = vpop.f32.mrb[54].mxu1 }
 0x285   :  { %v1594_v9 = vadd.f32 %v2783_v59, %v1229_v7  ;;  %v1231_v10 = vpop.f32.mrb[55].mxu1 }
 0x287   :  { %v2204_v11 = vpack.c.bf16 %v1594_v9, %v1593_v8 }
 0x289   :  { %2300 = vst [vmem:[#allocation9 + $0x78] sm:$0xff] %v2204_v11  }
 0x28a   :  { %v1234_v14 = vpop.f32.mrb[56].mxu1 }
 0x28b   :  { %v1236_v0 = vpop.f32.mrb[57].mxu1  ;;  %v1595_v16 = vadd.f32 %v2783_v59, %v1234_v14 }
 0x28c   :  { %v1237_v15 = vpop.f32.mrb[58].mxu1 }
 0x28d   :  { %v1596_v17 = vadd.f32 %v2783_v59, %v1237_v15  ;;  %v1239_v18 = vpop.f32.mrb[59].mxu1 }
 0x28f   :  { %v2209_v19 = vpack.c.bf16 %v1596_v17, %v1595_v16 }
 0x291   :  { %2301 = vst [vmem:[#allocation9 + $0x80] sm:$0xff] %v2209_v19  }
 0x292   :  { %v1242_v20 = vpop.f32.mrb[60].mxu1 }
 0x293   :  { %v1244_v21 = vpop.f32.mrb[61].mxu1  ;;  %v1597_v23 = vadd.f32 %v2783_v59, %v1242_v20 }
 0x294   :  { %v1245_v22 = vpop.f32.mrb[62].mxu1 }
 0x295   :  { %v1598_v24 = vadd.f32 %v2783_v59, %v1245_v22  ;;  %v1247_v25 = vpop.f32.mrb[63].mxu1 }
 0x297   :  { %v2214_v26 = vpack.c.bf16 %v1598_v24, %v1597_v23 }
 0x299   :  { %2302 = vst [vmem:[#allocation9 + $0x88] sm:$0xff] %v2214_v26  }
 0x29a   :  { %v1250_v27 = vpop.f32.mrb[64].mxu1 }
 0x29b   :  { %v1252_v28 = vpop.f32.mrb[65].mxu1  ;;  %v1599_v13 = vadd.f32 %v2783_v59, %v1250_v27 }
 0x29c   :  { %v1253_v31 = vpop.f32.mrb[66].mxu1 }
 0x29d   :  { %v1600_v32 = vadd.f32 %v2783_v59, %v1253_v31  ;;  %v1255_v33 = vpop.f32.mrb[67].mxu1 }
 0x29f   :  { %v2219_v34 = vpack.c.bf16 %v1600_v32, %v1599_v13 }
 0x2a1   :  { %2303 = vst [vmem:[#allocation9 + $0x90] sm:$0xff] %v2219_v34  }
 0x2a2   :  { %v1258_v35 = vpop.f32.mrb[68].mxu1 }
 0x2a3   :  { %v1260_v36 = vpop.f32.mrb[69].mxu1  ;;  %v1601_v38 = vadd.f32 %v2783_v59, %v1258_v35 }
 0x2a4   :  { %v1261_v37 = vpop.f32.mrb[70].mxu1 }
 0x2a5   :  { %v1602_v39 = vadd.f32 %v2783_v59, %v1261_v37  ;;  %v1263_v40 = vpop.f32.mrb[71].mxu1 }
 0x2a7   :  { %v2224_v41 = vpack.c.bf16 %v1602_v39, %v1601_v38 }
 0x2a9   :  { %2304 = vst [vmem:[#allocation9 + $0x98] sm:$0xff] %v2224_v41  }
 0x2aa   :  { %v1266_v12 = vpop.f32.mrb[72].mxu1 }
 0x2ab   :  { %v1268_v42 = vpop.f32.mrb[73].mxu1  ;;  %v1603_v30 = vadd.f32 %v2783_v59, %v1266_v12 }
 0x2ac   :  { %v1269_v43 = vpop.f32.mrb[74].mxu1 }
 0x2ad   :  { %v1604_v44 = vadd.f32 %v2783_v59, %v1269_v43  ;;  %v1271_v45 = vpop.f32.mrb[75].mxu1 }
 0x2af   :  { %v2229_v56 = vpack.c.bf16 %v1604_v44, %v1603_v30 }
 0x2b1   :  { %2305 = vst [vmem:[#allocation9 + $0xa0] sm:$0xff] %v2229_v56  }
 0x2b2   :  { %v1274_v46 = vpop.f32.mrb[76].mxu1 }
 0x2b3   :  { %v1276_v47 = vpop.f32.mrb[77].mxu1  ;;  %v1605_v48 = vadd.f32 %v2783_v59, %v1274_v46 }
 0x2b4   :  { %v1277_v57 = vpop.f32.mrb[78].mxu1 }
 0x2b5   :  { %v1606_v49 = vadd.f32 %v2783_v59, %v1277_v57  ;;  %v1279_v50 = vpop.f32.mrb[79].mxu1 }
 0x2b7   :  { %v2234_v51 = vpack.c.bf16 %v1606_v49, %v1605_v48 }
 0x2b9   :  { %2306 = vst [vmem:[#allocation9 + $0xa8] sm:$0xff] %v2234_v51  }
 0x2ba   :  { %v1282_v52 = vpop.f32.mrb[80].mxu1 }
 0x2bb   :  { %v1284_v53 = vpop.f32.mrb[81].mxu1  ;;  %v1607_v55 = vadd.f32 %v2783_v59, %v1282_v52 }
 0x2bc   :  { %v1285_v54 = vpop.f32.mrb[82].mxu1 }
 0x2bd   :  { %v1608_v29 = vadd.f32 %v2783_v59, %v1285_v54  ;;  %v1287_v58 = vpop.f32.mrb[83].mxu1 }
 0x2bf   :  { %v2239_v60 = vpack.c.bf16 %v1608_v29, %v1607_v55 }
 0x2c1   :  { %2307 = vst [vmem:[#allocation9 + $0xb0] sm:$0xff] %v2239_v60  }
 0x2c2   :  { %v1290_v61 = vpop.f32.mrb[84].mxu1 }
 0x2c3   :  { %v1292_v62 = vpop.f32.mrb[85].mxu1  ;;  %v1609_v1 = vadd.f32 %v2783_v59, %v1290_v61 }
 0x2c4   :  { %v1293_v63 = vpop.f32.mrb[86].mxu1 }
 0x2c5   :  { %v1610_v2 = vadd.f32 %v2783_v59, %v1293_v63  ;;  %v1295_v3 = vpop.f32.mrb[87].mxu1 }
 0x2c7   :  { %v2244_v4 = vpack.c.bf16 %v1610_v2, %v1609_v1 }
 0x2c9   :  { %2308 = vst [vmem:[#allocation9 + $0xb8] sm:$0xff] %v2244_v4  }
 0x2ca   :  { %v1298_v5 = vpop.f32.mrb[88].mxu1 }
 0x2cb   :  { %v1300_v6 = vpop.f32.mrb[89].mxu1  ;;  %v1611_v8 = vadd.f32 %v2783_v59, %v1298_v5 }
 0x2cc   :  { %v1301_v7 = vpop.f32.mrb[90].mxu1 }
 0x2cd   :  { %v1612_v9 = vadd.f32 %v2783_v59, %v1301_v7  ;;  %v1303_v10 = vpop.f32.mrb[91].mxu1 }
 0x2cf   :  { %v2249_v11 = vpack.c.bf16 %v1612_v9, %v1611_v8 }
 0x2d1   :  { %2309 = vst [vmem:[#allocation9 + $0xc0] sm:$0xff] %v2249_v11  }
 0x2d2   :  { %v1306_v14 = vpop.f32.mrb[92].mxu1 }
 0x2d3   :  { %v1308_v0 = vpop.f32.mrb[93].mxu1  ;;  %v1613_v16 = vadd.f32 %v2783_v59, %v1306_v14 }
 0x2d4   :  { %v1309_v15 = vpop.f32.mrb[94].mxu1 }
 0x2d5   :  { %v1614_v17 = vadd.f32 %v2783_v59, %v1309_v15  ;;  %v1311_v18 = vpop.f32.mrb[95].mxu1 }
 0x2d7   :  { %v2254_v19 = vpack.c.bf16 %v1614_v17, %v1613_v16 }
 0x2d9   :  { %2310 = vst [vmem:[#allocation9 + $0xc8] sm:$0xff] %v2254_v19  }
 0x2da   :  { %v1314_v20 = vpop.f32.mrb[96].mxu1 }
 0x2db   :  { %v1316_v21 = vpop.f32.mrb[97].mxu1  ;;  %v1615_v23 = vadd.f32 %v2783_v59, %v1314_v20 }
 0x2dc   :  { %v1317_v22 = vpop.f32.mrb[98].mxu1 }
 0x2dd   :  { %v1616_v24 = vadd.f32 %v2783_v59, %v1317_v22  ;;  %v1319_v25 = vpop.f32.mrb[99].mxu1 }
 0x2df   :  { %v2259_v26 = vpack.c.bf16 %v1616_v24, %v1615_v23 }
 0x2e1   :  { %2311 = vst [vmem:[#allocation9 + $0xd0] sm:$0xff] %v2259_v26  }
 0x2e2   :  { %v1322_v27 = vpop.f32.mrb[100].mxu1 }
 0x2e3   :  { %v1324_v28 = vpop.f32.mrb[101].mxu1  ;;  %v1617_v13 = vadd.f32 %v2783_v59, %v1322_v27 }
 0x2e4   :  { %v1325_v31 = vpop.f32.mrb[102].mxu1 }
 0x2e5   :  { %v1618_v32 = vadd.f32 %v2783_v59, %v1325_v31  ;;  %v1327_v33 = vpop.f32.mrb[103].mxu1 }
 0x2e7   :  { %v2264_v34 = vpack.c.bf16 %v1618_v32, %v1617_v13 }
 0x2e9   :  { %2312 = vst [vmem:[#allocation9 + $0xd8] sm:$0xff] %v2264_v34  }
 0x2ea   :  { %v1330_v35 = vpop.f32.mrb[104].mxu1 }
 0x2eb   :  { %v1332_v36 = vpop.f32.mrb[105].mxu1  ;;  %v1619_v38 = vadd.f32 %v2783_v59, %v1330_v35 }
 0x2ec   :  { %v1333_v37 = vpop.f32.mrb[106].mxu1 }
 0x2ed   :  { %v1620_v39 = vadd.f32 %v2783_v59, %v1333_v37  ;;  %v1335_v40 = vpop.f32.mrb[107].mxu1 }
 0x2ef   :  { %v2269_v41 = vpack.c.bf16 %v1620_v39, %v1619_v38 }
 0x2f1   :  { %2313 = vst [vmem:[#allocation9 + $0xe0] sm:$0xff] %v2269_v41  }
 0x2f2   :  { %v1338_v12 = vpop.f32.mrb[108].mxu1 }
 0x2f3   :  { %v1340_v42 = vpop.f32.mrb[109].mxu1  ;;  %v1621_v30 = vadd.f32 %v2783_v59, %v1338_v12 }
 0x2f4   :  { %v1341_v43 = vpop.f32.mrb[110].mxu1 }
 0x2f5   :  { %v1622_v44 = vadd.f32 %v2783_v59, %v1341_v43  ;;  %v1343_v45 = vpop.f32.mrb[111].mxu1 }
 0x2f7   :  { %v2274_v56 = vpack.c.bf16 %v1622_v44, %v1621_v30 }
 0x2f9   :  { %2314 = vst [vmem:[#allocation9 + $0xe8] sm:$0xff] %v2274_v56  }
 0x2fa   :  { %v1346_v46 = vpop.f32.mrb[112].mxu1 }
 0x2fb   :  { %v1348_v47 = vpop.f32.mrb[113].mxu1  ;;  %v1623_v48 = vadd.f32 %v2783_v59, %v1346_v46 }
 0x2fc   :  { %v1349_v57 = vpop.f32.mrb[114].mxu1 }
 0x2fd   :  { %v1624_v49 = vadd.f32 %v2783_v59, %v1349_v57  ;;  %v1351_v50 = vpop.f32.mrb[115].mxu1 }
 0x2ff   :  { %v2279_v51 = vpack.c.bf16 %v1624_v49, %v1623_v48 }
 0x301   :  { %2315 = vst [vmem:[#allocation9 + $0xf0] sm:$0xff] %v2279_v51  }
 0x302   :  { %v1354_v52 = vpop.f32.mrb[116].mxu1 }
 0x303   :  { %v1356_v53 = vpop.f32.mrb[117].mxu1  ;;  %v1625_v55 = vadd.f32 %v2783_v59, %v1354_v52 }
 0x304   :  { %v1357_v54 = vpop.f32.mrb[118].mxu1 }
 0x305   :  { %v1626_v29 = vadd.f32 %v2783_v59, %v1357_v54  ;;  %v1359_v58 = vpop.f32.mrb[119].mxu1 }
 0x307   :  { %v2284_v60 = vpack.c.bf16 %v1626_v29, %v1625_v55 }
 0x309   :  { %2316 = vst [vmem:[#allocation9 + $0xf8] sm:$0xff] %v2284_v60  }
 0x30a   :  { %2475 = shalt.err (!%p2472_p0)
}
 0x30b   :  { %s2476_s12 = scalar_lea.hbm %s2877_s5, 4096 }
 0x30c   :  { %p2477_p1 = scmp.ne.s32.totalorder %s2877_s5, %s2476_s12  ;;  %p2480_p2 = scmp.lt.u32.totalorder %s2476_s12, %s2877_s5 }
 0x30e   :  { %p2482_p3 = pnand %p2480_p2, %p2477_p1 }
 0x310   :  { %2485 = shalt.err (!%p2482_p3)
}
 0x311   :  { %1958 = dma.vmem_to_hbm [thread:$0]  %s1953_s8, 4096, %s2877_s5, [#allocation5], %s2497_s0, %s2497_s0, %s2498_s21  }
 0x312   :  { %2490 = dma.done.wait [#allocation5], 4096  }
 0x313   :  { %2491 = vsyncadd [#allocation5], 4294963200 }
 0x314   :  { %1962 = vsyncpa [#allocation4], 1 }
 0x315   :  { %1963 = vsyncpa [#allocation7], 1 }
 0x316   :  { %1964 = vsyncpa [#allocation5], 1 }

// kernel: tpu_custom_call.1
= control target key start
LH: loop header
LB: loop body
LE: loop exit
PB: predicated region body
PF: predicated region fallthrough
CT: control target
= control target key end

     0   :  { %10 = vsyncpa [#allocation4], 0  ;;  %s2872_s0 = inlined_call_operand.hbm [shape: f32[512,128], index: 0, kind: input, shape index: {}]   ;;  %s2873_s1 = inlined_call_operand.hbm [shape: bf16[128,256], index: 1, kind: input, shape index: {}]   ;;  %s2874_s2 = inlined_call_operand.vmem [shape: f32[1,256], index: 2, kind: input, shape index: {}]   ;;  %s2875_s3 = inlined_call_operand.hbm [shape: bf16[256,128], index: 3, kind: input, shape index: {}]   ;;  %s2876_s4 = inlined_call_operand.vmem [shape: f32[1,128], index: 4, kind: input, shape index: {}]   ;;  %s2877_s5 = inlined_call_operand.hbm [shape: bf16[512,128], index: 5, kind: output, shape index: {}]  }
   0x1   :  { %11 = vsyncpa [#allocation7], 0 }
   0x2   :  { %12 = vsyncpa [#allocation5], 0  ;;  %s2492_s18 = smov [#allocation6]   ;;  %s2493_s20 = smov [#allocation3]  }
   0x3   :  { %s30_s19 = sshll.u32 %s2492_s18, 4  ;;  %s18_s21 = sshll.u32 %s2493_s20, 4  ;;  %s31_s19 = int_to_ptr.vmem [resolvable:$true] %s30_s19  ;;  %s2531_s21 = int_to_ptr.vmem [resolvable:$true] %s18_s21 }
   0x4   :  { %s2398_s24 = scalar_lea.hbm %s2873_s1, 2048 }
   0x5   :  { %p2399_p0 = scmp.ne.s32.totalorder %s2873_s1, %s2398_s24  ;;  %p2402_p1 = scmp.lt.u32.totalorder %s2398_s24, %s2873_s1 }
   0x7   :  { %p2404_p2 = pnand %p2402_p1, %p2399_p0 }
   0x9   :  { %2407 = shalt.err (!%p2404_p2)
}
   0xa   :  { %s2408_s29 = scalar_lea.vmem %s31_s19, 2048  ;;  %p2413_p4 = scmp.lt.s32.totalorder %s31_s19, %s31_s19 }
   0xb   :  { %p2409_p3 = scmp.ne.s32.totalorder %s31_s19, %s2408_s29  ;;  %p2414_p5 = scmp.lt.s32.totalorder %s2408_s29, %s2408_s29 }
   0xd   :  { %p2415_p6 = por %p2414_p5, %p2413_p4 }
   0xf   :  { %p2416_p7 = pnand %p2415_p6, %p2409_p3 }
  0x11   :  { %2419 = shalt.err (!%p2416_p7)
}
  0x12   :  { %s2494_s30 = smov 128   ;;  %s2495_s6 = smov 8  }
  0x13   :  { %36 = dma.hbm_to_vmem [thread:$0]  %s2873_s1, 2048, %s31_s19, [#allocation7], %s2494_s30, %s2494_s30, %s2495_s6  }
  0x14   :  { %s2420_s11 = scalar_lea.hbm %s2872_s0, 8192 }
  0x15   :  { %p2421_p8 = scmp.ne.s32.totalorder %s2872_s0, %s2420_s11  ;;  %p2424_p9 = scmp.lt.u32.totalorder %s2420_s11, %s2872_s0 }
  0x17   :  { %p2426_p10 = pnand %p2424_p9, %p2421_p8 }
  0x19   :  { %2429 = shalt.err (!%p2426_p10)
}
  0x1a   :  { %s2430_s16 = scalar_lea.vmem %s2531_s21, 8192  ;;  %p2435_p12 = scmp.lt.s32.totalorder %s2531_s21, %s2531_s21 }
  0x1b   :  { %p2431_p11 = scmp.ne.s32.totalorder %s2531_s21, %s2430_s16  ;;  %p2436_p13 = scmp.lt.s32.totalorder %s2430_s16, %s2430_s16 }
  0x1d   :  { %p2437_p0 = por %p2436_p13, %p2435_p12 }
  0x1f   :  { %p2438_p1 = pnand %p2437_p0, %p2431_p11 }
  0x21   :  { %2441 = shalt.err (!%p2438_p1)
}
  0x22   :  { %24 = dma.hbm_to_vmem [thread:$0]  %s2872_s0, 8192, %s2531_s21, [#allocation4], %s2494_s30, %s2494_s30, %s2495_s6  }
  0x23   :  { %s2496_s18 = smov [#allocation8]   ;;  %s2442_s23 = scalar_lea.hbm %s2875_s3, 2048 }
  0x24   :  { %s44_s19 = sshll.u32 %s2496_s18, 4  ;;  %p2443_p2 = scmp.ne.s32.totalorder %s2875_s3, %s2442_s23  ;;  %s45_s19 = int_to_ptr.vmem [resolvable:$true] %s44_s19 }
  0x25   :  { %p2446_p3 = scmp.lt.u32.totalorder %s2442_s23, %s2875_s3 }
  0x27   :  { %p2448_p4 = pnand %p2446_p3, %p2443_p2 }
  0x29   :  { %2451 = shalt.err (!%p2448_p4)
}
  0x2a   :  { %s2452_s28 = scalar_lea.vmem %s45_s19, 2048  ;;  %p2457_p6 = scmp.lt.s32.totalorder %s45_s19, %s45_s19 }
  0x2b   :  { %p2453_p5 = scmp.ne.s32.totalorder %s45_s19, %s2452_s28  ;;  %p2458_p7 = scmp.lt.s32.totalorder %s2452_s28, %s2452_s28 }
  0x2d   :  { %p2459_p8 = por %p2458_p7, %p2457_p6 }
  0x2f   :  { %p2460_p9 = pnand %p2459_p8, %p2453_p5 }
  0x31   :  { %2463 = shalt.err (!%p2460_p9)
}
  0x32   :  { %s2497_s0 = smov 64   ;;  %s2498_s21 = smov 4  }
  0x33   :  { %50 = dma.hbm_to_vmem [thread:$0]  %s2875_s3, 2048, %s45_s19, [#allocation7], %s2497_s0, %s2497_s0, %s2498_s21  }
  0x34   :  { %2486 = dma.done.wait [#allocation4], 8192  }
  0x35   :  { %2487 = vsyncadd [#allocation4], 4294959104 }
  0x36   :  { %2488 = dma.done.wait [#allocation7], 4096  }
  0x37   :  { %2489 = vsyncadd [#allocation7], 4294963200  ;;  %v2499_v0 = vmov 0   ;;  %v2358_v1 = vld [vmem:[#allocation6 + $0x4] ss:$8 sps:$4 sm:$0xff]   ;;  %v133_v20 = vld [vmem:[#allocation3 + $0x10] sm:$0xff] }
  0x38   :  { %367 = vmatprep.mubr.bf16.mxu0 %v2499_v0  ;;  %2317 = vmatprep.subr.bf16.mxu1 %v2499_v0  ;;  %v2360_v2 = vld [vmem:[#allocation6] ss:$8 sps:$4 sm:$0xff]   ;;  %v2361_v3 = vld [vmem:[#allocation6 + $0x14] ss:$8 sps:$4 sm:$0xff]   ;;  %v2363_v4 = vld [vmem:[#allocation6 + $0x10] ss:$8 sps:$4 sm:$0xff]  }
  0x39   :  { %335 = vmatprep.subr.bf16.mxu0 %v2358_v1  ;;  %v2364_v5 = vld [vmem:[#allocation6 + $0x24] ss:$8 sps:$4 sm:$0xff]   ;;  %v2366_v6 = vld [vmem:[#allocation6 + $0x20] ss:$8 sps:$4 sm:$0xff]   ;;  %v2367_v7 = vld [vmem:[#allocation6 + $0x34] ss:$8 sps:$4 sm:$0xff]  }
  0x3a   :  { %336 = vmatpush1.bf16.msra.mxu0 %v2360_v2  ;;  %v2369_v8 = vld [vmem:[#allocation6 + $0x30] ss:$8 sps:$4 sm:$0xff]   ;;  %v2370_v9 = vld [vmem:[#allocation6 + $0x44] ss:$8 sps:$4 sm:$0xff]   ;;  %v2372_v10 = vld [vmem:[#allocation6 + $0x40] ss:$8 sps:$4 sm:$0xff]  }
  0x3b   :  { %337 = vmatprep.subr.bf16.mxu0 %v2361_v3  ;;  %v2373_v11 = vld [vmem:[#allocation6 + $0x54] ss:$8 sps:$4 sm:$0xff]   ;;  %v2375_v12 = vld [vmem:[#allocation6 + $0x50] ss:$8 sps:$4 sm:$0xff]   ;;  %v2376_v13 = vld [vmem:[#allocation6 + $0x64] ss:$8 sps:$4 sm:$0xff]  }
  0x3c   :  { %v2378_v14 = vld [vmem:[#allocation6 + $0x60] ss:$8 sps:$4 sm:$0xff]   ;;  %v2379_v15 = vld [vmem:[#allocation6 + $0x74] ss:$8 sps:$4 sm:$0xff]   ;;  %v2381_v16 = vld [vmem:[#allocation6 + $0x70] ss:$8 sps:$4 sm:$0xff]  }
  0x3d   :  { %v131_v17 = vld [vmem:[#allocation3] sm:$0xff]  ;;  %v132_v18 = vld [vmem:[#allocation3 + $0x8] sm:$0xff]  ;;  %v134_v21 = vld [vmem:[#allocation3 + $0x18] sm:$0xff] }
  0x3e   :  { %338 = vmatpush1.bf16.msra.mxu0 %v2363_v4  ;;  %v195_v19 = vpack.c.bf16 %v132_v18, %v131_v17  ;;  %v196_v22 = vpack.c.bf16 %v134_v21, %v133_v20  ;;  %v135_v23 = vld [vmem:[#allocation3 + $0x20] sm:$0xff]  ;;  %v136_v24 = vld [vmem:[#allocation3 + $0x28] sm:$0xff]  ;;  %v137_v26 = vld [vmem:[#allocation3 + $0x30] sm:$0xff] }
  0x3f   :  { %339 = vmatprep.subr.bf16.mxu0 %v2364_v5  ;;  %v197_v25 = vpack.c.bf16 %v136_v24, %v135_v23  ;;  %v138_v27 = vld [vmem:[#allocation3 + $0x38] sm:$0xff]  ;;  %v139_v29 = vld [vmem:[#allocation3 + $0x40] sm:$0xff]  ;;  %v140_v30 = vld [vmem:[#allocation3 + $0x48] sm:$0xff] }
  0x40   :  { %v198_v28 = vpack.c.bf16 %v138_v27, %v137_v26  ;;  %v199_v31 = vpack.c.bf16 %v140_v30, %v139_v29  ;;  %v141_v32 = vld [vmem:[#allocation3 + $0x50] sm:$0xff]  ;;  %v142_v33 = vld [vmem:[#allocation3 + $0x58] sm:$0xff]  ;;  %v143_v35 = vld [vmem:[#allocation3 + $0x60] sm:$0xff] }
  0x41   :  { %v200_v34 = vpack.c.bf16 %v142_v33, %v141_v32  ;;  %v144_v36 = vld [vmem:[#allocation3 + $0x68] sm:$0xff]  ;;  %v2382_v37 = vld [vmem:[#allocation8] sm:$0xff]   ;;  %v145_v40 = vld [vmem:[#allocation3 + $0x70] sm:$0xff] }
  0x42   :  { %340 = vmatpush1.bf16.msra.mxu0 %v2366_v6  ;;  %2333 = vmatpush1.bf16.msra.mxu1 %v2382_v37  ;;  %v201_v38 = vpack.c.bf16 %v144_v36, %v143_v35  ;;  %v2383_v39 = vld [vmem:[#allocation8 + $0x8] sm:$0xff]   ;;  %v146_v41 = vld [vmem:[#allocation3 + $0x78] sm:$0xff]  ;;  %v2384_v42 = vld [vmem:[#allocation8 + $0x10] sm:$0xff]  }
  0x43   :  { %341 = vmatprep.subr.bf16.mxu0 %v2367_v7  ;;  %2318 = vmatprep.subr.bf16.mxu1 %v2499_v0  ;;  %v202_v43 = vpack.c.bf16 %v146_v41, %v145_v40  ;;  %v2385_v44 = vld [vmem:[#allocation8 + $0x18] sm:$0xff]   ;;  %v147_v45 = vld [vmem:[#allocation3 + $0x80] sm:$0xff]  ;;  %v148_v46 = vld [vmem:[#allocation3 + $0x88] sm:$0xff] }
  0x44   :  { %v2386_v47 = vld [vmem:[#allocation8 + $0x20] sm:$0xff]   ;;  %v203_v48 = vpack.c.bf16 %v148_v46, %v147_v45  ;;  %v2387_v49 = vld [vmem:[#allocation8 + $0x28] sm:$0xff]   ;;  %v149_v50 = vld [vmem:[#allocation3 + $0x90] sm:$0xff] }
  0x45   :  { %v150_v51 = vld [vmem:[#allocation3 + $0x98] sm:$0xff]  ;;  %v2388_v52 = vld [vmem:[#allocation8 + $0x30] sm:$0xff]   ;;  %v151_v55 = vld [vmem:[#allocation3 + $0xa0] sm:$0xff] }
  0x46   :  { %342 = vmatpush1.bf16.msra.mxu0 %v2369_v8  ;;  %2334 = vmatpush1.bf16.msra.mxu1 %v2383_v39  ;;  %v204_v53 = vpack.c.bf16 %v150_v51, %v149_v50  ;;  %v2389_v54 = vld [vmem:[#allocation8 + $0x38] sm:$0xff]   ;;  %v152_v56 = vld [vmem:[#allocation3 + $0xa8] sm:$0xff]  ;;  %v2390_v57 = vld [vmem:[#allocation8 + $0x40] sm:$0xff]  }
  0x47   :  { %343 = vmatprep.subr.bf16.mxu0 %v2370_v9  ;;  %2319 = vmatprep.subr.bf16.mxu1 %v2499_v0  ;;  %v205_v58 = vpack.c.bf16 %v152_v56, %v151_v55  ;;  %v153_v59 = vld [vmem:[#allocation3 + $0xb0] sm:$0xff]  ;;  %v154_v60 = vld [vmem:[#allocation3 + $0xb8] sm:$0xff]  ;;  %v2391_v61 = vld [vmem:[#allocation8 + $0x48] sm:$0xff]  }
  0x48   :  { %v206_v62 = vpack.c.bf16 %v154_v60, %v153_v59  ;;  %v2392_v63 = vld [vmem:[#allocation8 + $0x50] sm:$0xff]   ;;  %v155_v1 = vld [vmem:[#allocation3 + $0xc0] sm:$0xff]  ;;  %v156_v2 = vld [vmem:[#allocation3 + $0xc8] sm:$0xff] }
  0x49   :  { %v2393_v3 = vld [vmem:[#allocation8 + $0x58] sm:$0xff]   ;;  %v207_v4 = vpack.c.bf16 %v156_v2, %v155_v1  ;;  %v2394_v5 = vld [vmem:[#allocation8 + $0x60] sm:$0xff]   ;;  %v157_v6 = vld [vmem:[#allocation3 + $0xd0] sm:$0xff] }
  0x4a   :  { %344 = vmatpush1.bf16.msra.mxu0 %v2372_v10  ;;  %2335 = vmatpush1.bf16.msra.mxu1 %v2384_v42  ;;  %v158_v7 = vld [vmem:[#allocation3 + $0xd8] sm:$0xff]  ;;  %v2395_v8 = vld [vmem:[#allocation8 + $0x68] sm:$0xff]   ;;  %v2396_v10 = vld [vmem:[#allocation8 + $0x70] sm:$0xff]  }
  0x4b   :  { %345 = vmatprep.subr.bf16.mxu0 %v2373_v11  ;;  %2320 = vmatprep.subr.bf16.mxu1 %v2499_v0  ;;  %v208_v9 = vpack.c.bf16 %v158_v7, %v157_v6  ;;  %v159_v11 = vld [vmem:[#allocation3 + $0xe0] sm:$0xff]  ;;  %v165_v21 = vld [vmem:[#allocation3 + $0x110] sm:$0xff]  ;;  %v178_v40 = vld [vmem:[#allocation3 + $0x178] sm:$0xff] }
  0x4c   :  { %v163_v18 = vld [vmem:[#allocation3 + $0x100] sm:$0xff]  ;;  %v169_v27 = vld [vmem:[#allocation3 + $0x130] sm:$0xff]  ;;  %v182_v46 = vld [vmem:[#allocation3 + $0x198] sm:$0xff] }
  0x4d   :  { %v167_v24 = vld [vmem:[#allocation3 + $0x120] sm:$0xff]  ;;  %v173_v33 = vld [vmem:[#allocation3 + $0x150] sm:$0xff]  ;;  %v184_v51 = vld [vmem:[#allocation3 + $0x1a8] sm:$0xff] }
  0x4e   :  { %346 = vmatpush1.bf16.msra.mxu0 %v2375_v12  ;;  %2336 = vmatpush1.bf16.msra.mxu1 %v2385_v44  ;;  %v160_v12 = vld [vmem:[#allocation3 + $0xe8] sm:$0xff]  ;;  %v171_v30 = vld [vmem:[#allocation3 + $0x140] sm:$0xff]  ;;  %v181_v45 = vld [vmem:[#allocation3 + $0x190] sm:$0xff] }
  0x4f   :  { %347 = vmatprep.subr.bf16.mxu0 %v2376_v13  ;;  %2321 = vmatprep.subr.bf16.mxu1 %v2499_v0  ;;  %v2397_v13 = vld [vmem:[#allocation8 + $0x78] sm:$0xff]   ;;  %v175_v36 = vld [vmem:[#allocation3 + $0x160] sm:$0xff] }
  0x50   :  { %v183_v50 = vld [vmem:[#allocation3 + $0x1a0] sm:$0xff]  ;;  %v186_v59 = vld [vmem:[#allocation3 + $0x1b8] sm:$0xff] }
  0x52   :  { %348 = vmatpush1.bf16.msra.mxu0 %v2378_v14  ;;  %2337 = vmatpush1.bf16.msra.mxu1 %v2386_v47  ;;  %v209_v14 = vpack.c.bf16 %v160_v12, %v159_v11  ;;  %v188_v11 = vld [vmem:[#allocation3 + $0x1c8] sm:$0xff] }
  0x53   :  { %349 = vmatprep.subr.bf16.mxu0 %v2379_v15  ;;  %2322 = vmatprep.subr.bf16.mxu1 %v2499_v0  ;;  %v161_v15 = vld [vmem:[#allocation3 + $0xf0] sm:$0xff] }
  0x56   :  { %350 = vmatpush1.bf16.msra.mxu0 %v2381_v16  ;;  %2338 = vmatpush1.bf16.msra.mxu1 %v2387_v49  ;;  %v162_v16 = vld [vmem:[#allocation3 + $0xf8] sm:$0xff] }
  0x57   :  { %1072 = vmatprep.subr.bf16.mxu0 %v2499_v0  ;;  %2323 = vmatprep.subr.bf16.mxu1 %v2499_v0  ;;  %v210_v17 = vpack.c.bf16 %v162_v16, %v161_v15 }
  0x59   :  { %368 = vmatmul.mubr.bf16.vlgmr.msra.gmra.mrb[0].mxu0 %v195_v19  ;;  %v164_v19 = vld [vmem:[#allocation3 + $0x108] sm:$0xff] }
  0x5a   :  { %377 = vmatprep.mubr.bf16.mxu0 %v2499_v0  ;;  %1073 = vmatpush1.bf16.msra.mxu0 %v2382_v37  ;;  %v211_v20 = vpack.c.bf16 %v164_v19, %v163_v18  ;;  %v176_v37 = vld [vmem:[#allocation3 + $0x168] sm:$0xff] }
  0x5b   :  { %1074 = vmatprep.subr.bf16.mxu0 %v2499_v0  ;;  %2339 = vmatpush1.bf16.msra.mxu1 %v2388_v52 }
  0x5c   :  { %2324 = vmatprep.subr.bf16.mxu1 %v2499_v0 }
  0x5e   :  { %1075 = vmatpush1.bf16.msra.mxu0 %v2383_v39  ;;  %v177_v39 = vld [vmem:[#allocation3 + $0x170] sm:$0xff] }
  0x5f   :  { %1076 = vmatprep.subr.bf16.mxu0 %v2499_v0  ;;  %2340 = vmatpush1.bf16.msra.mxu1 %v2389_v54  ;;  %v218_v41 = vpack.c.bf16 %v178_v40, %v177_v39 }
  0x60   :  { %2325 = vmatprep.subr.bf16.mxu1 %v2499_v0 }
  0x61   :  { %378 = vmatmul.mubr.bf16.gmra.mrb[4].mxu0 %v196_v22  ;;  %v166_v22 = vld [vmem:[#allocation3 + $0x118] sm:$0xff] }
  0x62   :  { %387 = vmatprep.mubr.bf16.mxu0 %v2499_v0  ;;  %1077 = vmatpush1.bf16.msra.mxu0 %v2384_v42  ;;  %v212_v23 = vpack.c.bf16 %v166_v22, %v165_v21  ;;  %v179_v42 = vld [vmem:[#allocation3 + $0x180] sm:$0xff] }
  0x63   :  { %1078 = vmatprep.subr.bf16.mxu0 %v2499_v0  ;;  %2341 = vmatpush1.bf16.msra.mxu1 %v2390_v57 }
  0x64   :  { %2326 = vmatprep.subr.bf16.mxu1 %v2499_v0 }
  0x66   :  { %1079 = vmatpush1.bf16.msra.mxu0 %v2385_v44 }
  0x67   :  { %1080 = vmatprep.subr.bf16.mxu0 %v2499_v0  ;;  %2342 = vmatpush1.bf16.msra.mxu1 %v2391_v61 }
  0x68   :  { %2327 = vmatprep.subr.bf16.mxu1 %v2499_v0 }
  0x69   :  { %388 = vmatmul.mubr.bf16.gmra.mrb[8].mxu0 %v197_v25  ;;  %v168_v25 = vld [vmem:[#allocation3 + $0x128] sm:$0xff] }
  0x6a   :  { %397 = vmatprep.mubr.bf16.mxu0 %v2499_v0  ;;  %1081 = vmatpush1.bf16.msra.mxu0 %v2386_v47  ;;  %v213_v26 = vpack.c.bf16 %v168_v25, %v167_v24  ;;  %v220_v47 = vpack.c.bf16 %v182_v46, %v181_v45  ;;  %v192_v45 = vld [vmem:[#allocation3 + $0x1e8] sm:$0xff] }
  0x6b   :  { %1082 = vmatprep.subr.bf16.mxu0 %v2499_v0  ;;  %2343 = vmatpush1.bf16.msra.mxu1 %v2392_v63 }
  0x6c   :  { %2328 = vmatprep.subr.bf16.mxu1 %v2499_v0 }
  0x6e   :  { %1083 = vmatpush1.bf16.msra.mxu0 %v2387_v49 }
  0x6f   :  { %1084 = vmatprep.subr.bf16.mxu0 %v2499_v0  ;;  %2344 = vmatpush1.bf16.msra.mxu1 %v2393_v3 }
  0x70   :  { %2329 = vmatprep.subr.bf16.mxu1 %v2499_v0 }
  0x71   :  { %398 = vmatmul.mubr.bf16.gmra.mrb[12].mxu0 %v198_v28  ;;  %v170_v28 = vld [vmem:[#allocation3 + $0x138] sm:$0xff] }
  0x72   :  { %407 = vmatprep.mubr.bf16.mxu0 %v2499_v0  ;;  %1085 = vmatpush1.bf16.msra.mxu0 %v2388_v52  ;;  %v214_v29 = vpack.c.bf16 %v170_v28, %v169_v27  ;;  %v221_v52 = vpack.c.bf16 %v184_v51, %v183_v50  ;;  %v189_v27 = vld [vmem:[#allocation3 + $0x1d0] sm:$0xff]  ;;  %v190_v28 = vld [vmem:[#allocation3 + $0x1d8] sm:$0xff] }
  0x73   :  { %1086 = vmatprep.subr.bf16.mxu0 %v2499_v0  ;;  %2345 = vmatpush1.bf16.msra.mxu1 %v2394_v5 }
  0x74   :  { %2330 = vmatprep.subr.bf16.mxu1 %v2499_v0 }
  0x76   :  { %1087 = vmatpush1.bf16.msra.mxu0 %v2389_v54  ;;  %v243_v54 = vld [vmem:[%s2874_s2] sm:$0x3] }
  0x77   :  { %1088 = vmatprep.subr.bf16.mxu0 %v2499_v0  ;;  %2346 = vmatpush1.bf16.msra.mxu1 %v2395_v8 }
  0x78   :  { %2331 = vmatprep.subr.bf16.mxu1 %v2499_v0 }
  0x79   :  { %408 = vmatmul.mubr.bf16.gmra.mrb[16].mxu0 %v199_v31  ;;  %v172_v31 = vld [vmem:[#allocation3 + $0x148] sm:$0xff] }
  0x7a   :  { %417 = vmatprep.mubr.bf16.mxu0 %v2499_v0  ;;  %1089 = vmatpush1.bf16.msra.mxu0 %v2390_v57  ;;  %v215_v32 = vpack.c.bf16 %v172_v31, %v171_v30 }
  0x7b   :  { %1090 = vmatprep.subr.bf16.mxu0 %v2499_v0  ;;  %2347 = vmatpush1.bf16.msra.mxu1 %v2396_v10 }
  0x7c   :  { %2332 = vmatprep.subr.bf16.mxu1 %v2499_v0 }
  0x7e   :  { %1091 = vmatpush1.bf16.msra.mxu0 %v2391_v61 }
  0x7f   :  { %1092 = vmatprep.subr.bf16.mxu0 %v2499_v0  ;;  %2348 = vmatpush1.bf16.msra.mxu1 %v2397_v13 }
  0x81   :  { %418 = vmatmul.mubr.bf16.gmra.mrb[20].mxu0 %v200_v34  ;;  %v174_v34 = vld [vmem:[#allocation3 + $0x158] sm:$0xff] }
  0x82   :  { %427 = vmatprep.mubr.bf16.mxu0 %v2499_v0  ;;  %1093 = vmatpush1.bf16.msra.mxu0 %v2392_v63  ;;  %v216_v35 = vpack.c.bf16 %v174_v34, %v173_v33  ;;  %v224_v34 = vpack.c.bf16 %v190_v28, %v189_v27 }
  0x83   :  { %1094 = vmatprep.subr.bf16.mxu0 %v2499_v0 }
  0x86   :  { %1095 = vmatpush1.bf16.msra.mxu0 %v2393_v3 }
  0x87   :  { %1096 = vmatprep.subr.bf16.mxu0 %v2499_v0 }
  0x89   :  { %428 = vmatmul.mubr.bf16.gmra.mrb[24].mxu0 %v201_v38  ;;  %v217_v38 = vpack.c.bf16 %v176_v37, %v175_v36 }
  0x8a   :  { %437 = vmatprep.mubr.bf16.mxu0 %v2499_v0  ;;  %1097 = vmatpush1.bf16.msra.mxu0 %v2394_v5 }
  0x8b   :  { %1098 = vmatprep.subr.bf16.mxu0 %v2499_v0 }
  0x8e   :  { %1099 = vmatpush1.bf16.msra.mxu0 %v2395_v8 }
  0x8f   :  { %1100 = vmatprep.subr.bf16.mxu0 %v2499_v0 }
  0x91   :  { %438 = vmatmul.mubr.bf16.gmra.mrb[28].mxu0 %v202_v43  ;;  %v180_v43 = vld [vmem:[#allocation3 + $0x188] sm:$0xff] }
  0x92   :  { %447 = vmatprep.mubr.bf16.mxu0 %v2499_v0  ;;  %1101 = vmatpush1.bf16.msra.mxu0 %v2396_v10  ;;  %v219_v44 = vpack.c.bf16 %v180_v43, %v179_v42  ;;  %v187_v10 = vld [vmem:[#allocation3 + $0x1c0] sm:$0xff] }
  0x93   :  { %1102 = vmatprep.subr.bf16.mxu0 %v2499_v0 }
  0x96   :  { %1103 = vmatpush1.bf16.msra.mxu0 %v2397_v13 }
  0x99   :  { %448 = vmatmul.mubr.bf16.gmra.mrb[32].mxu0 %v203_v48  ;;  %v245_v48 = vlaneseq }
  0x9a   :  { %457 = vmatprep.mubr.bf16.mxu0 %v2499_v0 }
  0x9b   :  { %v246_v49 = vshrl.u32 %v245_v48, 7 }
  0x9d   :  { %v251_v55 = vsub.s32 1, %v246_v49 }
  0x9f   :  { %v2641_v57 = vrot.slane %v243_v54, %v251_v55 }
  0xa1   :  { %458 = vmatmul.mubr.bf16.gmra.mrb[36].mxu0 %v204_v53  ;;  %v247_v53 = vsub.s32 0, %v246_v49 }
  0xa2   :  { %467 = vmatprep.mubr.bf16.mxu0 %v2499_v0 }
  0xa3   :  { %v2639_v56 = vrot.slane %v243_v54, %v247_v53 }
  0xa9   :  { %468 = vmatmul.mubr.bf16.gmra.mrb[40].mxu0 %v205_v58  ;;  %v185_v58 = vld [vmem:[#allocation3 + $0x1b0] sm:$0xff] }
  0xaa   :  { %477 = vmatprep.mubr.bf16.mxu0 %v2499_v0  ;;  %v222_v63 = vpack.c.bf16 %v186_v59, %v185_v58 }
  0xb1   :  { %478 = vmatmul.mubr.bf16.gmra.mrb[44].mxu0 %v206_v62 }
  0xb2   :  { %487 = vmatprep.mubr.bf16.mxu0 %v2499_v0 }
  0xb9   :  { %488 = vmatmul.mubr.bf16.gmra.mrb[48].mxu0 %v207_v4 }
  0xba   :  { %497 = vmatprep.mubr.bf16.mxu0 %v2499_v0 }
  0xc1   :  { %498 = vmatmul.mubr.bf16.gmra.mrb[52].mxu0 %v208_v9 }
  0xc2   :  { %507 = vmatprep.mubr.bf16.mxu0 %v2499_v0 }
  0xc9   :  { %508 = vmatmul.mubr.bf16.gmra.mrb[56].mxu0 %v209_v14 }
  0xca   :  { %517 = vmatprep.mubr.bf16.mxu0 %v2499_v0 }
  0xd1   :  { %518 = vmatmul.mubr.bf16.gmra.mrb[60].mxu0 %v210_v17  ;;  %v223_v17 = vpack.c.bf16 %v188_v11, %v187_v10 }
  0xd2   :  { %527 = vmatprep.mubr.bf16.mxu0 %v2499_v0 }
  0xd9   :  { %528 = vmatmul.mubr.bf16.gmra.mrb[64].mxu0 %v211_v20 }
  0xda   :  { %537 = vmatprep.mubr.bf16.mxu0 %v2499_v0 }
  0xe1   :  { %538 = vmatmul.mubr.bf16.gmra.mrb[68].mxu0 %v212_v23 }
  0xe2   :  { %547 = vmatprep.mubr.bf16.mxu0 %v2499_v0 }
  0xe9   :  { %548 = vmatmul.mubr.bf16.gmra.mrb[72].mxu0 %v213_v26 }
  0xea   :  { %557 = vmatprep.mubr.bf16.mxu0 %v2499_v0 }
  0xf1   :  { %558 = vmatmul.mubr.bf16.gmra.mrb[76].mxu0 %v214_v29 }
  0xf2   :  { %567 = vmatprep.mubr.bf16.mxu0 %v2499_v0 }
  0xf9   :  { %568 = vmatmul.mubr.bf16.gmra.mrb[80].mxu0 %v215_v32 }
  0xfa   :  { %577 = vmatprep.mubr.bf16.mxu0 %v2499_v0 }
 0x101   :  { %578 = vmatmul.mubr.bf16.gmra.mrb[84].mxu0 %v216_v35 }
 0x102   :  { %587 = vmatprep.mubr.bf16.mxu0 %v2499_v0 }
 0x109   :  { %588 = vmatmul.mubr.bf16.gmra.mrb[88].mxu0 %v217_v38 }
 0x10a   :  { %597 = vmatprep.mubr.bf16.mxu0 %v2499_v0 }
 0x111   :  { %598 = vmatmul.mubr.bf16.gmra.mrb[92].mxu0 %v218_v41 }
 0x112   :  { %607 = vmatprep.mubr.bf16.mxu0 %v2499_v0 }
 0x119   :  { %608 = vmatmul.mubr.bf16.gmra.mrb[96].mxu0 %v219_v44  ;;  %v191_v44 = vld [vmem:[#allocation3 + $0x1e0] sm:$0xff] }
 0x11a   :  { %617 = vmatprep.mubr.bf16.mxu0 %v2499_v0  ;;  %v225_v51 = vpack.c.bf16 %v192_v45, %v191_v44 }
 0x121   :  { %618 = vmatmul.mubr.bf16.gmra.mrb[100].mxu0 %v220_v47 }
 0x122   :  { %627 = vmatprep.mubr.bf16.mxu0 %v2499_v0 }
 0x129   :  { %628 = vmatmul.mubr.bf16.gmra.mrb[104].mxu0 %v221_v52 }
 0x12a   :  { %637 = vmatprep.mubr.bf16.mxu0 %v2499_v0 }
 0x12c   :  { %v369_v60 = vpop.f32.mrb[0].mxu0 }
 0x12d   :  { %v370_v61 = vadd.f32 %v369_v60, %v2639_v56  ;;  %v371_v62 = vpop.f32.mrb[1].mxu0 }
 0x12e   :  { %v372_v1 = vadd.f32 %v371_v62, %v2641_v57  ;;  %v373_v2 = vpop.f32.mrb[2].mxu0 }
 0x12f   :  { %v374_v3 = vadd.f32 %v373_v2, %v2639_v56  ;;  %v375_v4 = vpop.f32.mrb[3].mxu0  ;;  %v688_v6 = vmax.f32 %v370_v61, 0.0 }
 0x130   :  { %v376_v5 = vadd.f32 %v375_v4, %v2641_v57  ;;  %v689_v8 = vmax.f32 %v372_v1, 0.0  ;;  %v194_v1 = vld [vmem:[#allocation3 + $0x1f8] sm:$0xff] }
 0x131   :  { %v690_v7 = vmax.f32 %v374_v3, 0.0  ;;  %638 = vmatmul.mubr.bf16.gmra.mrb[108].mxu0 %v222_v63  ;;  %v193_v63 = vld [vmem:[#allocation3 + $0x1f0] sm:$0xff] }
 0x132   :  { %v691_v9 = vmax.f32 %v376_v5, 0.0  ;;  %647 = vmatprep.mubr.bf16.mxu0 %v2499_v0 }
 0x133   :  { %v2649_v12 = vpack.c.bf16 %v690_v7, %v688_v6  ;;  %v226_v7 = vpack.c.bf16 %v194_v1, %v193_v63 }
 0x134   :  { %v2651_v13 = vpack.c.bf16 %v691_v9, %v689_v8  ;;  %v379_v14 = vpop.f32.mrb[4].mxu0 }
 0x135   :  { %v380_v15 = vadd.f32 %v379_v14, %v2639_v56  ;;  %v381_v16 = vpop.f32.mrb[5].mxu0 }
 0x136   :  { %v382_v18 = vadd.f32 %v381_v16, %v2641_v57  ;;  %v383_v19 = vpop.f32.mrb[6].mxu0 }
 0x137   :  { %v384_v20 = vadd.f32 %v383_v19, %v2639_v56  ;;  %v385_v21 = vpop.f32.mrb[7].mxu0  ;;  %v692_v23 = vmax.f32 %v380_v15, 0.0 }
 0x138   :  { %v386_v22 = vadd.f32 %v385_v21, %v2641_v57  ;;  %v693_v25 = vmax.f32 %v382_v18, 0.0 }
 0x139   :  { %v694_v24 = vmax.f32 %v384_v20, 0.0  ;;  %648 = vmatmul.mubr.bf16.gmra.mrb[112].mxu0 %v223_v17 }
 0x13a   :  { %v695_v26 = vmax.f32 %v386_v22, 0.0  ;;  %657 = vmatprep.mubr.bf16.mxu0 %v2499_v0 }
 0x13b   :  { %v2658_v29 = vpack.c.bf16 %v694_v24, %v692_v23 }
 0x13c   :  { %v2660_v30 = vpack.c.bf16 %v695_v26, %v693_v25  ;;  %v389_v31 = vpop.f32.mrb[8].mxu0 }
 0x13d   :  { %v390_v32 = vadd.f32 %v389_v31, %v2639_v56  ;;  %v391_v33 = vpop.f32.mrb[9].mxu0 }
 0x13e   :  { %v392_v35 = vadd.f32 %v391_v33, %v2641_v57  ;;  %v393_v36 = vpop.f32.mrb[10].mxu0 }
 0x13f   :  { %v394_v37 = vadd.f32 %v393_v36, %v2639_v56  ;;  %v395_v38 = vpop.f32.mrb[11].mxu0  ;;  %v696_v40 = vmax.f32 %v390_v32, 0.0 }
 0x140   :  { %v396_v39 = vadd.f32 %v395_v38, %v2641_v57  ;;  %v697_v42 = vmax.f32 %v392_v35, 0.0 }
 0x141   :  { %v698_v41 = vmax.f32 %v394_v37, 0.0  ;;  %658 = vmatmul.mubr.bf16.gmra.mrb[116].mxu0 %v224_v34 }
 0x142   :  { %v699_v43 = vmax.f32 %v396_v39, 0.0  ;;  %667 = vmatprep.mubr.bf16.mxu0 %v2499_v0 }
 0x143   :  { %v820_v46 = vpack.c.bf16 %v698_v41, %v696_v40 }
 0x144   :  { %v399_v47 = vpop.f32.mrb[12].mxu0  ;;  %v821_v48 = vpack.c.bf16 %v699_v43, %v697_v42 }
 0x145   :  { %v400_v49 = vadd.f32 %v399_v47, %v2639_v56  ;;  %v401_v50 = vpop.f32.mrb[13].mxu0 }
 0x146   :  { %v402_v52 = vadd.f32 %v401_v50, %v2641_v57  ;;  %v403_v53 = vpop.f32.mrb[14].mxu0  ;;  %1120 = vmatprep.mubr.bf16.mxu1 %v821_v48 }
 0x147   :  { %v404_v54 = vadd.f32 %v403_v53, %v2639_v56  ;;  %v405_v55 = vpop.f32.mrb[15].mxu0  ;;  %1121 = vmatmul.mubr.bf16.vlgmr.msra.gmra.mrb[0].mxu1 %v820_v46  ;;  %v700_v59 = vmax.f32 %v400_v49, 0.0 }
 0x148   :  { %v406_v58 = vadd.f32 %v405_v55, %v2641_v57  ;;  %v701_v61 = vmax.f32 %v402_v52, 0.0 }
 0x149   :  { %v702_v60 = vmax.f32 %v404_v54, 0.0  ;;  %668 = vmatmul.mubr.bf16.gmra.mrb[120].mxu0 %v225_v51 }
 0x14a   :  { %v703_v62 = vmax.f32 %v406_v58, 0.0  ;;  %677 = vmatprep.mubr.bf16.mxu0 %v2499_v0 }
 0x14b   :  { %v822_v2 = vpack.c.bf16 %v702_v60, %v700_v59 }
 0x14c   :  { %v823_v3 = vpack.c.bf16 %v703_v62, %v701_v61  ;;  %v409_v4 = vpop.f32.mrb[16].mxu0 }
 0x14d   :  { %v410_v5 = vadd.f32 %v409_v4, %v2639_v56  ;;  %v411_v6 = vpop.f32.mrb[17].mxu0 }
 0x14e   :  { %v412_v8 = vadd.f32 %v411_v6, %v2641_v57  ;;  %v413_v9 = vpop.f32.mrb[18].mxu0  ;;  %1128 = vmatprep.mubr.bf16.mxu1 %v823_v3 }
 0x14f   :  { %v414_v10 = vadd.f32 %v413_v9, %v2639_v56  ;;  %v415_v11 = vpop.f32.mrb[19].mxu0  ;;  %1129 = vmatmul.mubr.bf16.gmra.mrb[4].mxu1 %v822_v2  ;;  %v704_v0 = vmax.f32 %v410_v5, 0.0 }
 0x150   :  { %v416_v14 = vadd.f32 %v415_v11, %v2641_v57  ;;  %v705_v16 = vmax.f32 %v412_v8, 0.0 }
 0x151   :  { %v706_v15 = vmax.f32 %v414_v10, 0.0  ;;  %678 = vmatmul.mubr.bf16.gmra.mrb[124].mxu0 %v226_v7 }
 0x152   :  { %v707_v17 = vmax.f32 %v416_v14, 0.0  ;;  %1104 = vmatprep.mubr.bf16.mxu0 %v2651_v13 }
 0x153   :  { %v824_v18 = vpack.c.bf16 %v706_v15, %v704_v0 }
 0x154   :  { %v825_v19 = vpack.c.bf16 %v707_v17, %v705_v16  ;;  %v419_v20 = vpop.f32.mrb[20].mxu0 }
 0x155   :  { %v420_v21 = vadd.f32 %v419_v20, %v2639_v56  ;;  %v421_v22 = vpop.f32.mrb[21].mxu0 }
 0x156   :  { %v422_v23 = vadd.f32 %v421_v22, %v2641_v57  ;;  %v423_v24 = vpop.f32.mrb[22].mxu0  ;;  %1136 = vmatprep.mubr.bf16.mxu1 %v825_v19 }
 0x157   :  { %v424_v25 = vadd.f32 %v423_v24, %v2639_v56  ;;  %v425_v26 = vpop.f32.mrb[23].mxu0  ;;  %1137 = vmatmul.mubr.bf16.gmra.mrb[8].mxu1 %v824_v18  ;;  %v708_v28 = vmax.f32 %v420_v21, 0.0 }
 0x158   :  { %v426_v27 = vadd.f32 %v425_v26, %v2641_v57  ;;  %v709_v13 = vmax.f32 %v422_v23, 0.0 }
 0x159   :  { %v710_v31 = vmax.f32 %v424_v25, 0.0  ;;  %1105 = vmatmul.mubr.bf16.vlgmr.msra.gmra.mrb[128].mxu0 %v2649_v12 }
 0x15a   :  { %v711_v32 = vmax.f32 %v426_v27, 0.0  ;;  %1112 = vmatprep.mubr.bf16.mxu0 %v2660_v30 }
 0x15b   :  { %v826_v33 = vpack.c.bf16 %v710_v31, %v708_v28 }
 0x15c   :  { %v827_v34 = vpack.c.bf16 %v711_v32, %v709_v13  ;;  %v429_v35 = vpop.f32.mrb[24].mxu0 }
 0x15d   :  { %v430_v36 = vadd.f32 %v429_v35, %v2639_v56  ;;  %v431_v37 = vpop.f32.mrb[25].mxu0 }
 0x15e   :  { %v432_v38 = vadd.f32 %v431_v37, %v2641_v57  ;;  %v433_v39 = vpop.f32.mrb[26].mxu0  ;;  %1144 = vmatprep.mubr.bf16.mxu1 %v827_v34 }
 0x15f   :  { %v434_v40 = vadd.f32 %v433_v39, %v2639_v56  ;;  %v435_v41 = vpop.f32.mrb[27].mxu0  ;;  %1145 = vmatmul.mubr.bf16.gmra.mrb[12].mxu1 %v826_v33  ;;  %v712_v42 = vmax.f32 %v430_v36, 0.0 }
 0x160   :  { %v436_v12 = vadd.f32 %v435_v41, %v2641_v57  ;;  %v713_v30 = vmax.f32 %v432_v38, 0.0 }
 0x161   :  { %v714_v43 = vmax.f32 %v434_v40, 0.0  ;;  %1113 = vmatmul.mubr.bf16.gmra.mrb[132].mxu0 %v2658_v29 }
 0x162   :  { %v715_v44 = vmax.f32 %v436_v12, 0.0 }
 0x163   :  { %v828_v45 = vpack.c.bf16 %v714_v43, %v712_v42 }
 0x164   :  { %v829_v46 = vpack.c.bf16 %v715_v44, %v713_v30  ;;  %v439_v47 = vpop.f32.mrb[28].mxu0 }
 0x165   :  { %v440_v48 = vadd.f32 %v439_v47, %v2639_v56  ;;  %v441_v49 = vpop.f32.mrb[29].mxu0 }
 0x166   :  { %v442_v50 = vadd.f32 %v441_v49, %v2641_v57  ;;  %v443_v51 = vpop.f32.mrb[30].mxu0  ;;  %1152 = vmatprep.mubr.bf16.mxu1 %v829_v46 }
 0x167   :  { %v444_v52 = vadd.f32 %v443_v51, %v2639_v56  ;;  %v445_v53 = vpop.f32.mrb[31].mxu0  ;;  %1153 = vmatmul.mubr.bf16.gmra.mrb[16].mxu1 %v828_v45  ;;  %v716_v55 = vmax.f32 %v440_v48, 0.0 }
 0x168   :  { %v446_v54 = vadd.f32 %v445_v53, %v2641_v57  ;;  %v717_v58 = vmax.f32 %v442_v50, 0.0 }
 0x169   :  { %v718_v29 = vmax.f32 %v444_v52, 0.0 }
 0x16a   :  { %v719_v59 = vmax.f32 %v446_v54, 0.0 }
 0x16b   :  { %v830_v60 = vpack.c.bf16 %v718_v29, %v716_v55 }
 0x16c   :  { %v831_v61 = vpack.c.bf16 %v719_v59, %v717_v58  ;;  %v449_v62 = vpop.f32.mrb[32].mxu0 }
 0x16d   :  { %v450_v63 = vadd.f32 %v449_v62, %v2639_v56  ;;  %v451_v1 = vpop.f32.mrb[33].mxu0 }
 0x16e   :  { %v452_v2 = vadd.f32 %v451_v1, %v2641_v57  ;;  %v453_v3 = vpop.f32.mrb[34].mxu0  ;;  %1160 = vmatprep.mubr.bf16.mxu1 %v831_v61 }
 0x16f   :  { %v454_v4 = vadd.f32 %v453_v3, %v2639_v56  ;;  %v455_v5 = vpop.f32.mrb[35].mxu0  ;;  %1161 = vmatmul.mubr.bf16.gmra.mrb[20].mxu1 %v830_v60  ;;  %v720_v7 = vmax.f32 %v450_v63, 0.0 }
 0x170   :  { %v456_v6 = vadd.f32 %v455_v5, %v2641_v57  ;;  %v721_v9 = vmax.f32 %v452_v2, 0.0 }
 0x171   :  { %v722_v8 = vmax.f32 %v454_v4, 0.0 }
 0x172   :  { %v723_v10 = vmax.f32 %v456_v6, 0.0 }
 0x173   :  { %v832_v11 = vpack.c.bf16 %v722_v8, %v720_v7 }
 0x174   :  { %v833_v14 = vpack.c.bf16 %v723_v10, %v721_v9  ;;  %v459_v0 = vpop.f32.mrb[36].mxu0 }
 0x175   :  { %v460_v15 = vadd.f32 %v459_v0, %v2639_v56  ;;  %v461_v16 = vpop.f32.mrb[37].mxu0 }
 0x176   :  { %v462_v17 = vadd.f32 %v461_v16, %v2641_v57  ;;  %v463_v18 = vpop.f32.mrb[38].mxu0  ;;  %1168 = vmatprep.mubr.bf16.mxu1 %v833_v14 }
 0x177   :  { %v464_v19 = vadd.f32 %v463_v18, %v2639_v56  ;;  %v465_v20 = vpop.f32.mrb[39].mxu0  ;;  %1169 = vmatmul.mubr.bf16.gmra.mrb[24].mxu1 %v832_v11  ;;  %v724_v22 = vmax.f32 %v460_v15, 0.0 }
 0x178   :  { %v466_v21 = vadd.f32 %v465_v20, %v2641_v57  ;;  %v725_v24 = vmax.f32 %v462_v17, 0.0 }
 0x179   :  { %v726_v23 = vmax.f32 %v464_v19, 0.0 }
 0x17a   :  { %v727_v25 = vmax.f32 %v466_v21, 0.0 }
 0x17b   :  { %v834_v26 = vpack.c.bf16 %v726_v23, %v724_v22 }
 0x17c   :  { %v835_v27 = vpack.c.bf16 %v727_v25, %v725_v24  ;;  %v469_v28 = vpop.f32.mrb[40].mxu0 }
 0x17d   :  { %v470_v31 = vadd.f32 %v469_v28, %v2639_v56  ;;  %v471_v13 = vpop.f32.mrb[41].mxu0 }
 0x17e   :  { %v472_v32 = vadd.f32 %v471_v13, %v2641_v57  ;;  %v473_v33 = vpop.f32.mrb[42].mxu0  ;;  %1176 = vmatprep.mubr.bf16.mxu1 %v835_v27 }
 0x17f   :  { %v474_v34 = vadd.f32 %v473_v33, %v2639_v56  ;;  %v475_v35 = vpop.f32.mrb[43].mxu0  ;;  %1177 = vmatmul.mubr.bf16.gmra.mrb[28].mxu1 %v834_v26  ;;  %v728_v37 = vmax.f32 %v470_v31, 0.0 }
 0x180   :  { %v476_v36 = vadd.f32 %v475_v35, %v2641_v57  ;;  %v729_v39 = vmax.f32 %v472_v32, 0.0 }
 0x181   :  { %v730_v38 = vmax.f32 %v474_v34, 0.0 }
 0x182   :  { %v731_v40 = vmax.f32 %v476_v36, 0.0 }
 0x183   :  { %v836_v41 = vpack.c.bf16 %v730_v38, %v728_v37 }
 0x184   :  { %v837_v12 = vpack.c.bf16 %v731_v40, %v729_v39  ;;  %v479_v42 = vpop.f32.mrb[44].mxu0 }
 0x185   :  { %v480_v43 = vadd.f32 %v479_v42, %v2639_v56  ;;  %v481_v30 = vpop.f32.mrb[45].mxu0 }
 0x186   :  { %v482_v44 = vadd.f32 %v481_v30, %v2641_v57  ;;  %v483_v45 = vpop.f32.mrb[46].mxu0  ;;  %1184 = vmatprep.mubr.bf16.mxu1 %v837_v12 }
 0x187   :  { %v484_v46 = vadd.f32 %v483_v45, %v2639_v56  ;;  %v485_v47 = vpop.f32.mrb[47].mxu0  ;;  %1185 = vmatmul.mubr.bf16.gmra.mrb[32].mxu1 %v836_v41  ;;  %v732_v49 = vmax.f32 %v480_v43, 0.0 }
 0x188   :  { %v486_v48 = vadd.f32 %v485_v47, %v2641_v57  ;;  %v733_v51 = vmax.f32 %v482_v44, 0.0 }
 0x189   :  { %v734_v50 = vmax.f32 %v484_v46, 0.0 }
 0x18a   :  { %v735_v52 = vmax.f32 %v486_v48, 0.0 }
 0x18b   :  { %v838_v53 = vpack.c.bf16 %v734_v50, %v732_v49 }
 0x18c   :  { %v839_v54 = vpack.c.bf16 %v735_v52, %v733_v51  ;;  %v489_v55 = vpop.f32.mrb[48].mxu0 }
 0x18d   :  { %v490_v29 = vadd.f32 %v489_v55, %v2639_v56  ;;  %v491_v58 = vpop.f32.mrb[49].mxu0 }
 0x18e   :  { %v492_v59 = vadd.f32 %v491_v58, %v2641_v57  ;;  %v493_v60 = vpop.f32.mrb[50].mxu0  ;;  %1192 = vmatprep.mubr.bf16.mxu1 %v839_v54 }
 0x18f   :  { %v494_v61 = vadd.f32 %v493_v60, %v2639_v56  ;;  %v495_v62 = vpop.f32.mrb[51].mxu0  ;;  %1193 = vmatmul.mubr.bf16.gmra.mrb[36].mxu1 %v838_v53  ;;  %v736_v1 = vmax.f32 %v490_v29, 0.0 }
 0x190   :  { %v496_v63 = vadd.f32 %v495_v62, %v2641_v57  ;;  %v737_v3 = vmax.f32 %v492_v59, 0.0 }
 0x191   :  { %v738_v2 = vmax.f32 %v494_v61, 0.0 }
 0x192   :  { %v739_v4 = vmax.f32 %v496_v63, 0.0 }
 0x193   :  { %v840_v5 = vpack.c.bf16 %v738_v2, %v736_v1 }
 0x194   :  { %v841_v6 = vpack.c.bf16 %v739_v4, %v737_v3  ;;  %v499_v7 = vpop.f32.mrb[52].mxu0 }
 0x195   :  { %v500_v8 = vadd.f32 %v499_v7, %v2639_v56  ;;  %v501_v9 = vpop.f32.mrb[53].mxu0 }
 0x196   :  { %v502_v10 = vadd.f32 %v501_v9, %v2641_v57  ;;  %v503_v11 = vpop.f32.mrb[54].mxu0  ;;  %1200 = vmatprep.mubr.bf16.mxu1 %v841_v6 }
 0x197   :  { %v504_v14 = vadd.f32 %v503_v11, %v2639_v56  ;;  %v505_v0 = vpop.f32.mrb[55].mxu0  ;;  %1201 = vmatmul.mubr.bf16.gmra.mrb[40].mxu1 %v840_v5  ;;  %v740_v16 = vmax.f32 %v500_v8, 0.0 }
 0x198   :  { %v506_v15 = vadd.f32 %v505_v0, %v2641_v57  ;;  %v741_v18 = vmax.f32 %v502_v10, 0.0 }
 0x199   :  { %v742_v17 = vmax.f32 %v504_v14, 0.0 }
 0x19a   :  { %v743_v19 = vmax.f32 %v506_v15, 0.0 }
 0x19b   :  { %v842_v20 = vpack.c.bf16 %v742_v17, %v740_v16 }
 0x19c   :  { %v843_v21 = vpack.c.bf16 %v743_v19, %v741_v18  ;;  %v509_v22 = vpop.f32.mrb[56].mxu0 }
 0x19d   :  { %v510_v23 = vadd.f32 %v509_v22, %v2639_v56  ;;  %v511_v24 = vpop.f32.mrb[57].mxu0 }
 0x19e   :  { %v512_v25 = vadd.f32 %v511_v24, %v2641_v57  ;;  %v513_v26 = vpop.f32.mrb[58].mxu0  ;;  %1208 = vmatprep.mubr.bf16.mxu1 %v843_v21 }
 0x19f   :  { %v514_v27 = vadd.f32 %v513_v26, %v2639_v56  ;;  %v515_v28 = vpop.f32.mrb[59].mxu0  ;;  %1209 = vmatmul.mubr.bf16.gmra.mrb[44].mxu1 %v842_v20  ;;  %v744_v13 = vmax.f32 %v510_v23, 0.0 }
 0x1a0   :  { %v516_v31 = vadd.f32 %v515_v28, %v2641_v57  ;;  %v745_v33 = vmax.f32 %v512_v25, 0.0 }
 0x1a1   :  { %v746_v32 = vmax.f32 %v514_v27, 0.0 }
 0x1a2   :  { %v747_v34 = vmax.f32 %v516_v31, 0.0 }
 0x1a3   :  { %v844_v35 = vpack.c.bf16 %v746_v32, %v744_v13 }
 0x1a4   :  { %v845_v36 = vpack.c.bf16 %v747_v34, %v745_v33  ;;  %v519_v37 = vpop.f32.mrb[60].mxu0 }
 0x1a5   :  { %v520_v38 = vadd.f32 %v519_v37, %v2639_v56  ;;  %v521_v39 = vpop.f32.mrb[61].mxu0 }
 0x1a6   :  { %v522_v40 = vadd.f32 %v521_v39, %v2641_v57  ;;  %v523_v41 = vpop.f32.mrb[62].mxu0  ;;  %1216 = vmatprep.mubr.bf16.mxu1 %v845_v36 }
 0x1a7   :  { %v524_v12 = vadd.f32 %v523_v41, %v2639_v56  ;;  %v525_v42 = vpop.f32.mrb[63].mxu0  ;;  %1217 = vmatmul.mubr.bf16.gmra.mrb[48].mxu1 %v844_v35  ;;  %v748_v30 = vmax.f32 %v520_v38, 0.0 }
 0x1a8   :  { %v526_v43 = vadd.f32 %v525_v42, %v2641_v57  ;;  %v749_v45 = vmax.f32 %v522_v40, 0.0 }
 0x1a9   :  { %v750_v44 = vmax.f32 %v524_v12, 0.0 }
 0x1aa   :  { %v751_v46 = vmax.f32 %v526_v43, 0.0 }
 0x1ab   :  { %v846_v47 = vpack.c.bf16 %v750_v44, %v748_v30 }
 0x1ac   :  { %v847_v48 = vpack.c.bf16 %v751_v46, %v749_v45  ;;  %v529_v49 = vpop.f32.mrb[64].mxu0 }
 0x1ad   :  { %v530_v50 = vadd.f32 %v529_v49, %v2639_v56  ;;  %v531_v51 = vpop.f32.mrb[65].mxu0 }
 0x1ae   :  { %v532_v52 = vadd.f32 %v531_v51, %v2641_v57  ;;  %v533_v53 = vpop.f32.mrb[66].mxu0  ;;  %1224 = vmatprep.mubr.bf16.mxu1 %v847_v48 }
 0x1af   :  { %v534_v54 = vadd.f32 %v533_v53, %v2639_v56  ;;  %v535_v55 = vpop.f32.mrb[67].mxu0  ;;  %1225 = vmatmul.mubr.bf16.gmra.mrb[52].mxu1 %v846_v47  ;;  %v752_v58 = vmax.f32 %v530_v50, 0.0 }
 0x1b0   :  { %v536_v29 = vadd.f32 %v535_v55, %v2641_v57  ;;  %v753_v60 = vmax.f32 %v532_v52, 0.0 }
 0x1b1   :  { %v754_v59 = vmax.f32 %v534_v54, 0.0 }
 0x1b2   :  { %v755_v61 = vmax.f32 %v536_v29, 0.0 }
 0x1b3   :  { %v848_v62 = vpack.c.bf16 %v754_v59, %v752_v58 }
 0x1b4   :  { %v849_v63 = vpack.c.bf16 %v755_v61, %v753_v60  ;;  %v539_v1 = vpop.f32.mrb[68].mxu0 }
 0x1b5   :  { %v540_v2 = vadd.f32 %v539_v1, %v2639_v56  ;;  %v541_v3 = vpop.f32.mrb[69].mxu0 }
 0x1b6   :  { %v542_v4 = vadd.f32 %v541_v3, %v2641_v57  ;;  %v543_v5 = vpop.f32.mrb[70].mxu0  ;;  %1232 = vmatprep.mubr.bf16.mxu1 %v849_v63 }
 0x1b7   :  { %v544_v6 = vadd.f32 %v543_v5, %v2639_v56  ;;  %v545_v7 = vpop.f32.mrb[71].mxu0  ;;  %1233 = vmatmul.mubr.bf16.gmra.mrb[56].mxu1 %v848_v62  ;;  %v756_v9 = vmax.f32 %v540_v2, 0.0 }
 0x1b8   :  { %v546_v8 = vadd.f32 %v545_v7, %v2641_v57  ;;  %v757_v11 = vmax.f32 %v542_v4, 0.0 }
 0x1b9   :  { %v758_v10 = vmax.f32 %v544_v6, 0.0 }
 0x1ba   :  { %v759_v14 = vmax.f32 %v546_v8, 0.0 }
 0x1bb   :  { %v850_v0 = vpack.c.bf16 %v758_v10, %v756_v9 }
 0x1bc   :  { %v851_v15 = vpack.c.bf16 %v759_v14, %v757_v11  ;;  %v549_v16 = vpop.f32.mrb[72].mxu0 }
 0x1bd   :  { %v550_v17 = vadd.f32 %v549_v16, %v2639_v56  ;;  %v551_v18 = vpop.f32.mrb[73].mxu0 }
 0x1be   :  { %v552_v19 = vadd.f32 %v551_v18, %v2641_v57  ;;  %v553_v20 = vpop.f32.mrb[74].mxu0  ;;  %1240 = vmatprep.mubr.bf16.mxu1 %v851_v15 }
 0x1bf   :  { %v554_v21 = vadd.f32 %v553_v20, %v2639_v56  ;;  %v555_v22 = vpop.f32.mrb[75].mxu0  ;;  %1241 = vmatmul.mubr.bf16.gmra.mrb[60].mxu1 %v850_v0  ;;  %v760_v24 = vmax.f32 %v550_v17, 0.0 }
 0x1c0   :  { %v556_v23 = vadd.f32 %v555_v22, %v2641_v57  ;;  %v761_v26 = vmax.f32 %v552_v19, 0.0 }
 0x1c1   :  { %v762_v25 = vmax.f32 %v554_v21, 0.0 }
 0x1c2   :  { %v763_v27 = vmax.f32 %v556_v23, 0.0 }
 0x1c3   :  { %v852_v28 = vpack.c.bf16 %v762_v25, %v760_v24 }
 0x1c4   :  { %v853_v31 = vpack.c.bf16 %v763_v27, %v761_v26  ;;  %v559_v13 = vpop.f32.mrb[76].mxu0 }
 0x1c5   :  { %v560_v32 = vadd.f32 %v559_v13, %v2639_v56  ;;  %v561_v33 = vpop.f32.mrb[77].mxu0 }
 0x1c6   :  { %v562_v34 = vadd.f32 %v561_v33, %v2641_v57  ;;  %v563_v35 = vpop.f32.mrb[78].mxu0  ;;  %1248 = vmatprep.mubr.bf16.mxu1 %v853_v31 }
 0x1c7   :  { %v564_v36 = vadd.f32 %v563_v35, %v2639_v56  ;;  %v565_v37 = vpop.f32.mrb[79].mxu0  ;;  %1249 = vmatmul.mubr.bf16.gmra.mrb[64].mxu1 %v852_v28  ;;  %v764_v39 = vmax.f32 %v560_v32, 0.0 }
 0x1c8   :  { %v566_v38 = vadd.f32 %v565_v37, %v2641_v57  ;;  %v765_v41 = vmax.f32 %v562_v34, 0.0 }
 0x1c9   :  { %v766_v40 = vmax.f32 %v564_v36, 0.0 }
 0x1ca   :  { %v767_v12 = vmax.f32 %v566_v38, 0.0 }
 0x1cb   :  { %v854_v42 = vpack.c.bf16 %v766_v40, %v764_v39 }
 0x1cc   :  { %v855_v43 = vpack.c.bf16 %v767_v12, %v765_v41  ;;  %v569_v30 = vpop.f32.mrb[80].mxu0 }
 0x1cd   :  { %v570_v44 = vadd.f32 %v569_v30, %v2639_v56  ;;  %v571_v45 = vpop.f32.mrb[81].mxu0 }
 0x1ce   :  { %v572_v46 = vadd.f32 %v571_v45, %v2641_v57  ;;  %v573_v47 = vpop.f32.mrb[82].mxu0  ;;  %1256 = vmatprep.mubr.bf16.mxu1 %v855_v43 }
 0x1cf   :  { %v574_v48 = vadd.f32 %v573_v47, %v2639_v56  ;;  %v575_v49 = vpop.f32.mrb[83].mxu0  ;;  %1257 = vmatmul.mubr.bf16.gmra.mrb[68].mxu1 %v854_v42  ;;  %v768_v51 = vmax.f32 %v570_v44, 0.0 }
 0x1d0   :  { %v576_v50 = vadd.f32 %v575_v49, %v2641_v57  ;;  %v769_v53 = vmax.f32 %v572_v46, 0.0 }
 0x1d1   :  { %v770_v52 = vmax.f32 %v574_v48, 0.0 }
 0x1d2   :  { %v771_v54 = vmax.f32 %v576_v50, 0.0 }
 0x1d3   :  { %v856_v55 = vpack.c.bf16 %v770_v52, %v768_v51 }
 0x1d4   :  { %v857_v29 = vpack.c.bf16 %v771_v54, %v769_v53  ;;  %v579_v58 = vpop.f32.mrb[84].mxu0 }
 0x1d5   :  { %v580_v59 = vadd.f32 %v579_v58, %v2639_v56  ;;  %v581_v60 = vpop.f32.mrb[85].mxu0 }
 0x1d6   :  { %v582_v61 = vadd.f32 %v581_v60, %v2641_v57  ;;  %v583_v62 = vpop.f32.mrb[86].mxu0  ;;  %1264 = vmatprep.mubr.bf16.mxu1 %v857_v29 }
 0x1d7   :  { %v584_v63 = vadd.f32 %v583_v62, %v2639_v56  ;;  %v585_v1 = vpop.f32.mrb[87].mxu0  ;;  %1265 = vmatmul.mubr.bf16.gmra.mrb[72].mxu1 %v856_v55  ;;  %v772_v3 = vmax.f32 %v580_v59, 0.0 }
 0x1d8   :  { %v586_v2 = vadd.f32 %v585_v1, %v2641_v57  ;;  %v773_v5 = vmax.f32 %v582_v61, 0.0 }
 0x1d9   :  { %v774_v4 = vmax.f32 %v584_v63, 0.0 }
 0x1da   :  { %v775_v6 = vmax.f32 %v586_v2, 0.0 }
 0x1db   :  { %v858_v7 = vpack.c.bf16 %v774_v4, %v772_v3 }
 0x1dc   :  { %v859_v8 = vpack.c.bf16 %v775_v6, %v773_v5  ;;  %v589_v9 = vpop.f32.mrb[88].mxu0 }
 0x1dd   :  { %v590_v10 = vadd.f32 %v589_v9, %v2639_v56  ;;  %v591_v11 = vpop.f32.mrb[89].mxu0 }
 0x1de   :  { %v592_v14 = vadd.f32 %v591_v11, %v2641_v57  ;;  %v593_v0 = vpop.f32.mrb[90].mxu0  ;;  %1272 = vmatprep.mubr.bf16.mxu1 %v859_v8 }
 0x1df   :  { %v594_v15 = vadd.f32 %v593_v0, %v2639_v56  ;;  %v595_v16 = vpop.f32.mrb[91].mxu0  ;;  %1273 = vmatmul.mubr.bf16.gmra.mrb[76].mxu1 %v858_v7  ;;  %v776_v18 = vmax.f32 %v590_v10, 0.0 }
 0x1e0   :  { %v596_v17 = vadd.f32 %v595_v16, %v2641_v57  ;;  %v777_v20 = vmax.f32 %v592_v14, 0.0 }
 0x1e1   :  { %v778_v19 = vmax.f32 %v594_v15, 0.0 }
 0x1e2   :  { %v779_v21 = vmax.f32 %v596_v17, 0.0 }
 0x1e3   :  { %v860_v22 = vpack.c.bf16 %v778_v19, %v776_v18 }
 0x1e4   :  { %v861_v23 = vpack.c.bf16 %v779_v21, %v777_v20  ;;  %v599_v24 = vpop.f32.mrb[92].mxu0 }
 0x1e5   :  { %v600_v25 = vadd.f32 %v599_v24, %v2639_v56  ;;  %v601_v26 = vpop.f32.mrb[93].mxu0 }
 0x1e6   :  { %v602_v27 = vadd.f32 %v601_v26, %v2641_v57  ;;  %v603_v28 = vpop.f32.mrb[94].mxu0  ;;  %1280 = vmatprep.mubr.bf16.mxu1 %v861_v23 }
 0x1e7   :  { %v604_v31 = vadd.f32 %v603_v28, %v2639_v56  ;;  %v605_v13 = vpop.f32.mrb[95].mxu0  ;;  %1281 = vmatmul.mubr.bf16.gmra.mrb[80].mxu1 %v860_v22  ;;  %v780_v33 = vmax.f32 %v600_v25, 0.0 }
 0x1e8   :  { %v606_v32 = vadd.f32 %v605_v13, %v2641_v57  ;;  %v781_v35 = vmax.f32 %v602_v27, 0.0 }
 0x1e9   :  { %v782_v34 = vmax.f32 %v604_v31, 0.0 }
 0x1ea   :  { %v783_v36 = vmax.f32 %v606_v32, 0.0 }
 0x1eb   :  { %v862_v37 = vpack.c.bf16 %v782_v34, %v780_v33 }
 0x1ec   :  { %v863_v38 = vpack.c.bf16 %v783_v36, %v781_v35  ;;  %v609_v39 = vpop.f32.mrb[96].mxu0 }
 0x1ed   :  { %v610_v40 = vadd.f32 %v609_v39, %v2639_v56  ;;  %v611_v41 = vpop.f32.mrb[97].mxu0 }
 0x1ee   :  { %v612_v12 = vadd.f32 %v611_v41, %v2641_v57  ;;  %v613_v42 = vpop.f32.mrb[98].mxu0  ;;  %1288 = vmatprep.mubr.bf16.mxu1 %v863_v38 }
 0x1ef   :  { %v614_v43 = vadd.f32 %v613_v42, %v2639_v56  ;;  %v615_v30 = vpop.f32.mrb[99].mxu0  ;;  %1289 = vmatmul.mubr.bf16.gmra.mrb[84].mxu1 %v862_v37  ;;  %v784_v45 = vmax.f32 %v610_v40, 0.0 }
 0x1f0   :  { %v616_v44 = vadd.f32 %v615_v30, %v2641_v57  ;;  %v785_v47 = vmax.f32 %v612_v12, 0.0 }
 0x1f1   :  { %v786_v46 = vmax.f32 %v614_v43, 0.0 }
 0x1f2   :  { %v787_v48 = vmax.f32 %v616_v44, 0.0 }
 0x1f3   :  { %v864_v49 = vpack.c.bf16 %v786_v46, %v784_v45 }
 0x1f4   :  { %v865_v50 = vpack.c.bf16 %v787_v48, %v785_v47  ;;  %v619_v51 = vpop.f32.mrb[100].mxu0 }
 0x1f5   :  { %v620_v52 = vadd.f32 %v619_v51, %v2639_v56  ;;  %v621_v53 = vpop.f32.mrb[101].mxu0 }
 0x1f6   :  { %v622_v54 = vadd.f32 %v621_v53, %v2641_v57  ;;  %v623_v55 = vpop.f32.mrb[102].mxu0  ;;  %1296 = vmatprep.mubr.bf16.mxu1 %v865_v50 }
 0x1f7   :  { %v624_v29 = vadd.f32 %v623_v55, %v2639_v56  ;;  %v625_v58 = vpop.f32.mrb[103].mxu0  ;;  %1297 = vmatmul.mubr.bf16.gmra.mrb[88].mxu1 %v864_v49  ;;  %v788_v60 = vmax.f32 %v620_v52, 0.0 }
 0x1f8   :  { %v626_v59 = vadd.f32 %v625_v58, %v2641_v57  ;;  %v789_v62 = vmax.f32 %v622_v54, 0.0 }
 0x1f9   :  { %v790_v61 = vmax.f32 %v624_v29, 0.0 }
 0x1fa   :  { %v791_v63 = vmax.f32 %v626_v59, 0.0  ;;  %v2783_v59 = vld [vmem:[%s2876_s4] ss:$0 sm:$0xff]  ;;  %s2500_s4 = smov [#allocation9]  }
 0x1fb   :  { %v866_v1 = vpack.c.bf16 %v790_v61, %v788_v60  ;;  %s1952_s8 = sshll.u32 %s2500_s4, 4  ;;  %s1953_s8 = int_to_ptr.vmem [resolvable:$true] %s1952_s8 }
 0x1fc   :  { %v867_v2 = vpack.c.bf16 %v791_v63, %v789_v62  ;;  %v629_v3 = vpop.f32.mrb[104].mxu0  ;;  %s2464_s9 = scalar_lea.vmem %s1953_s8, 4096  ;;  %p2469_p11 = scmp.lt.s32.totalorder %s1953_s8, %s1953_s8 }
 0x1fd   :  { %v630_v4 = vadd.f32 %v629_v3, %v2639_v56  ;;  %v631_v5 = vpop.f32.mrb[105].mxu0  ;;  %p2465_p10 = scmp.ne.s32.totalorder %s1953_s8, %s2464_s9  ;;  %p2470_p12 = scmp.lt.s32.totalorder %s2464_s9, %s2464_s9 }
 0x1fe   :  { %v632_v6 = vadd.f32 %v631_v5, %v2641_v57  ;;  %v633_v7 = vpop.f32.mrb[106].mxu0  ;;  %1304 = vmatprep.mubr.bf16.mxu1 %v867_v2 }
 0x1ff   :  { %v634_v8 = vadd.f32 %v633_v7, %v2639_v56  ;;  %v635_v9 = vpop.f32.mrb[107].mxu0  ;;  %1305 = vmatmul.mubr.bf16.gmra.mrb[92].mxu1 %v866_v1  ;;  %v792_v11 = vmax.f32 %v630_v4, 0.0  ;;  %p2471_p13 = por %p2470_p12, %p2469_p11 }
 0x200   :  { %v636_v10 = vadd.f32 %v635_v9, %v2641_v57  ;;  %v793_v0 = vmax.f32 %v632_v6, 0.0 }
 0x201   :  { %v794_v14 = vmax.f32 %v634_v8, 0.0  ;;  %p2472_p0 = pnand %p2471_p13, %p2465_p10 }
 0x202   :  { %v795_v15 = vmax.f32 %v636_v10, 0.0 }
 0x203   :  { %v868_v16 = vpack.c.bf16 %v794_v14, %v792_v11 }
 0x204   :  { %v869_v17 = vpack.c.bf16 %v795_v15, %v793_v0  ;;  %v639_v18 = vpop.f32.mrb[108].mxu0 }
 0x205   :  { %v640_v19 = vadd.f32 %v639_v18, %v2639_v56  ;;  %v641_v20 = vpop.f32.mrb[109].mxu0 }
 0x206   :  { %v642_v21 = vadd.f32 %v641_v20, %v2641_v57  ;;  %v643_v22 = vpop.f32.mrb[110].mxu0  ;;  %1312 = vmatprep.mubr.bf16.mxu1 %v869_v17 }
 0x207   :  { %v644_v23 = vadd.f32 %v643_v22, %v2639_v56  ;;  %v645_v24 = vpop.f32.mrb[111].mxu0  ;;  %1313 = vmatmul.mubr.bf16.gmra.mrb[96].mxu1 %v868_v16  ;;  %v796_v26 = vmax.f32 %v640_v19, 0.0 }
 0x208   :  { %v646_v25 = vadd.f32 %v645_v24, %v2641_v57  ;;  %v797_v28 = vmax.f32 %v642_v21, 0.0 }
 0x209   :  { %v798_v27 = vmax.f32 %v644_v23, 0.0 }
 0x20a   :  { %v799_v31 = vmax.f32 %v646_v25, 0.0 }
 0x20b   :  { %v870_v13 = vpack.c.bf16 %v798_v27, %v796_v26 }
 0x20c   :  { %v871_v32 = vpack.c.bf16 %v799_v31, %v797_v28  ;;  %v649_v33 = vpop.f32.mrb[112].mxu0 }
 0x20d   :  { %v650_v34 = vadd.f32 %v649_v33, %v2639_v56  ;;  %v651_v35 = vpop.f32.mrb[113].mxu0 }
 0x20e   :  { %v652_v36 = vadd.f32 %v651_v35, %v2641_v57  ;;  %v653_v37 = vpop.f32.mrb[114].mxu0  ;;  %1320 = vmatprep.mubr.bf16.mxu1 %v871_v32 }
 0x20f   :  { %v654_v38 = vadd.f32 %v653_v37, %v2639_v56  ;;  %v655_v39 = vpop.f32.mrb[115].mxu0  ;;  %1321 = vmatmul.mubr.bf16.gmra.mrb[100].mxu1 %v870_v13  ;;  %v800_v41 = vmax.f32 %v650_v34, 0.0 }
 0x210   :  { %v656_v40 = vadd.f32 %v655_v39, %v2641_v57  ;;  %v801_v42 = vmax.f32 %v652_v36, 0.0 }
 0x211   :  { %v802_v12 = vmax.f32 %v654_v38, 0.0 }
 0x212   :  { %v803_v43 = vmax.f32 %v656_v40, 0.0 }
 0x213   :  { %v872_v30 = vpack.c.bf16 %v802_v12, %v800_v41 }
 0x214   :  { %v873_v44 = vpack.c.bf16 %v803_v43, %v801_v42  ;;  %v659_v45 = vpop.f32.mrb[116].mxu0 }
 0x215   :  { %v660_v46 = vadd.f32 %v659_v45, %v2639_v56  ;;  %v661_v47 = vpop.f32.mrb[117].mxu0 }
 0x216   :  { %v662_v48 = vadd.f32 %v661_v47, %v2641_v57  ;;  %v663_v49 = vpop.f32.mrb[118].mxu0  ;;  %1328 = vmatprep.mubr.bf16.mxu1 %v873_v44 }
 0x217   :  { %v664_v50 = vadd.f32 %v663_v49, %v2639_v56  ;;  %v665_v51 = vpop.f32.mrb[119].mxu0  ;;  %1329 = vmatmul.mubr.bf16.gmra.mrb[104].mxu1 %v872_v30  ;;  %v804_v53 = vmax.f32 %v660_v46, 0.0 }
 0x218   :  { %v666_v52 = vadd.f32 %v665_v51, %v2641_v57  ;;  %v805_v55 = vmax.f32 %v662_v48, 0.0 }
 0x219   :  { %v806_v54 = vmax.f32 %v664_v50, 0.0 }
 0x21a   :  { %v807_v29 = vmax.f32 %v666_v52, 0.0  ;;  %v1122_v58 = vpop.f32.mrb[0].mxu1 }
 0x21b   :  { %v874_v60 = vpack.c.bf16 %v806_v54, %v804_v53  ;;  %v1124_v61 = vpop.f32.mrb[1].mxu1  ;;  %v1567_v2 = vadd.f32 %v2783_v59, %v1122_v58 }
 0x21c   :  { %v875_v62 = vpack.c.bf16 %v807_v29, %v805_v55  ;;  %v669_v63 = vpop.f32.mrb[120].mxu0  ;;  %v1125_v1 = vpop.f32.mrb[2].mxu1 }
 0x21d   :  { %v670_v3 = vadd.f32 %v669_v63, %v2639_v56  ;;  %v1568_v4 = vadd.f32 %v2783_v59, %v1125_v1  ;;  %v671_v5 = vpop.f32.mrb[121].mxu0  ;;  %v1127_v6 = vpop.f32.mrb[3].mxu1 }
 0x21e   :  { %v672_v7 = vadd.f32 %v671_v5, %v2641_v57  ;;  %v673_v8 = vpop.f32.mrb[122].mxu0  ;;  %1336 = vmatprep.mubr.bf16.mxu1 %v875_v62 }
 0x21f   :  { %v2139_v9 = vpack.c.bf16 %v1568_v4, %v1567_v2  ;;  %v674_v10 = vadd.f32 %v673_v8, %v2639_v56  ;;  %v675_v11 = vpop.f32.mrb[123].mxu0  ;;  %1337 = vmatmul.mubr.bf16.gmra.mrb[108].mxu1 %v874_v60  ;;  %v808_v0 = vmax.f32 %v670_v3, 0.0 }
 0x220   :  { %v676_v14 = vadd.f32 %v675_v11, %v2641_v57  ;;  %v809_v16 = vmax.f32 %v672_v7, 0.0 }
 0x221   :  { %2287 = vst [vmem:[#allocation9 + $0x10] sm:$0xff] %v2139_v9   ;;  %v810_v15 = vmax.f32 %v674_v10, 0.0 }
 0x222   :  { %v811_v17 = vmax.f32 %v676_v14, 0.0  ;;  %v1130_v18 = vpop.f32.mrb[4].mxu1 }
 0x223   :  { %v876_v19 = vpack.c.bf16 %v810_v15, %v808_v0  ;;  %v1132_v20 = vpop.f32.mrb[5].mxu1  ;;  %v1569_v24 = vadd.f32 %v2783_v59, %v1130_v18 }
 0x224   :  { %v877_v21 = vpack.c.bf16 %v811_v17, %v809_v16  ;;  %v679_v22 = vpop.f32.mrb[124].mxu0  ;;  %v1133_v23 = vpop.f32.mrb[6].mxu1 }
 0x225   :  { %v680_v25 = vadd.f32 %v679_v22, %v2639_v56  ;;  %v1570_v26 = vadd.f32 %v2783_v59, %v1133_v23  ;;  %v681_v27 = vpop.f32.mrb[125].mxu0  ;;  %v1135_v28 = vpop.f32.mrb[7].mxu1 }
 0x226   :  { %v682_v31 = vadd.f32 %v681_v27, %v2641_v57  ;;  %v683_v13 = vpop.f32.mrb[126].mxu0  ;;  %1344 = vmatprep.mubr.bf16.mxu1 %v877_v21 }
 0x227   :  { %v2144_v32 = vpack.c.bf16 %v1570_v26, %v1569_v24  ;;  %v684_v33 = vadd.f32 %v683_v13, %v2639_v56  ;;  %v685_v34 = vpop.f32.mrb[127].mxu0  ;;  %1345 = vmatmul.mubr.bf16.gmra.mrb[112].mxu1 %v876_v19  ;;  %v812_v36 = vmax.f32 %v680_v25, 0.0 }
 0x228   :  { %v686_v35 = vadd.f32 %v685_v34, %v2641_v57  ;;  %v813_v38 = vmax.f32 %v682_v31, 0.0 }
 0x229   :  { %2288 = vst [vmem:[#allocation9 + $0x18] sm:$0xff] %v2144_v32   ;;  %v814_v37 = vmax.f32 %v684_v33, 0.0 }
 0x22a   :  { %v815_v39 = vmax.f32 %v686_v35, 0.0  ;;  %v1138_v40 = vpop.f32.mrb[8].mxu1 }
 0x22b   :  { %v878_v41 = vpack.c.bf16 %v814_v37, %v812_v36  ;;  %v1140_v12 = vpop.f32.mrb[9].mxu1  ;;  %v1571_v44 = vadd.f32 %v2783_v59, %v1138_v40 }
 0x22c   :  { %v879_v42 = vpack.c.bf16 %v815_v39, %v813_v38  ;;  %v1106_v43 = vpop.f32.mrb[128].mxu0  ;;  %v1141_v30 = vpop.f32.mrb[10].mxu1 }
 0x22d   :  { %v1572_v45 = vadd.f32 %v2783_v59, %v1141_v30  ;;  %v1108_v56 = vpop.f32.mrb[129].mxu0  ;;  %v1143_v46 = vpop.f32.mrb[11].mxu1  ;;  %v1563_v57 = vadd.f32 %v2783_v59, %v1106_v43 }
 0x22e   :  { %v1109_v47 = vpop.f32.mrb[130].mxu0  ;;  %1352 = vmatprep.mubr.bf16.mxu1 %v879_v42 }
 0x22f   :  { %v2149_v48 = vpack.c.bf16 %v1572_v45, %v1571_v44  ;;  %v1564_v49 = vadd.f32 %v2783_v59, %v1109_v47  ;;  %v1111_v50 = vpop.f32.mrb[131].mxu0  ;;  %1353 = vmatmul.mubr.bf16.gmra.mrb[116].mxu1 %v878_v41 }
 0x231   :  { %2289 = vst [vmem:[#allocation9 + $0x20] sm:$0xff] %v2149_v48   ;;  %v2129_v51 = vpack.c.bf16 %v1564_v49, %v1563_v57 }
 0x232   :  { %v1146_v52 = vpop.f32.mrb[12].mxu1 }
 0x233   :  { %2130 = vst [vmem:[#allocation9] sm:$0xff] %v2129_v51   ;;  %v1148_v53 = vpop.f32.mrb[13].mxu1  ;;  %v1573_v29 = vadd.f32 %v2783_v59, %v1146_v52 }
 0x234   :  { %v1114_v54 = vpop.f32.mrb[132].mxu0  ;;  %v1149_v55 = vpop.f32.mrb[14].mxu1 }
 0x235   :  { %v1574_v58 = vadd.f32 %v2783_v59, %v1149_v55  ;;  %v1116_v60 = vpop.f32.mrb[133].mxu0  ;;  %v1151_v61 = vpop.f32.mrb[15].mxu1  ;;  %v1565_v63 = vadd.f32 %v2783_v59, %v1114_v54 }
 0x236   :  { %v1117_v62 = vpop.f32.mrb[134].mxu0 }
 0x237   :  { %v2154_v1 = vpack.c.bf16 %v1574_v58, %v1573_v29  ;;  %v1566_v2 = vadd.f32 %v2783_v59, %v1117_v62  ;;  %v1119_v3 = vpop.f32.mrb[135].mxu0 }
 0x239   :  { %2290 = vst [vmem:[#allocation9 + $0x28] sm:$0xff] %v2154_v1   ;;  %v2134_v4 = vpack.c.bf16 %v1566_v2, %v1565_v63 }
 0x23a   :  { %v1154_v5 = vpop.f32.mrb[16].mxu1 }
 0x23b   :  { %2286 = vst [vmem:[#allocation9 + $0x8] sm:$0xff] %v2134_v4   ;;  %v1156_v6 = vpop.f32.mrb[17].mxu1  ;;  %v1575_v8 = vadd.f32 %v2783_v59, %v1154_v5 }
 0x23c   :  { %v1157_v7 = vpop.f32.mrb[18].mxu1 }
 0x23d   :  { %v1576_v9 = vadd.f32 %v2783_v59, %v1157_v7  ;;  %v1159_v10 = vpop.f32.mrb[19].mxu1 }
 0x23f   :  { %v2159_v11 = vpack.c.bf16 %v1576_v9, %v1575_v8 }
 0x241   :  { %2291 = vst [vmem:[#allocation9 + $0x30] sm:$0xff] %v2159_v11  }
 0x242   :  { %v1162_v14 = vpop.f32.mrb[20].mxu1 }
 0x243   :  { %v1164_v0 = vpop.f32.mrb[21].mxu1  ;;  %v1577_v16 = vadd.f32 %v2783_v59, %v1162_v14 }
 0x244   :  { %v1165_v15 = vpop.f32.mrb[22].mxu1 }
 0x245   :  { %v1578_v17 = vadd.f32 %v2783_v59, %v1165_v15  ;;  %v1167_v18 = vpop.f32.mrb[23].mxu1 }
 0x247   :  { %v2164_v19 = vpack.c.bf16 %v1578_v17, %v1577_v16 }
 0x249   :  { %2292 = vst [vmem:[#allocation9 + $0x38] sm:$0xff] %v2164_v19  }
 0x24a   :  { %v1170_v20 = vpop.f32.mrb[24].mxu1 }
 0x24b   :  { %v1172_v21 = vpop.f32.mrb[25].mxu1  ;;  %v1579_v23 = vadd.f32 %v2783_v59, %v1170_v20 }
 0x24c   :  { %v1173_v22 = vpop.f32.mrb[26].mxu1 }
 0x24d   :  { %v1580_v24 = vadd.f32 %v2783_v59, %v1173_v22  ;;  %v1175_v25 = vpop.f32.mrb[27].mxu1 }
 0x24f   :  { %v2169_v26 = vpack.c.bf16 %v1580_v24, %v1579_v23 }
 0x251   :  { %2293 = vst [vmem:[#allocation9 + $0x40] sm:$0xff] %v2169_v26  }
 0x252   :  { %v1178_v27 = vpop.f32.mrb[28].mxu1 }
 0x253   :  { %v1180_v28 = vpop.f32.mrb[29].mxu1  ;;  %v1581_v13 = vadd.f32 %v2783_v59, %v1178_v27 }
 0x254   :  { %v1181_v31 = vpop.f32.mrb[30].mxu1 }
 0x255   :  { %v1582_v32 = vadd.f32 %v2783_v59, %v1181_v31  ;;  %v1183_v33 = vpop.f32.mrb[31].mxu1 }
 0x257   :  { %v2174_v34 = vpack.c.bf16 %v1582_v32, %v1581_v13 }
 0x259   :  { %2294 = vst [vmem:[#allocation9 + $0x48] sm:$0xff] %v2174_v34  }
 0x25a   :  { %v1186_v35 = vpop.f32.mrb[32].mxu1 }
 0x25b   :  { %v1188_v36 = vpop.f32.mrb[33].mxu1  ;;  %v1583_v38 = vadd.f32 %v2783_v59, %v1186_v35 }
 0x25c   :  { %v1189_v37 = vpop.f32.mrb[34].mxu1 }
 0x25d   :  { %v1584_v39 = vadd.f32 %v2783_v59, %v1189_v37  ;;  %v1191_v40 = vpop.f32.mrb[35].mxu1 }
 0x25f   :  { %v2179_v41 = vpack.c.bf16 %v1584_v39, %v1583_v38 }
 0x261   :  { %2295 = vst [vmem:[#allocation9 + $0x50] sm:$0xff] %v2179_v41  }
 0x262   :  { %v1194_v12 = vpop.f32.mrb[36].mxu1 }
 0x263   :  { %v1196_v42 = vpop.f32.mrb[37].mxu1  ;;  %v1585_v30 = vadd.f32 %v2783_v59, %v1194_v12 }
 0x264   :  { %v1197_v43 = vpop.f32.mrb[38].mxu1 }
 0x265   :  { %v1586_v44 = vadd.f32 %v2783_v59, %v1197_v43  ;;  %v1199_v45 = vpop.f32.mrb[39].mxu1 }
 0x267   :  { %v2184_v56 = vpack.c.bf16 %v1586_v44, %v1585_v30 }
 0x269   :  { %2296 = vst [vmem:[#allocation9 + $0x58] sm:$0xff] %v2184_v56  }
 0x26a   :  { %v1202_v46 = vpop.f32.mrb[40].mxu1 }
 0x26b   :  { %v1204_v47 = vpop.f32.mrb[41].mxu1  ;;  %v1587_v48 = vadd.f32 %v2783_v59, %v1202_v46 }
 0x26c   :  { %v1205_v57 = vpop.f32.mrb[42].mxu1 }
 0x26d   :  { %v1588_v49 = vadd.f32 %v2783_v59, %v1205_v57  ;;  %v1207_v50 = vpop.f32.mrb[43].mxu1 }
 0x26f   :  { %v2189_v51 = vpack.c.bf16 %v1588_v49, %v1587_v48 }
 0x271   :  { %2297 = vst [vmem:[#allocation9 + $0x60] sm:$0xff] %v2189_v51  }
 0x272   :  { %v1210_v52 = vpop.f32.mrb[44].mxu1 }
 0x273   :  { %v1212_v53 = vpop.f32.mrb[45].mxu1  ;;  %v1589_v55 = vadd.f32 %v2783_v59, %v1210_v52 }
 0x274   :  { %v1213_v54 = vpop.f32.mrb[46].mxu1 }
 0x275   :  { %v1590_v29 = vadd.f32 %v2783_v59, %v1213_v54  ;;  %v1215_v58 = vpop.f32.mrb[47].mxu1 }
 0x277   :  { %v2194_v60 = vpack.c.bf16 %v1590_v29, %v1589_v55 }
 0x279   :  { %2298 = vst [vmem:[#allocation9 + $0x68] sm:$0xff] %v2194_v60  }
 0x27a   :  { %v1218_v61 = vpop.f32.mrb[48].mxu1 }
 0x27b   :  { %v1220_v62 = vpop.f32.mrb[49].mxu1  ;;  %v1591_v1 = vadd.f32 %v2783_v59, %v1218_v61 }
 0x27c   :  { %v1221_v63 = vpop.f32.mrb[50].mxu1 }
 0x27d   :  { %v1592_v2 = vadd.f32 %v2783_v59, %v1221_v63  ;;  %v1223_v3 = vpop.f32.mrb[51].mxu1 }
 0x27f   :  { %v2199_v4 = vpack.c.bf16 %v1592_v2, %v1591_v1 }
 0x281   :  { %2299 = vst [vmem:[#allocation9 + $0x70] sm:$0xff] %v2199_v4  }
 0x282   :  { %v1226_v5 = vpop.f32.mrb[52].mxu1 }
 0x283   :  { %v1228_v6 = vpop.f32.mrb[53].mxu1  ;;  %v1593_v8 = vadd.f32 %v2783_v59, %v1226_v5 }
 0x284   :  { %v1229_v7 = vpop.f32.mrb[54].mxu1 }
 0x285   :  { %v1594_v9 = vadd.f32 %v2783_v59, %v1229_v7  ;;  %v1231_v10 = vpop.f32.mrb[55].mxu1 }
 0x287   :  { %v2204_v11 = vpack.c.bf16 %v1594_v9, %v1593_v8 }
 0x289   :  { %2300 = vst [vmem:[#allocation9 + $0x78] sm:$0xff] %v2204_v11  }
 0x28a   :  { %v1234_v14 = vpop.f32.mrb[56].mxu1 }
 0x28b   :  { %v1236_v0 = vpop.f32.mrb[57].mxu1  ;;  %v1595_v16 = vadd.f32 %v2783_v59, %v1234_v14 }
 0x28c   :  { %v1237_v15 = vpop.f32.mrb[58].mxu1 }
 0x28d   :  { %v1596_v17 = vadd.f32 %v2783_v59, %v1237_v15  ;;  %v1239_v18 = vpop.f32.mrb[59].mxu1 }
 0x28f   :  { %v2209_v19 = vpack.c.bf16 %v1596_v17, %v1595_v16 }
 0x291   :  { %2301 = vst [vmem:[#allocation9 + $0x80] sm:$0xff] %v2209_v19  }
 0x292   :  { %v1242_v20 = vpop.f32.mrb[60].mxu1 }
 0x293   :  { %v1244_v21 = vpop.f32.mrb[61].mxu1  ;;  %v1597_v23 = vadd.f32 %v2783_v59, %v1242_v20 }
 0x294   :  { %v1245_v22 = vpop.f32.mrb[62].mxu1 }
 0x295   :  { %v1598_v24 = vadd.f32 %v2783_v59, %v1245_v22  ;;  %v1247_v25 = vpop.f32.mrb[63].mxu1 }
 0x297   :  { %v2214_v26 = vpack.c.bf16 %v1598_v24, %v1597_v23 }
 0x299   :  { %2302 = vst [vmem:[#allocation9 + $0x88] sm:$0xff] %v2214_v26  }
 0x29a   :  { %v1250_v27 = vpop.f32.mrb[64].mxu1 }
 0x29b   :  { %v1252_v28 = vpop.f32.mrb[65].mxu1  ;;  %v1599_v13 = vadd.f32 %v2783_v59, %v1250_v27 }
 0x29c   :  { %v1253_v31 = vpop.f32.mrb[66].mxu1 }
 0x29d   :  { %v1600_v32 = vadd.f32 %v2783_v59, %v1253_v31  ;;  %v1255_v33 = vpop.f32.mrb[67].mxu1 }
 0x29f   :  { %v2219_v34 = vpack.c.bf16 %v1600_v32, %v1599_v13 }
 0x2a1   :  { %2303 = vst [vmem:[#allocation9 + $0x90] sm:$0xff] %v2219_v34  }
 0x2a2   :  { %v1258_v35 = vpop.f32.mrb[68].mxu1 }
 0x2a3   :  { %v1260_v36 = vpop.f32.mrb[69].mxu1  ;;  %v1601_v38 = vadd.f32 %v2783_v59, %v1258_v35 }
 0x2a4   :  { %v1261_v37 = vpop.f32.mrb[70].mxu1 }
 0x2a5   :  { %v1602_v39 = vadd.f32 %v2783_v59, %v1261_v37  ;;  %v1263_v40 = vpop.f32.mrb[71].mxu1 }
 0x2a7   :  { %v2224_v41 = vpack.c.bf16 %v1602_v39, %v1601_v38 }
 0x2a9   :  { %2304 = vst [vmem:[#allocation9 + $0x98] sm:$0xff] %v2224_v41  }
 0x2aa   :  { %v1266_v12 = vpop.f32.mrb[72].mxu1 }
 0x2ab   :  { %v1268_v42 = vpop.f32.mrb[73].mxu1  ;;  %v1603_v30 = vadd.f32 %v2783_v59, %v1266_v12 }
 0x2ac   :  { %v1269_v43 = vpop.f32.mrb[74].mxu1 }
 0x2ad   :  { %v1604_v44 = vadd.f32 %v2783_v59, %v1269_v43  ;;  %v1271_v45 = vpop.f32.mrb[75].mxu1 }
 0x2af   :  { %v2229_v56 = vpack.c.bf16 %v1604_v44, %v1603_v30 }
 0x2b1   :  { %2305 = vst [vmem:[#allocation9 + $0xa0] sm:$0xff] %v2229_v56  }
 0x2b2   :  { %v1274_v46 = vpop.f32.mrb[76].mxu1 }
 0x2b3   :  { %v1276_v47 = vpop.f32.mrb[77].mxu1  ;;  %v1605_v48 = vadd.f32 %v2783_v59, %v1274_v46 }
 0x2b4   :  { %v1277_v57 = vpop.f32.mrb[78].mxu1 }
 0x2b5   :  { %v1606_v49 = vadd.f32 %v2783_v59, %v1277_v57  ;;  %v1279_v50 = vpop.f32.mrb[79].mxu1 }
 0x2b7   :  { %v2234_v51 = vpack.c.bf16 %v1606_v49, %v1605_v48 }
 0x2b9   :  { %2306 = vst [vmem:[#allocation9 + $0xa8] sm:$0xff] %v2234_v51  }
 0x2ba   :  { %v1282_v52 = vpop.f32.mrb[80].mxu1 }
 0x2bb   :  { %v1284_v53 = vpop.f32.mrb[81].mxu1  ;;  %v1607_v55 = vadd.f32 %v2783_v59, %v1282_v52 }
 0x2bc   :  { %v1285_v54 = vpop.f32.mrb[82].mxu1 }
 0x2bd   :  { %v1608_v29 = vadd.f32 %v2783_v59, %v1285_v54  ;;  %v1287_v58 = vpop.f32.mrb[83].mxu1 }
 0x2bf   :  { %v2239_v60 = vpack.c.bf16 %v1608_v29, %v1607_v55 }
 0x2c1   :  { %2307 = vst [vmem:[#allocation9 + $0xb0] sm:$0xff] %v2239_v60  }
 0x2c2   :  { %v1290_v61 = vpop.f32.mrb[84].mxu1 }
 0x2c3   :  { %v1292_v62 = vpop.f32.mrb[85].mxu1  ;;  %v1609_v1 = vadd.f32 %v2783_v59, %v1290_v61 }
 0x2c4   :  { %v1293_v63 = vpop.f32.mrb[86].mxu1 }
 0x2c5   :  { %v1610_v2 = vadd.f32 %v2783_v59, %v1293_v63  ;;  %v1295_v3 = vpop.f32.mrb[87].mxu1 }
 0x2c7   :  { %v2244_v4 = vpack.c.bf16 %v1610_v2, %v1609_v1 }
 0x2c9   :  { %2308 = vst [vmem:[#allocation9 + $0xb8] sm:$0xff] %v2244_v4  }
 0x2ca   :  { %v1298_v5 = vpop.f32.mrb[88].mxu1 }
 0x2cb   :  { %v1300_v6 = vpop.f32.mrb[89].mxu1  ;;  %v1611_v8 = vadd.f32 %v2783_v59, %v1298_v5 }
 0x2cc   :  { %v1301_v7 = vpop.f32.mrb[90].mxu1 }
 0x2cd   :  { %v1612_v9 = vadd.f32 %v2783_v59, %v1301_v7  ;;  %v1303_v10 = vpop.f32.mrb[91].mxu1 }
 0x2cf   :  { %v2249_v11 = vpack.c.bf16 %v1612_v9, %v1611_v8 }
 0x2d1   :  { %2309 = vst [vmem:[#allocation9 + $0xc0] sm:$0xff] %v2249_v11  }
 0x2d2   :  { %v1306_v14 = vpop.f32.mrb[92].mxu1 }
 0x2d3   :  { %v1308_v0 = vpop.f32.mrb[93].mxu1  ;;  %v1613_v16 = vadd.f32 %v2783_v59, %v1306_v14 }
 0x2d4   :  { %v1309_v15 = vpop.f32.mrb[94].mxu1 }
 0x2d5   :  { %v1614_v17 = vadd.f32 %v2783_v59, %v1309_v15  ;;  %v1311_v18 = vpop.f32.mrb[95].mxu1 }
 0x2d7   :  { %v2254_v19 = vpack.c.bf16 %v1614_v17, %v1613_v16 }
 0x2d9   :  { %2310 = vst [vmem:[#allocation9 + $0xc8] sm:$0xff] %v2254_v19  }
 0x2da   :  { %v1314_v20 = vpop.f32.mrb[96].mxu1 }
 0x2db   :  { %v1316_v21 = vpop.f32.mrb[97].mxu1  ;;  %v1615_v23 = vadd.f32 %v2783_v59, %v1314_v20 }
 0x2dc   :  { %v1317_v22 = vpop.f32.mrb[98].mxu1 }
 0x2dd   :  { %v1616_v24 = vadd.f32 %v2783_v59, %v1317_v22  ;;  %v1319_v25 = vpop.f32.mrb[99].mxu1 }
 0x2df   :  { %v2259_v26 = vpack.c.bf16 %v1616_v24, %v1615_v23 }
 0x2e1   :  { %2311 = vst [vmem:[#allocation9 + $0xd0] sm:$0xff] %v2259_v26  }
 0x2e2   :  { %v1322_v27 = vpop.f32.mrb[100].mxu1 }
 0x2e3   :  { %v1324_v28 = vpop.f32.mrb[101].mxu1  ;;  %v1617_v13 = vadd.f32 %v2783_v59, %v1322_v27 }
 0x2e4   :  { %v1325_v31 = vpop.f32.mrb[102].mxu1 }
 0x2e5   :  { %v1618_v32 = vadd.f32 %v2783_v59, %v1325_v31  ;;  %v1327_v33 = vpop.f32.mrb[103].mxu1 }
 0x2e7   :  { %v2264_v34 = vpack.c.bf16 %v1618_v32, %v1617_v13 }
 0x2e9   :  { %2312 = vst [vmem:[#allocation9 + $0xd8] sm:$0xff] %v2264_v34  }
 0x2ea   :  { %v1330_v35 = vpop.f32.mrb[104].mxu1 }
 0x2eb   :  { %v1332_v36 = vpop.f32.mrb[105].mxu1  ;;  %v1619_v38 = vadd.f32 %v2783_v59, %v1330_v35 }
 0x2ec   :  { %v1333_v37 = vpop.f32.mrb[106].mxu1 }
 0x2ed   :  { %v1620_v39 = vadd.f32 %v2783_v59, %v1333_v37  ;;  %v1335_v40 = vpop.f32.mrb[107].mxu1 }
 0x2ef   :  { %v2269_v41 = vpack.c.bf16 %v1620_v39, %v1619_v38 }
 0x2f1   :  { %2313 = vst [vmem:[#allocation9 + $0xe0] sm:$0xff] %v2269_v41  }
 0x2f2   :  { %v1338_v12 = vpop.f32.mrb[108].mxu1 }
 0x2f3   :  { %v1340_v42 = vpop.f32.mrb[109].mxu1  ;;  %v1621_v30 = vadd.f32 %v2783_v59, %v1338_v12 }
 0x2f4   :  { %v1341_v43 = vpop.f32.mrb[110].mxu1 }
 0x2f5   :  { %v1622_v44 = vadd.f32 %v2783_v59, %v1341_v43  ;;  %v1343_v45 = vpop.f32.mrb[111].mxu1 }
 0x2f7   :  { %v2274_v56 = vpack.c.bf16 %v1622_v44, %v1621_v30 }
 0x2f9   :  { %2314 = vst [vmem:[#allocation9 + $0xe8] sm:$0xff] %v2274_v56  }
 0x2fa   :  { %v1346_v46 = vpop.f32.mrb[112].mxu1 }
 0x2fb   :  { %v1348_v47 = vpop.f32.mrb[113].mxu1  ;;  %v1623_v48 = vadd.f32 %v2783_v59, %v1346_v46 }
 0x2fc   :  { %v1349_v57 = vpop.f32.mrb[114].mxu1 }
 0x2fd   :  { %v1624_v49 = vadd.f32 %v2783_v59, %v1349_v57  ;;  %v1351_v50 = vpop.f32.mrb[115].mxu1 }
 0x2ff   :  { %v2279_v51 = vpack.c.bf16 %v1624_v49, %v1623_v48 }
 0x301   :  { %2315 = vst [vmem:[#allocation9 + $0xf0] sm:$0xff] %v2279_v51  }
 0x302   :  { %v1354_v52 = vpop.f32.mrb[116].mxu1 }
 0x303   :  { %v1356_v53 = vpop.f32.mrb[117].mxu1  ;;  %v1625_v55 = vadd.f32 %v2783_v59, %v1354_v52 }
 0x304   :  { %v1357_v54 = vpop.f32.mrb[118].mxu1 }
 0x305   :  { %v1626_v29 = vadd.f32 %v2783_v59, %v1357_v54  ;;  %v1359_v58 = vpop.f32.mrb[119].mxu1 }
 0x307   :  { %v2284_v60 = vpack.c.bf16 %v1626_v29, %v1625_v55 }
 0x309   :  { %2316 = vst [vmem:[#allocation9 + $0xf8] sm:$0xff] %v2284_v60  }
 0x30a   :  { %2475 = shalt.err (!%p2472_p0)
}
 0x30b   :  { %s2476_s12 = scalar_lea.hbm %s2877_s5, 4096 }
 0x30c   :  { %p2477_p1 = scmp.ne.s32.totalorder %s2877_s5, %s2476_s12  ;;  %p2480_p2 = scmp.lt.u32.totalorder %s2476_s12, %s2877_s5 }
 0x30e   :  { %p2482_p3 = pnand %p2480_p2, %p2477_p1 }
 0x310   :  { %2485 = shalt.err (!%p2482_p3)
}
 0x311   :  { %1958 = dma.vmem_to_hbm [thread:$0]  %s1953_s8, 4096, %s2877_s5, [#allocation5], %s2497_s0, %s2497_s0, %s2498_s21  }
 0x312   :  { %2490 = dma.done.wait [#allocation5], 4096  }
 0x313   :  { %2491 = vsyncadd [#allocation5], 4294963200 }
 0x314   :  { %1962 = vsyncpa [#allocation4], 1 }
 0x315   :  { %1963 = vsyncpa [#allocation7], 1 }
 0x316   :  { %1964 = vsyncpa [#allocation5], 1 }

</bundles_post_ra>
